<compile_context>
chip_gen: v7x
topology: tpu7x:2x2x1
jax: 0.10.0
libtpu: 0.0.40
codegen_flags: <defaults>
</compile_context>

<pallas_src>
import functools

import jax
import jax.numpy as jnp
from jax.experimental import pallas as pl
from jax.experimental.pallas import tpu as pltpu


def _round_up(x, m):
    return ((x + m - 1) // m) * m


def _vmem_estimate(tv, dp, cb):
    """Rough per-step VMEM footprint in bytes (double-buffered tiles + zp)."""
    return (2 * tv * dp * 4          # zv tile, f32, double-buffered
            + 2 * cb * dp * dp * 2   # P tile, bf16, double-buffered
            + 2 * cb * tv * 4        # out tile, f32, double-buffered
            + tv * cb * dp * 4)      # zp intermediate, f32


# ----------------------------- Pallas kernel ------------------------------ #
def _proj_scores_kernel(zv_ref, p_ref, out_ref, *, cb, dp, eps):
    """One grid step: `cb` classes x one tile of validation rows.

    zv_ref : (tv, dp)      f32  validation features (zero-padded feature cols)
    p_ref  : (cb*dp, dp)   bf16 cb projection matrices stacked along rows
    out_ref: (cb, tv)      f32  per-class clamped inner-product scores
    """
    zv = zv_ref[...]                                   # (tv, dp) f32 for epilogue
    zv_lo = zv.astype(jnp.bfloat16)                    # bf16 operand for the MXU
    # zp[:, c*dp:(c+1)*dp] = zv @ P_c^T == zv @ P_c  (each P_c is symmetric)
    zp = jax.lax.dot_general(
        zv_lo, p_ref[...],
        dimension_numbers=(((1,), (1,)), ((), ())),
        preferred_element_type=jnp.float32)            # (tv, cb*dp) f32

    eps2 = eps * eps
    for c in range(cb):  # static unroll; slices are 128-lane aligned (dp % 128 == 0)
        zpc = zp[:, c * dp:(c + 1) * dp]               # (tv, dp) f32
        sumsq = jnp.sum(zpc * zpc, axis=1)             # (tv,)
        # 1 / max(||zp||, eps) == rsqrt(max(||zp||^2, eps^2))  -> EUP slot
        inv_norm = jax.lax.rsqrt(jnp.maximum(sumsq, eps2))
        # sum(relu(zv * (zpc * inv_norm))) == inv_norm * sum(relu(zv * zpc))
        relu_ip = jnp.sum(jnp.maximum(zv * zpc, 0.0), axis=1)
        out_ref[c, :] = relu_ip * inv_norm             # lane-dense row store


def class_projection_scores(z_validation, proj_matrices, eps,
                            *, class_block=8, val_block=512):
    """Returns (n_classes, n_val) un-normalized per-class scores."""
    n_val, d = z_validation.shape
    n_classes = proj_matrices.shape[0]

    dp = _round_up(d, 128)                       # lane-align per-class slices
    cb = _round_up(max(8, int(class_block)), 8)  # keep the (cb, tv) block sublane-legal
    n_classes_pad = _round_up(n_classes, cb)
    n_class_tiles = n_classes_pad // cb

    # Lane-dense output: pad n_val to a multiple of 128 even for small batches.
    n_val_pad = _round_up(n_val, 128)
    tv_cap = min(_round_up(int(val_block), 128), n_val_pad)
    if n_class_tiles == 1 and n_val_pad >= 256:
        # Give the megacore (v7x, 2 TCs) at least two grid points along val.
        tv_cap = min(tv_cap, max(128, (n_val_pad // 2) // 128 * 128))

    budget = 30 << 20  # stay under the default scoped VMEM limit when possible
    tv = 128
    for cand in range(tv_cap, 127, -128):
        if n_val_pad % cand == 0 and _vmem_estimate(cand, dp, cb) <= budget:
            tv = cand
            break
    n_val_tiles = n_val_pad // tv

    # Operands: f32 zv (needed for the f32 epilogue), bf16 P (halves DMA/VMEM).
    zv = jnp.zeros((n_val_pad, dp), jnp.float32)
    zv = zv.at[:n_val, :d].set(z_validation.astype(jnp.float32))
    P = jnp.zeros((n_classes_pad, dp, dp), jnp.bfloat16)
    P = P.at[:n_classes, :d, :d].set(proj_matrices.astype(jnp.bfloat16))
    P_flat = P.reshape(n_classes_pad * dp, dp)   # contiguous; no host transpose

    # Choose grid order from an HBM-traffic estimate.
    zv_bytes = n_val_pad * dp * 4
    p_bytes = n_classes_pad * dp * dp * 2
    class_outer = (p_bytes + n_class_tiles * zv_bytes
                   <= zv_bytes + n_val_tiles * p_bytes)

    if class_outer:   # P block resident per outer step, zv streams (inner axis)
        grid = (n_class_tiles, n_val_tiles)
        zv_spec = pl.BlockSpec((tv, dp), lambda j, i: (i, 0))
        p_spec = pl.BlockSpec((cb * dp, dp), lambda j, i: (j, 0))
        out_spec = pl.BlockSpec((cb, tv), lambda j, i: (j, i))
    else:             # zv block resident per outer step, P streams (inner axis)
        grid = (n_val_tiles, n_class_tiles)
        zv_spec = pl.BlockSpec((tv, dp), lambda i, j: (i, 0))
        p_spec = pl.BlockSpec((cb * dp, dp), lambda i, j: (j, 0))
        out_spec = pl.BlockSpec((cb, tv), lambda i, j: (j, i))

    estimate = _vmem_estimate(tv, dp, cb)
    cp_kwargs = dict(dimension_semantics=("parallel", "parallel"))
    if estimate > (30 << 20):
        # Big-dp regime: raise the scoped limit (capped under v7x's 64 MiB physical).
        cp_kwargs["vmem_limit_bytes"] = min(int(estimate * 1.25), 56 << 20)

    out = pl.pallas_call(
        functools.partial(_proj_scores_kernel, cb=cb, dp=dp, eps=float(eps)),
        out_shape=jax.ShapeDtypeStruct((n_classes_pad, n_val_pad), jnp.float32),
        grid=grid,
        in_specs=[zv_spec, p_spec],
        out_specs=out_spec,
        compiler_params=pltpu.CompilerParams(**cp_kwargs),
    )(zv, P_flat)
    return out[:n_classes, :n_val]                   # (n_classes, n_val)


# ------------------------------ OLE-GRSV ---------------------------------- #
class OLEGRSVPallas:
    """JAX/Pallas port of OLEGRSV.forward (default class_loss = NLL of gathered prob)."""

    def __init__(self, classes, l=1.0, delta=1.0, eigThresh=1e-6,
                 min_singular_value_fraction=0.1):
        self.classes = jnp.asarray(classes, dtype=jnp.float32)
        self.n_classes = int(self.classes.shape[0])
        self.l = float(l)
        self.delta = float(delta)
        self.eigThresh = float(eigThresh)
        self.min_frac = float(min_singular_value_fraction)

    def _per_class_svd(self, z_geometry, y_geometry):
        """Static-shape emulation of the per-class SVD + filtering.

        Rows not belonging to class c are zeroed (adds only exact-zero singular
        values, which the eigThresh filter discards), so the retained right
        singular vectors match torch.svd(z_geometry[class_indices]).
        """
        yf = y_geometry.astype(jnp.float32)

        def one(c):
            mask = (yf == c).astype(z_geometry.dtype)                 # (N,)
            Zc = z_geometry * mask[:, None]                           # (N, d)
            _, S, Vh = jnp.linalg.svd(Zc, full_matrices=False)        # S: (k,)
            valid = S >= self.eigThresh
            any_valid = jnp.any(valid)
            nuclear = jnp.sum(jnp.where(valid, S, 0.0))
            smax = jnp.max(jnp.where(valid, S, 0.0))
            frac_valid = valid & (S >= self.min_frac * smax)
            u = Vh.T * frac_valid[None, :].astype(z_geometry.dtype)   # (d, k)
            P = u @ u.T                                               # (d, d)
            # TODO(synk): the torch code appends torch.zeros(n_classes) for an
            # empty/degenerate class (a dim bug when n_val != n_classes); here a
            # zero projection matrix yields a zero score row of length n_val.
            P = jnp.where(any_valid, P, jnp.zeros_like(P))
            return P, nuclear, any_valid

        Ps, nucs, anys = jax.vmap(one)(self.classes)
        return Ps, nucs, anys

    def forward(self, z_geometry, y_geometry, z_validation, y_validation):
        z_geometry = z_geometry.astype(jnp.float32)
        z_validation = z_validation.astype(jnp.float32)

        # --- predict(): per-class projection scores (Pallas hot path) ---
        Ps, nucs, anys = self._per_class_svd(z_geometry, y_geometry)
        projs = class_projection_scores(z_validation, Ps, self.eigThresh)  # (C, n_val)
        projs = projs / jnp.sum(projs, axis=0, keepdims=True)
        y_pred_c = projs.T                                                  # (n_val, C)

        # --- default class loss: -mean(log(prob of true label)) ---
        n_val = y_pred_c.shape[0]
        picked = y_pred_c[jnp.arange(n_val), y_validation]
        class_obj = -jnp.mean(jnp.log(picked))

        # --- _OLE.forward objective ---
        per_class_obj = jnp.where(
            anys, jnp.where(nucs > self.delta, nucs, self.delta), 0.0)
        obj_c = jnp.sum(per_class_obj)
        s_full = jnp.linalg.svd(z_geometry, compute_uv=False)
        N = z_geometry.shape[0]
        ole_obj = (obj_c - jnp.sum(s_full)) / N

        return ole_obj + self.l * class_obj


# --------------------------------- main ------------------------------------ #
if __name__ == "__main__":
    n_classes = 4
    d = 32
    n_geo = 16
    n_val = 8

    key = jax.random.PRNGKey(0)
    k1, k2, k3 = jax.random.split(key, 3)
    z_geometry = jax.random.normal(k1, (n_geo, d), dtype=jnp.float32)
    y_geometry = jnp.arange(n_geo, dtype=jnp.int32) % n_classes  # every class present
    z_validation = jax.random.normal(k2, (n_val, d), dtype=jnp.float32)
    y_validation = jax.random.randint(k3, (n_val,), 0, n_classes, dtype=jnp.int32)

    module = OLEGRSVPallas(classes=list(range(n_classes)),
                           l=1.0, delta=1.0, eigThresh=1e-6,
                           min_singular_value_fraction=0.1)

    loss = module.forward(z_geometry, y_geometry, z_validation, y_validation)
    jax.block_until_ready(loss)
    assert jnp.isfinite(loss), "loss is not finite"
    print("KERNEL_OK")
</pallas_src>

<mosaic_0001>
module attributes {stable_mosaic.version = 11 : i64} {
  func.func @_proj_scores_kernel(%arg0: i32, %arg1: i32, %arg2: memref<128x128xf32, #tpu.memory_space<vmem>>, %arg3: memref<1024x128xbf16, #tpu.memory_space<vmem>>, %arg4: memref<8x128xf32, #tpu.memory_space<vmem>>) attributes {dimension_semantics = [#tpu.dimension_semantics<parallel>, #tpu.dimension_semantics<parallel>], iteration_bounds = array<i64: 1, 1>, scalar_prefetch = 0 : i64, scratch_operands = 0 : i64, tpu.core_type = #tpu.core_type<tc>, window_params = [{transform_indices = @transform_0, window_bounds = array<i64: 128, 128>}, {transform_indices = @transform_1, window_bounds = array<i64: 1024, 128>}, {transform_indices = @transform_2, window_bounds = array<i64: 8, 128>}]} {
    %c0 = arith.constant 0 : index
    %c0_0 = arith.constant 0 : index
    %0 = vector.load %arg2[%c0, %c0_0] : memref<128x128xf32, #tpu.memory_space<vmem>>, vector<128x128xf32>
    %1 = arith.truncf %0 : vector<128x128xf32> to vector<128x128xbf16>
    %c0_1 = arith.constant 0 : index
    %c0_2 = arith.constant 0 : index
    %2 = vector.load %arg3[%c0_1, %c0_2] : memref<1024x128xbf16, #tpu.memory_space<vmem>>, vector<1024x128xbf16>
    %cst = arith.constant dense<0.000000e+00> : vector<128x1024xf32>
    %3 = tpu.matmul %1, %2, %cst {dimension_numbers = #tpu.dot_dimension_numbers<[1], [1], [0], [0], [0, 0, 1, 0], [], []>} : vector<128x128xbf16>, vector<1024x128xbf16>, vector<128x1024xf32> -> vector<128x1024xf32>
    %4 = vector.extract_strided_slice %3 {offsets = [0, 0], sizes = [128, 128], strides = [1, 1]} : vector<128x1024xf32> to vector<128x128xf32>
    %5 = arith.mulf %4, %4 : vector<128x128xf32>
    %cst_3 = arith.constant dense<0.000000e+00> : vector<128xf32>
    %6 = vector.multi_reduction <add>, %5, %cst_3 [1] : vector<128x128xf32> to vector<128xf32>
    %cst_4 = arith.constant 9.99999996E-13 : f32
    %7 = vector.broadcast %cst_4 : f32 to vector<128xf32>
    %8 = arith.maximumf %6, %7 : vector<128xf32>
    %9 = math.rsqrt %8 : vector<128xf32>
    %10 = arith.mulf %0, %4 : vector<128x128xf32>
    %cst_5 = arith.constant 0.000000e+00 : f32
    %11 = vector.broadcast %cst_5 : f32 to vector<128x128xf32>
    %12 = arith.maximumf %10, %11 : vector<128x128xf32>
    %cst_6 = arith.constant dense<0.000000e+00> : vector<128xf32>
    %13 = vector.multi_reduction <add>, %12, %cst_6 [1] : vector<128x128xf32> to vector<128xf32>
    %14 = arith.mulf %13, %9 : vector<128xf32>
    %c0_7 = arith.constant 0 : index
    %c0_8 = arith.constant 0 : index
    %15 = vector.load %arg4[%c0_7, %c0_8] : memref<8x128xf32, #tpu.memory_space<vmem>>, vector<1x128xf32>
    %16 = vector.shape_cast %15 : vector<1x128xf32> to vector<128xf32>
    %17 = vector.shape_cast %14 : vector<128xf32> to vector<1x128xf32>
    tpu.vector_store %arg4[%c0_7, %c0_8], %17 {strides = array<i32>} : memref<8x128xf32, #tpu.memory_space<vmem>>, vector<1x128xf32>,
    %18 = vector.extract_strided_slice %3 {offsets = [0, 128], sizes = [128, 128], strides = [1, 1]} : vector<128x1024xf32> to vector<128x128xf32>
    %19 = arith.mulf %18, %18 : vector<128x128xf32>
    %cst_9 = arith.constant dense<0.000000e+00> : vector<128xf32>
    %20 = vector.multi_reduction <add>, %19, %cst_9 [1] : vector<128x128xf32> to vector<128xf32>
    %cst_10 = arith.constant 9.99999996E-13 : f32
    %21 = vector.broadcast %cst_10 : f32 to vector<128xf32>
    %22 = arith.maximumf %20, %21 : vector<128xf32>
    %23 = math.rsqrt %22 : vector<128xf32>
    %24 = arith.mulf %0, %18 : vector<128x128xf32>
    %cst_11 = arith.constant 0.000000e+00 : f32
    %25 = vector.broadcast %cst_11 : f32 to vector<128x128xf32>
    %26 = arith.maximumf %24, %25 : vector<128x128xf32>
    %cst_12 = arith.constant dense<0.000000e+00> : vector<128xf32>
    %27 = vector.multi_reduction <add>, %26, %cst_12 [1] : vector<128x128xf32> to vector<128xf32>
    %28 = arith.mulf %27, %23 : vector<128xf32>
    %c1 = arith.constant 1 : index
    %c0_13 = arith.constant 0 : index
    %29 = vector.load %arg4[%c1, %c0_13] : memref<8x128xf32, #tpu.memory_space<vmem>>, vector<1x128xf32>
    %30 = vector.shape_cast %29 : vector<1x128xf32> to vector<128xf32>
    %31 = vector.shape_cast %28 : vector<128xf32> to vector<1x128xf32>
    tpu.vector_store %arg4[%c1, %c0_13], %31 {strides = array<i32>} : memref<8x128xf32, #tpu.memory_space<vmem>>, vector<1x128xf32>,
    %32 = vector.extract_strided_slice %3 {offsets = [0, 256], sizes = [128, 128], strides = [1, 1]} : vector<128x1024xf32> to vector<128x128xf32>
    %33 = arith.mulf %32, %32 : vector<128x128xf32>
    %cst_14 = arith.constant dense<0.000000e+00> : vector<128xf32>
    %34 = vector.multi_reduction <add>, %33, %cst_14 [1] : vector<128x128xf32> to vector<128xf32>
    %cst_15 = arith.constant 9.99999996E-13 : f32
    %35 = vector.broadcast %cst_15 : f32 to vector<128xf32>
    %36 = arith.maximumf %34, %35 : vector<128xf32>
    %37 = math.rsqrt %36 : vector<128xf32>
    %38 = arith.mulf %0, %32 : vector<128x128xf32>
    %cst_16 = arith.constant 0.000000e+00 : f32
    %39 = vector.broadcast %cst_16 : f32 to vector<128x128xf32>
    %40 = arith.maximumf %38, %39 : vector<128x128xf32>
    %cst_17 = arith.constant dense<0.000000e+00> : vector<128xf32>
    %41 = vector.multi_reduction <add>, %40, %cst_17 [1] : vector<128x128xf32> to vector<128xf32>
    %42 = arith.mulf %41, %37 : vector<128xf32>
    %c2 = arith.constant 2 : index
    %c0_18 = arith.constant 0 : index
    %43 = vector.load %arg4[%c2, %c0_18] : memref<8x128xf32, #tpu.memory_space<vmem>>, vector<1x128xf32>
    %44 = vector.shape_cast %43 : vector<1x128xf32> to vector<128xf32>
    %45 = vector.shape_cast %42 : vector<128xf32> to vector<1x128xf32>
    tpu.vector_store %arg4[%c2, %c0_18], %45 {strides = array<i32>} : memref<8x128xf32, #tpu.memory_space<vmem>>, vector<1x128xf32>,
    %46 = vector.extract_strided_slice %3 {offsets = [0, 384], sizes = [128, 128], strides = [1, 1]} : vector<128x1024xf32> to vector<128x128xf32>
    %47 = arith.mulf %46, %46 : vector<128x128xf32>
    %cst_19 = arith.constant dense<0.000000e+00> : vector<128xf32>
    %48 = vector.multi_reduction <add>, %47, %cst_19 [1] : vector<128x128xf32> to vector<128xf32>
    %cst_20 = arith.constant 9.99999996E-13 : f32
    %49 = vector.broadcast %cst_20 : f32 to vector<128xf32>
    %50 = arith.maximumf %48, %49 : vector<128xf32>
    %51 = math.rsqrt %50 : vector<128xf32>
    %52 = arith.mulf %0, %46 : vector<128x128xf32>
    %cst_21 = arith.constant 0.000000e+00 : f32
    %53 = vector.broadcast %cst_21 : f32 to vector<128x128xf32>
    %54 = arith.maximumf %52, %53 : vector<128x128xf32>
    %cst_22 = arith.constant dense<0.000000e+00> : vector<128xf32>
    %55 = vector.multi_reduction <add>, %54, %cst_22 [1] : vector<128x128xf32> to vector<128xf32>
    %56 = arith.mulf %55, %51 : vector<128xf32>
    %c3 = arith.constant 3 : index
    %c0_23 = arith.constant 0 : index
    %57 = vector.load %arg4[%c3, %c0_23] : memref<8x128xf32, #tpu.memory_space<vmem>>, vector<1x128xf32>
    %58 = vector.shape_cast %57 : vector<1x128xf32> to vector<128xf32>
    %59 = vector.shape_cast %56 : vector<128xf32> to vector<1x128xf32>
    tpu.vector_store %arg4[%c3, %c0_23], %59 {strides = array<i32>} : memref<8x128xf32, #tpu.memory_space<vmem>>, vector<1x128xf32>,
    %60 = vector.extract_strided_slice %3 {offsets = [0, 512], sizes = [128, 128], strides = [1, 1]} : vector<128x1024xf32> to vector<128x128xf32>
    %61 = arith.mulf %60, %60 : vector<128x128xf32>
    %cst_24 = arith.constant dense<0.000000e+00> : vector<128xf32>
    %62 = vector.multi_reduction <add>, %61, %cst_24 [1] : vector<128x128xf32> to vector<128xf32>
    %cst_25 = arith.constant 9.99999996E-13 : f32
    %63 = vector.broadcast %cst_25 : f32 to vector<128xf32>
    %64 = arith.maximumf %62, %63 : vector<128xf32>
    %65 = math.rsqrt %64 : vector<128xf32>
    %66 = arith.mulf %0, %60 : vector<128x128xf32>
    %cst_26 = arith.constant 0.000000e+00 : f32
    %67 = vector.broadcast %cst_26 : f32 to vector<128x128xf32>
    %68 = arith.maximumf %66, %67 : vector<128x128xf32>
    %cst_27 = arith.constant dense<0.000000e+00> : vector<128xf32>
    %69 = vector.multi_reduction <add>, %68, %cst_27 [1] : vector<128x128xf32> to vector<128xf32>
    %70 = arith.mulf %69, %65 : vector<128xf32>
    %c4 = arith.constant 4 : index
    %c0_28 = arith.constant 0 : index
    %71 = vector.load %arg4[%c4, %c0_28] : memref<8x128xf32, #tpu.memory_space<vmem>>, vector<1x128xf32>
    %72 = vector.shape_cast %71 : vector<1x128xf32> to vector<128xf32>
    %73 = vector.shape_cast %70 : vector<128xf32> to vector<1x128xf32>
    tpu.vector_store %arg4[%c4, %c0_28], %73 {strides = array<i32>} : memref<8x128xf32, #tpu.memory_space<vmem>>, vector<1x128xf32>,
    %74 = vector.extract_strided_slice %3 {offsets = [0, 640], sizes = [128, 128], strides = [1, 1]} : vector<128x1024xf32> to vector<128x128xf32>
    %75 = arith.mulf %74, %74 : vector<128x128xf32>
    %cst_29 = arith.constant dense<0.000000e+00> : vector<128xf32>
    %76 = vector.multi_reduction <add>, %75, %cst_29 [1] : vector<128x128xf32> to vector<128xf32>
    %cst_30 = arith.constant 9.99999996E-13 : f32
    %77 = vector.broadcast %cst_30 : f32 to vector<128xf32>
    %78 = arith.maximumf %76, %77 : vector<128xf32>
    %79 = math.rsqrt %78 : vector<128xf32>
    %80 = arith.mulf %0, %74 : vector<128x128xf32>
    %cst_31 = arith.constant 0.000000e+00 : f32
    %81 = vector.broadcast %cst_31 : f32 to vector<128x128xf32>
    %82 = arith.maximumf %80, %81 : vector<128x128xf32>
    %cst_32 = arith.constant dense<0.000000e+00> : vector<128xf32>
    %83 = vector.multi_reduction <add>, %82, %cst_32 [1] : vector<128x128xf32> to vector<128xf32>
    %84 = arith.mulf %83, %79 : vector<128xf32>
    %c5 = arith.constant 5 : index
    %c0_33 = arith.constant 0 : index
    %85 = vector.load %arg4[%c5, %c0_33] : memref<8x128xf32, #tpu.memory_space<vmem>>, vector<1x128xf32>
    %86 = vector.shape_cast %85 : vector<1x128xf32> to vector<128xf32>
    %87 = vector.shape_cast %84 : vector<128xf32> to vector<1x128xf32>
    tpu.vector_store %arg4[%c5, %c0_33], %87 {strides = array<i32>} : memref<8x128xf32, #tpu.memory_space<vmem>>, vector<1x128xf32>,
    %88 = vector.extract_strided_slice %3 {offsets = [0, 768], sizes = [128, 128], strides = [1, 1]} : vector<128x1024xf32> to vector<128x128xf32>
    %89 = arith.mulf %88, %88 : vector<128x128xf32>
    %cst_34 = arith.constant dense<0.000000e+00> : vector<128xf32>
    %90 = vector.multi_reduction <add>, %89, %cst_34 [1] : vector<128x128xf32> to vector<128xf32>
    %cst_35 = arith.constant 9.99999996E-13 : f32
    %91 = vector.broadcast %cst_35 : f32 to vector<128xf32>
    %92 = arith.maximumf %90, %91 : vector<128xf32>
    %93 = math.rsqrt %92 : vector<128xf32>
    %94 = arith.mulf %0, %88 : vector<128x128xf32>
    %cst_36 = arith.constant 0.000000e+00 : f32
    %95 = vector.broadcast %cst_36 : f32 to vector<128x128xf32>
    %96 = arith.maximumf %94, %95 : vector<128x128xf32>
    %cst_37 = arith.constant dense<0.000000e+00> : vector<128xf32>
    %97 = vector.multi_reduction <add>, %96, %cst_37 [1] : vector<128x128xf32> to vector<128xf32>
    %98 = arith.mulf %97, %93 : vector<128xf32>
    %c6 = arith.constant 6 : index
    %c0_38 = arith.constant 0 : index
    %99 = vector.load %arg4[%c6, %c0_38] : memref<8x128xf32, #tpu.memory_space<vmem>>, vector<1x128xf32>
    %100 = vector.shape_cast %99 : vector<1x128xf32> to vector<128xf32>
    %101 = vector.shape_cast %98 : vector<128xf32> to vector<1x128xf32>
    tpu.vector_store %arg4[%c6, %c0_38], %101 {strides = array<i32>} : memref<8x128xf32, #tpu.memory_space<vmem>>, vector<1x128xf32>,
    %102 = vector.extract_strided_slice %3 {offsets = [0, 896], sizes = [128, 128], strides = [1, 1]} : vector<128x1024xf32> to vector<128x128xf32>
    %103 = arith.mulf %102, %102 : vector<128x128xf32>
    %cst_39 = arith.constant dense<0.000000e+00> : vector<128xf32>
    %104 = vector.multi_reduction <add>, %103, %cst_39 [1] : vector<128x128xf32> to vector<128xf32>
    %cst_40 = arith.constant 9.99999996E-13 : f32
    %105 = vector.broadcast %cst_40 : f32 to vector<128xf32>
    %106 = arith.maximumf %104, %105 : vector<128xf32>
    %107 = math.rsqrt %106 : vector<128xf32>
    %108 = arith.mulf %0, %102 : vector<128x128xf32>
    %cst_41 = arith.constant 0.000000e+00 : f32
    %109 = vector.broadcast %cst_41 : f32 to vector<128x128xf32>
    %110 = arith.maximumf %108, %109 : vector<128x128xf32>
    %cst_42 = arith.constant dense<0.000000e+00> : vector<128xf32>
    %111 = vector.multi_reduction <add>, %110, %cst_42 [1] : vector<128x128xf32> to vector<128xf32>
    %112 = arith.mulf %111, %107 : vector<128xf32>
    %c7 = arith.constant 7 : index
    %c0_43 = arith.constant 0 : index
    %113 = vector.load %arg4[%c7, %c0_43] : memref<8x128xf32, #tpu.memory_space<vmem>>, vector<1x128xf32>
    %114 = vector.shape_cast %113 : vector<1x128xf32> to vector<128xf32>
    %115 = vector.shape_cast %112 : vector<128xf32> to vector<1x128xf32>
    tpu.vector_store %arg4[%c7, %c0_43], %115 {strides = array<i32>} : memref<8x128xf32, #tpu.memory_space<vmem>>, vector<1x128xf32>,
    return
  }
  func.func @transform_0(%arg0: i32, %arg1: i32) -> (i32, i32) {
    %c0_i32 = arith.constant 0 : i32
    %c0_i32_0 = arith.constant 0 : i32
    return %arg1, %c0_i32 : i32, i32
  }
  func.func @transform_1(%arg0: i32, %arg1: i32) -> (i32, i32) {
    %c0_i32 = arith.constant 0 : i32
    %c0_i32_0 = arith.constant 0 : i32
    return %arg0, %c0_i32 : i32, i32
  }
  func.func @transform_2(%arg0: i32, %arg1: i32) -> (i32, i32) {
    %c0_i32 = arith.constant 0 : i32
    return %arg0, %arg1 : i32, i32
  }
}

</mosaic_0001>

<bundles_post_ra>
// kernel: tpu_custom_call.1
= control target key start
LH: loop header
LB: loop body
LE: loop exit
PB: predicated region body
PF: predicated region fallthrough
CT: control target
= control target key end

     0   :  { %7 = vsyncpa [#allocation3], 0  ;;  %s5230_s0 = inlined_call_operand.hbm [shape: f32[128,128], index: 0, kind: input, shape index: {}]   ;;  %s5231_s1 = inlined_call_operand.hbm [shape: bf16[1024,128], index: 1, kind: input, shape index: {}]   ;;  %s5232_s2 = inlined_call_operand.hbm [shape: f32[8,128], index: 2, kind: output, shape index: {}]  }
   0x1   :  { %8 = vsyncpa [#allocation6], 0 }
   0x2   :  { %9 = vsyncpa [#allocation4], 0  ;;  %s3748_s9 = smov [#allocation2]   ;;  %s3676_s13 = scalar_lea.hbm %s5230_s0, 2048 }
   0x3   :  { %s15_s10 = sshll.u32 %s3748_s9, 4  ;;  %p3677_p0 = scmp.ne.s32.totalorder %s5230_s0, %s3676_s13  ;;  %s16_s10 = int_to_ptr.vmem [resolvable:$true] %s15_s10 }
   0x4   :  { %p3680_p1 = scmp.lt.u32.totalorder %s3676_s13, %s5230_s0 }
   0x6   :  { %p3682_p2 = pnand %p3680_p1, %p3677_p0 }
   0x8   :  { %3685 = shalt.err (!%p3682_p2)
}
   0x9   :  { %s3686_s18 = scalar_lea.vmem %s16_s10, 2048  ;;  %p3691_p4 = scmp.lt.s32.totalorder %s16_s10, %s16_s10 }
   0xa   :  { %p3687_p3 = scmp.ne.s32.totalorder %s16_s10, %s3686_s18  ;;  %p3692_p5 = scmp.lt.s32.totalorder %s3686_s18, %s3686_s18 }
   0xc   :  { %p3693_p6 = por %p3692_p5, %p3691_p4 }
   0xe   :  { %p3694_p7 = pnand %p3693_p6, %p3687_p3 }
  0x10   :  { %3697 = shalt.err (!%p3694_p7)
}
  0x11   :  { %s3749_s19 = smov 128   ;;  %s3750_s20 = smov 8  }
  0x12   :  { %21 = dma.hbm_to_vmem [thread:$0]  %s5230_s0, 2048, %s16_s10, [#allocation3], %s3749_s19, %s3749_s19, %s3750_s20  }
  0x13   :  { %s3751_s23 = smov [#allocation5]   ;;  %s3698_s27 = scalar_lea.hbm %s5231_s1, 8192 }
  0x14   :  { %s27_s24 = sshll.u32 %s3751_s23, 4  ;;  %p3699_p8 = scmp.ne.s32.totalorder %s5231_s1, %s3698_s27  ;;  %s28_s24 = int_to_ptr.vmem [resolvable:$true] %s27_s24 }
  0x15   :  { %p3702_p9 = scmp.lt.u32.totalorder %s3698_s27, %s5231_s1 }
  0x17   :  { %p3704_p10 = pnand %p3702_p9, %p3699_p8 }
  0x19   :  { %3707 = shalt.err (!%p3704_p10)
}
  0x1a   :  { %s3708_s4 = scalar_lea.vmem %s28_s24, 8192  ;;  %p3713_p12 = scmp.lt.s32.totalorder %s28_s24, %s28_s24 }
  0x1b   :  { %p3709_p11 = scmp.ne.s32.totalorder %s28_s24, %s3708_s4  ;;  %p3714_p13 = scmp.lt.s32.totalorder %s3708_s4, %s3708_s4 }
  0x1d   :  { %p3715_p0 = por %p3714_p13, %p3713_p12 }
  0x1f   :  { %p3716_p1 = pnand %p3715_p0, %p3709_p11 }
  0x21   :  { %3719 = shalt.err (!%p3716_p1)
}
  0x22   :  { %s3752_s0 = smov 64   ;;  %s3753_s5 = smov 4  }
  0x23   :  { %33 = dma.hbm_to_vmem [thread:$0]  %s5231_s1, 8192, %s28_s24, [#allocation6], %s3752_s0, %s3752_s0, %s3753_s5  }
  0x24   :  { %3742 = dma.done.wait [#allocation3], 2048  }
  0x25   :  { %3743 = vsyncadd [#allocation3], 4294965248 }
  0x26   :  { %3744 = dma.done.wait [#allocation6], 8192  }
  0x27   :  { %3745 = vsyncadd [#allocation6], 4294959104  ;;  %v3332_v0 = vld [vmem:[#allocation5 + $0x40] sm:$0xff]   ;;  %v3336_v4 = vld [vmem:[#allocation5 + $0x48] sm:$0xff]   ;;  %vm1216_vm0 = vcmask 130112   ;;  %vm1223_vm1 = vcmask 195712  }
  0x28   :  { %v3333_v1 = vld [vmem:[#allocation5 + $0xc0] sm:$0xff]   ;;  %3197 = vmatprep.subr.bf16.mxu0 %v3332_v0  ;;  %v3337_v5 = vld [vmem:[#allocation5 + $0xc8] sm:$0xff]   ;;  %v3340_v8 = vld [vmem:[#allocation5 + $0x50] sm:$0xff]   ;;  %vm1230_vm2 = vcmask 261312   ;;  %vm1237_vm3 = vcmask 326912   ;;  %vm1244_vm4 = vcmask 392512  }
  0x29   :  { %v3334_v2 = vld [vmem:[#allocation5] sm:$0xff]   ;;  %3229 = vmatprep.subr.bf16.mxu1 %v3333_v1  ;;  %v3338_v6 = vld [vmem:[#allocation5 + $0x8] sm:$0xff]   ;;  %v3341_v9 = vld [vmem:[#allocation5 + $0xd0] sm:$0xff]   ;;  %vm1251_vm5 = vcmask 458112   ;;  %vm1258_vm6 = vcmask 523712   ;;  %vm1265_vm7 = vcmask 589312  }
  0x2a   :  { %v3335_v3 = vld [vmem:[#allocation5 + $0x80] sm:$0xff]   ;;  %3198 = vmatpush3.bf16.xpose.msra.mxu0 %v3334_v2  ;;  %v3339_v7 = vld [vmem:[#allocation5 + $0x88] sm:$0xff]   ;;  %v3342_v10 = vld [vmem:[#allocation5 + $0x10] sm:$0xff]   ;;  %vm1272_vm8 = vcmask 654912   ;;  %vm1279_vm9 = vcmask 720512   ;;  %vm1286_vm10 = vcmask 786112  }
  0x2b   :  { %3230 = vmatpush3.bf16.xpose.msra.mxu1 %v3335_v3  ;;  %3199 = vmatprep.subr.bf16.mxu0 %v3336_v4  ;;  %v3343_v11 = vld [vmem:[#allocation5 + $0x90] sm:$0xff]   ;;  %v3344_v12 = vld [vmem:[#allocation5 + $0x58] sm:$0xff]   ;;  %v3348_v16 = vld [vmem:[#allocation5 + $0x60] sm:$0xff]   ;;  %vm1293_vm11 = vcmask 851712   ;;  %vm1300_vm12 = vcmask 917312   ;;  %vm1307_vm13 = vcmask 982912  }
  0x2c   :  { %3231 = vmatprep.subr.bf16.mxu1 %v3337_v5  ;;  %v3345_v13 = vld [vmem:[#allocation5 + $0xd8] sm:$0xff]   ;;  %v3349_v17 = vld [vmem:[#allocation5 + $0xe0] sm:$0xff]   ;;  %v3796_v20 = vld [vmem:[#allocation2 + $0x8] sm:$0xff]  ;;  %vm1314_vm14 = vcmask 1048512   ;;  %s3754_s1 = smov [#allocation7]  }
  0x2d   :  { %v3346_v14 = vld [vmem:[#allocation5 + $0x18] sm:$0xff]   ;;  %v3350_v18 = vld [vmem:[#allocation5 + $0x20] sm:$0xff]   ;;  %v3352_v22 = vld [vmem:[#allocation5 + $0x68] sm:$0xff]   ;;  %s3123_s8 = sshll.u32 %s3754_s1, 4  ;;  %s3124_s8 = int_to_ptr.vmem [resolvable:$true] %s3123_s8 }
  0x2e   :  { %v3347_v15 = vld [vmem:[#allocation5 + $0x98] sm:$0xff]   ;;  %v3794_v19 = vld [vmem:[#allocation2] sm:$0xff]  ;;  %v3353_v24 = vld [vmem:[#allocation5 + $0xe8] sm:$0xff]   ;;  %s3720_s9 = scalar_lea.vmem %s3124_s8, 128  ;;  %p3725_p3 = scmp.lt.s32.totalorder %s3124_s8, %s3124_s8 }
  0x2f   :  { %v3351_v21 = vld [vmem:[#allocation5 + $0xa0] sm:$0xff]   ;;  %v3800_v23 = vpack.c.bf16 %v3796_v20, %v3794_v19  ;;  %v3354_v25 = vld [vmem:[#allocation5 + $0x28] sm:$0xff]   ;;  %v3356_v27 = vld [vmem:[#allocation5 + $0x70] sm:$0xff]   ;;  %p3721_p2 = scmp.ne.s32.totalorder %s3124_s8, %s3720_s9  ;;  %p3726_p4 = scmp.lt.s32.totalorder %s3720_s9, %s3720_s9 }
  0x30   :  { %v3355_v26 = vld [vmem:[#allocation5 + $0xa8] sm:$0xff]   ;;  %v3357_v28 = vld [vmem:[#allocation5 + $0xf0] sm:$0xff]   ;;  %v3360_v31 = vld [vmem:[#allocation5 + $0x78] sm:$0xff]  }
  0x31   :  { %3213 = vmatprep.mubr.bf16.mxu0 %v3800_v23  ;;  %3245 = vmatprep.mubr.bf16.mxu1 %v3800_v23  ;;  %v3358_v29 = vld [vmem:[#allocation5 + $0x30] sm:$0xff]   ;;  %v3361_v32 = vld [vmem:[#allocation5 + $0xf8] sm:$0xff]   ;;  %v3364_v35 = vld [vmem:[#allocation5 + $0x140] sm:$0xff]   ;;  %p3727_p5 = por %p3726_p4, %p3725_p3 }
  0x32   :  { %3200 = vmatpush3.bf16.xpose.msra.mxu0 %v3338_v6  ;;  %v3359_v30 = vld [vmem:[#allocation5 + $0xb0] sm:$0xff]   ;;  %v3362_v33 = vld [vmem:[#allocation5 + $0x38] sm:$0xff]   ;;  %v3366_v36 = vld [vmem:[#allocation5 + $0x1c0] sm:$0xff]  }
  0x33   :  { %3232 = vmatpush3.bf16.xpose.msra.mxu1 %v3339_v7  ;;  %3201 = vmatprep.subr.bf16.mxu0 %v3340_v8  ;;  %v3363_v34 = vld [vmem:[#allocation5 + $0xb8] sm:$0xff]   ;;  %v3804_v37 = vld [vmem:[#allocation2 + $0x10] sm:$0xff]  ;;  %v3365_v40 = vld [vmem:[#allocation5 + $0x100] sm:$0xff]   ;;  %p3728_p6 = pnand %p3727_p5, %p3721_p2 }
  0x34   :  { %3233 = vmatprep.subr.bf16.mxu1 %v3341_v9  ;;  %v3806_v38 = vld [vmem:[#allocation2 + $0x18] sm:$0xff]  ;;  %v3367_v41 = vld [vmem:[#allocation5 + $0x180] sm:$0xff]   ;;  %v3368_v42 = vld [vmem:[#allocation5 + $0x148] sm:$0xff]  }
  0x35   :  { %v3810_v39 = vpack.c.bf16 %v3806_v38, %v3804_v37  ;;  %v3370_v43 = vld [vmem:[#allocation5 + $0x1c8] sm:$0xff]   ;;  %v3816_v44 = vld [vmem:[#allocation2 + $0x20] sm:$0xff]  ;;  %v3372_v49 = vld [vmem:[#allocation5 + $0x150] sm:$0xff]  }
  0x36   :  { %v3818_v45 = vld [vmem:[#allocation2 + $0x28] sm:$0xff]  ;;  %v3374_v50 = vld [vmem:[#allocation5 + $0x1d0] sm:$0xff]   ;;  %v3830_v52 = vld [vmem:[#allocation2 + $0x38] sm:$0xff] }
  0x37   :  { %v3822_v46 = vpack.c.bf16 %v3818_v45, %v3816_v44  ;;  %v3369_v47 = vld [vmem:[#allocation5 + $0x108] sm:$0xff]   ;;  %v3828_v51 = vld [vmem:[#allocation2 + $0x30] sm:$0xff]  ;;  %v3840_v56 = vld [vmem:[#allocation2 + $0x40] sm:$0xff] }
  0x38   :  { %v3371_v48 = vld [vmem:[#allocation5 + $0x188] sm:$0xff]   ;;  %v3834_v53 = vpack.c.bf16 %v3830_v52, %v3828_v51  ;;  %v3373_v54 = vld [vmem:[#allocation5 + $0x110] sm:$0xff]   ;;  %v3854_v60 = vld [vmem:[#allocation2 + $0x58] sm:$0xff] }
  0x39   :  { %v3375_v55 = vld [vmem:[#allocation5 + $0x190] sm:$0xff]   ;;  %v3842_v57 = vld [vmem:[#allocation2 + $0x48] sm:$0xff]  ;;  %v53_v62 = vld [vmem:[#allocation2 + $0x60] sm:$0xff] }
  0x3a   :  { %3202 = vmatpush3.bf16.xpose.msra.mxu0 %v3342_v10  ;;  %v3846_v58 = vpack.c.bf16 %v3842_v57, %v3840_v56  ;;  %v3852_v59 = vld [vmem:[#allocation2 + $0x50] sm:$0xff]  ;;  %v54_v63 = vld [vmem:[#allocation2 + $0x68] sm:$0xff]  ;;  %v3376_v1 = vld [vmem:[#allocation5 + $0x158] sm:$0xff]  }
  0x3b   :  { %3234 = vmatpush3.bf16.xpose.msra.mxu1 %v3343_v11  ;;  %3203 = vmatprep.subr.bf16.mxu0 %v3344_v12  ;;  %v3858_v61 = vpack.c.bf16 %v3854_v60, %v3852_v59  ;;  %v3864_v0 = vpack.c.bf16 %v54_v63, %v53_v62  ;;  %v3377_v2 = vld [vmem:[#allocation5 + $0x118] sm:$0xff]   ;;  %v55_v5 = vld [vmem:[#allocation2 + $0x70] sm:$0xff]  ;;  %v3380_v8 = vld [vmem:[#allocation5 + $0x160] sm:$0xff]  }
  0x3c   :  { %3235 = vmatprep.subr.bf16.mxu1 %v3345_v13  ;;  %v3378_v3 = vld [vmem:[#allocation5 + $0x1d8] sm:$0xff]   ;;  %v3381_v9 = vld [vmem:[#allocation5 + $0x120] sm:$0xff]   ;;  %v3384_v12 = vld [vmem:[#allocation5 + $0x168] sm:$0xff]  }
  0x3d   :  { %v3379_v4 = vld [vmem:[#allocation5 + $0x198] sm:$0xff]   ;;  %v3382_v10 = vld [vmem:[#allocation5 + $0x1e0] sm:$0xff]   ;;  %v3385_v13 = vld [vmem:[#allocation5 + $0x128] sm:$0xff]  }
  0x3e   :  { %v56_v6 = vld [vmem:[#allocation2 + $0x78] sm:$0xff]  ;;  %v3383_v11 = vld [vmem:[#allocation5 + $0x1a0] sm:$0xff]  }
  0x3f   :  { %v3872_v7 = vpack.c.bf16 %v56_v6, %v55_v5 }
  0x42   :  { %3204 = vmatpush3.bf16.xpose.msra.mxu0 %v3346_v14  ;;  %v3386_v14 = vld [vmem:[#allocation5 + $0x1e8] sm:$0xff]  }
  0x43   :  { %3236 = vmatpush3.bf16.xpose.msra.mxu1 %v3347_v15  ;;  %3205 = vmatprep.subr.bf16.mxu0 %v3348_v16  ;;  %v3387_v15 = vld [vmem:[#allocation5 + $0x1a8] sm:$0xff]   ;;  %v3388_v16 = vld [vmem:[#allocation5 + $0x170] sm:$0xff]  }
  0x44   :  { %3237 = vmatprep.subr.bf16.mxu1 %v3349_v17  ;;  %v3389_v17 = vld [vmem:[#allocation5 + $0x130] sm:$0xff]  }
  0x4a   :  { %3206 = vmatpush3.bf16.xpose.msra.mxu0 %v3350_v18  ;;  %v3390_v18 = vld [vmem:[#allocation5 + $0x1f0] sm:$0xff]  }
  0x4b   :  { %3238 = vmatpush3.bf16.xpose.msra.mxu1 %v3351_v21  ;;  %3207 = vmatprep.subr.bf16.mxu0 %v3352_v22  ;;  %v3391_v21 = vld [vmem:[#allocation5 + $0x1b0] sm:$0xff]   ;;  %v3392_v22 = vld [vmem:[#allocation5 + $0x178] sm:$0xff]  }
  0x4c   :  { %3239 = vmatprep.subr.bf16.mxu1 %v3353_v24  ;;  %v3393_v24 = vld [vmem:[#allocation5 + $0x138] sm:$0xff]  }
  0x52   :  { %3208 = vmatpush3.bf16.xpose.msra.mxu0 %v3354_v25  ;;  %v3394_v25 = vld [vmem:[#allocation5 + $0x1f8] sm:$0xff]  }
  0x53   :  { %3240 = vmatpush3.bf16.xpose.msra.mxu1 %v3355_v26  ;;  %3209 = vmatprep.subr.bf16.mxu0 %v3356_v27  ;;  %v3395_v26 = vld [vmem:[#allocation5 + $0x1b8] sm:$0xff]  }
  0x54   :  { %3241 = vmatprep.subr.bf16.mxu1 %v3357_v28 }
  0x5a   :  { %3210 = vmatpush3.bf16.xpose.msra.mxu0 %v3358_v29 }
  0x5b   :  { %3242 = vmatpush3.bf16.xpose.msra.mxu1 %v3359_v30  ;;  %3211 = vmatprep.subr.bf16.mxu0 %v3360_v31 }
  0x5c   :  { %3243 = vmatprep.subr.bf16.mxu1 %v3361_v32 }
  0x62   :  { %3212 = vmatpush3.bf16.xpose.msra.mxu0 %v3362_v33 }
  0x63   :  { %3244 = vmatpush3.bf16.xpose.msra.mxu1 %v3363_v34  ;;  %3261 = vmatprep.subr.bf16.mxu0 %v3364_v35 }
  0x64   :  { %3293 = vmatprep.subr.bf16.mxu1 %v3366_v36 }
  0x69   :  { %3214 = vmatmul.mubr.bf16.vlgmr.msra.gmra.mrb[0].mxu0 %v3800_v23 }
  0x6a   :  { %3246 = vmatmul.mubr.bf16.vlgmr.msra.gmra.mrb[0].mxu1 %v3800_v23  ;;  %3215 = vmatprep.mubr.bf16.mxu0 %v3810_v39 }
  0x6b   :  { %3247 = vmatprep.mubr.bf16.mxu1 %v3810_v39  ;;  %3262 = vmatpush3.bf16.xpose.msra.mxu0 %v3365_v40 }
  0x6c   :  { %3294 = vmatpush3.bf16.xpose.msra.mxu1 %v3367_v41  ;;  %3263 = vmatprep.subr.bf16.mxu0 %v3368_v42 }
  0x6d   :  { %3295 = vmatprep.subr.bf16.mxu1 %v3370_v43 }
  0x71   :  { %3216 = vmatmul.mubr.bf16.gmra.mrb[4].mxu0 %v3810_v39 }
  0x72   :  { %3248 = vmatmul.mubr.bf16.gmra.mrb[4].mxu1 %v3810_v39  ;;  %3217 = vmatprep.mubr.bf16.mxu0 %v3822_v46 }
  0x73   :  { %3249 = vmatprep.mubr.bf16.mxu1 %v3822_v46  ;;  %3264 = vmatpush3.bf16.xpose.msra.mxu0 %v3369_v47 }
  0x74   :  { %3296 = vmatpush3.bf16.xpose.msra.mxu1 %v3371_v48  ;;  %3265 = vmatprep.subr.bf16.mxu0 %v3372_v49 }
  0x75   :  { %3297 = vmatprep.subr.bf16.mxu1 %v3374_v50 }
  0x79   :  { %3218 = vmatmul.mubr.bf16.gmra.mrb[8].mxu0 %v3822_v46 }
  0x7a   :  { %3250 = vmatmul.mubr.bf16.gmra.mrb[8].mxu1 %v3822_v46  ;;  %3219 = vmatprep.mubr.bf16.mxu0 %v3834_v53 }
  0x7b   :  { %3251 = vmatprep.mubr.bf16.mxu1 %v3834_v53  ;;  %3266 = vmatpush3.bf16.xpose.msra.mxu0 %v3373_v54 }
  0x7c   :  { %3298 = vmatpush3.bf16.xpose.msra.mxu1 %v3375_v55  ;;  %3267 = vmatprep.subr.bf16.mxu0 %v3376_v1 }
  0x7d   :  { %3299 = vmatprep.subr.bf16.mxu1 %v3378_v3 }
  0x81   :  { %3220 = vmatmul.mubr.bf16.gmra.mrb[12].mxu0 %v3834_v53 }
  0x82   :  { %3252 = vmatmul.mubr.bf16.gmra.mrb[12].mxu1 %v3834_v53  ;;  %3221 = vmatprep.mubr.bf16.mxu0 %v3846_v58 }
  0x83   :  { %3253 = vmatprep.mubr.bf16.mxu1 %v3846_v58  ;;  %3268 = vmatpush3.bf16.xpose.msra.mxu0 %v3377_v2 }
  0x84   :  { %3300 = vmatpush3.bf16.xpose.msra.mxu1 %v3379_v4  ;;  %3269 = vmatprep.subr.bf16.mxu0 %v3380_v8 }
  0x85   :  { %3301 = vmatprep.subr.bf16.mxu1 %v3382_v10 }
  0x89   :  { %3222 = vmatmul.mubr.bf16.gmra.mrb[16].mxu0 %v3846_v58 }
  0x8a   :  { %3254 = vmatmul.mubr.bf16.gmra.mrb[16].mxu1 %v3846_v58  ;;  %3223 = vmatprep.mubr.bf16.mxu0 %v3858_v61 }
  0x8b   :  { %3255 = vmatprep.mubr.bf16.mxu1 %v3858_v61  ;;  %3270 = vmatpush3.bf16.xpose.msra.mxu0 %v3381_v9 }
  0x8c   :  { %3302 = vmatpush3.bf16.xpose.msra.mxu1 %v3383_v11  ;;  %3271 = vmatprep.subr.bf16.mxu0 %v3384_v12 }
  0x8d   :  { %3303 = vmatprep.subr.bf16.mxu1 %v3386_v14 }
  0x91   :  { %3224 = vmatmul.mubr.bf16.gmra.mrb[20].mxu0 %v3858_v61 }
  0x92   :  { %3256 = vmatmul.mubr.bf16.gmra.mrb[20].mxu1 %v3858_v61  ;;  %3225 = vmatprep.mubr.bf16.mxu0 %v3864_v0 }
  0x93   :  { %3257 = vmatprep.mubr.bf16.mxu1 %v3864_v0  ;;  %3272 = vmatpush3.bf16.xpose.msra.mxu0 %v3385_v13 }
  0x94   :  { %3304 = vmatpush3.bf16.xpose.msra.mxu1 %v3387_v15  ;;  %3273 = vmatprep.subr.bf16.mxu0 %v3388_v16 }
  0x95   :  { %3305 = vmatprep.subr.bf16.mxu1 %v3390_v18 }
  0x99   :  { %3226 = vmatmul.mubr.bf16.gmra.mrb[24].mxu0 %v3864_v0 }
  0x9a   :  { %3258 = vmatmul.mubr.bf16.gmra.mrb[24].mxu1 %v3864_v0  ;;  %3227 = vmatprep.mubr.bf16.mxu0 %v3872_v7 }
  0x9b   :  { %3259 = vmatprep.mubr.bf16.mxu1 %v3872_v7  ;;  %3274 = vmatpush3.bf16.xpose.msra.mxu0 %v3389_v17 }
  0x9c   :  { %3306 = vmatpush3.bf16.xpose.msra.mxu1 %v3391_v21  ;;  %3275 = vmatprep.subr.bf16.mxu0 %v3392_v22 }
  0x9d   :  { %3307 = vmatprep.subr.bf16.mxu1 %v3394_v25 }
  0xa1   :  { %3228 = vmatmul.mubr.bf16.gmra.mrb[28].mxu0 %v3872_v7 }
  0xa2   :  { %3260 = vmatmul.mubr.bf16.gmra.mrb[28].mxu1 %v3872_v7  ;;  %3277 = vmatprep.mubr.bf16.mxu0 %v3800_v23 }
  0xa3   :  { %3309 = vmatprep.mubr.bf16.mxu1 %v3800_v23  ;;  %3276 = vmatpush3.bf16.xpose.msra.mxu0 %v3393_v24 }
  0xa4   :  { %3308 = vmatpush3.bf16.xpose.msra.mxu1 %v3395_v26 }
  0xaa   :  { %3278 = vmatmul.mubr.bf16.vlgmr.msra.gmra.mrb[32].mxu0 %v3800_v23 }
  0xab   :  { %3279 = vmatprep.mubr.bf16.mxu0 %v3810_v39  ;;  %3310 = vmatmul.mubr.bf16.vlgmr.msra.gmra.mrb[32].mxu1 %v3800_v23 }
  0xac   :  { %3311 = vmatprep.mubr.bf16.mxu1 %v3810_v39 }
  0xb2   :  { %3280 = vmatmul.mubr.bf16.gmra.mrb[36].mxu0 %v3810_v39 }
  0xb3   :  { %3281 = vmatprep.mubr.bf16.mxu0 %v3822_v46  ;;  %3312 = vmatmul.mubr.bf16.gmra.mrb[36].mxu1 %v3810_v39 }
  0xb4   :  { %3313 = vmatprep.mubr.bf16.mxu1 %v3822_v46 }
  0xba   :  { %3282 = vmatmul.mubr.bf16.gmra.mrb[40].mxu0 %v3822_v46 }
  0xbb   :  { %3283 = vmatprep.mubr.bf16.mxu0 %v3834_v53  ;;  %3314 = vmatmul.mubr.bf16.gmra.mrb[40].mxu1 %v3822_v46 }
  0xbc   :  { %3315 = vmatprep.mubr.bf16.mxu1 %v3834_v53 }
  0xc2   :  { %3284 = vmatmul.mubr.bf16.gmra.mrb[44].mxu0 %v3834_v53 }
  0xc3   :  { %3285 = vmatprep.mubr.bf16.mxu0 %v3846_v58  ;;  %3316 = vmatmul.mubr.bf16.gmra.mrb[44].mxu1 %v3834_v53 }
  0xc4   :  { %3317 = vmatprep.mubr.bf16.mxu1 %v3846_v58 }
  0xca   :  { %3286 = vmatmul.mubr.bf16.gmra.mrb[48].mxu0 %v3846_v58 }
  0xcb   :  { %3287 = vmatprep.mubr.bf16.mxu0 %v3858_v61  ;;  %3318 = vmatmul.mubr.bf16.gmra.mrb[48].mxu1 %v3846_v58 }
  0xcc   :  { %3319 = vmatprep.mubr.bf16.mxu1 %v3858_v61 }
  0xd2   :  { %3288 = vmatmul.mubr.bf16.gmra.mrb[52].mxu0 %v3858_v61 }
  0xd3   :  { %3289 = vmatprep.mubr.bf16.mxu0 %v3864_v0  ;;  %3320 = vmatmul.mubr.bf16.gmra.mrb[52].mxu1 %v3858_v61 }
  0xd4   :  { %3321 = vmatprep.mubr.bf16.mxu1 %v3864_v0 }
  0xda   :  { %3290 = vmatmul.mubr.bf16.gmra.mrb[56].mxu0 %v3864_v0 }
  0xdb   :  { %3291 = vmatprep.mubr.bf16.mxu0 %v3872_v7  ;;  %3322 = vmatmul.mubr.bf16.gmra.mrb[56].mxu1 %v3864_v0 }
  0xdc   :  { %3323 = vmatprep.mubr.bf16.mxu1 %v3872_v7 }
  0xe2   :  { %3292 = vmatmul.mubr.bf16.gmra.mrb[60].mxu0 %v3872_v7 }
  0xe3   :  { %3324 = vmatmul.mubr.bf16.gmra.mrb[60].mxu1 %v3872_v7 }
 0x13c   :  { %v611_v23 = vpop.f32.mrb[0].mxu0 }
 0x13d   :  { %v724_v27 = vpop.f32.mrb[0].mxu1  ;;  %v613_v28 = vpop.f32.mrb[1].mxu0  ;;  %v1029_v29 = vmul.f32 %v611_v23, %v611_v23  ;;  %v1109_v63 = vmul.f32 %v611_v23, %v3794_v19 }
 0x13e   :  { %v726_v30 = vpop.f32.mrb[1].mxu1  ;;  %v615_v31 = vpop.f32.mrb[2].mxu0  ;;  %v1575_v36 = vmul.f32 %v724_v27, %v724_v27  ;;  %v1318_v41 = vmul.f32 %v613_v28, %v613_v28  ;;  %v1655_v10 = vmul.f32 %v724_v27, %v3794_v19  ;;  %v1398_v15 = vmul.f32 %v613_v28, %v3794_v19 }
 0x13f   :  { %v728_v32 = vpop.f32.mrb[2].mxu1  ;;  %1045 = vadd.xlane.f32.xlu0 %v1029_v29  ;;  %v617_v33 = vpop.f32.mrb[3].mxu0  ;;  %v1110_v50 = vmul.f32 %v615_v31, %v3796_v20  ;;  %v1832_v55 = vmul.f32 %v726_v30, %v726_v30  ;;  %v1030_v0 = vmul.f32 %v615_v31, %v615_v31  ;;  %v1125_v11 = vmax.f32 %v1109_v63, 0.0 }
 0x140   :  { %v730_v34 = vpop.f32.mrb[3].mxu1  ;;  %v1576_v35 = vmul.f32 %v728_v32, %v728_v32  ;;  %v1319_v39 = vmul.f32 %v617_v33, %v617_v33  ;;  %v1656_v58 = vmul.f32 %v728_v32, %v3796_v20  ;;  %v1399_v7 = vmul.f32 %v617_v33, %v3796_v20 }
 0x141   :  { %v1833_v53 = vmul.f32 %v730_v34, %v730_v34  ;;  %v1126_v61 = vmax.f32 %v1110_v50, 0.0  ;;  %v1913_v12 = vmul.f32 %v730_v34, %v3796_v20  ;;  %v1671_v16 = vmax.f32 %v1655_v10, 0.0 }
 0x142   :  { %1593 = vadd.xlane.f32.xlu1 %v1576_v35  ;;  %v1672_v8 = vmax.f32 %v1656_v58, 0.0  ;;  %v1415_v13 = vmax.f32 %v1399_v7, 0.0  ;;  %v1912_v23 = vmul.f32 %v726_v30, %v3794_v19  ;;  %v1414_v27 = vmax.f32 %v1398_v15, 0.0 }
 0x143   :  { %1591 = vadd.xlane.f32.xlu0 %v1575_v36  ;;  %v1929_v20 = vmax.f32 %v1913_v12, 0.0 }
 0x144   :  { %v3910_v40 = vpop.f32.mrb[4].mxu0  ;;  %v1928_v31 = vmax.f32 %v1912_v23, 0.0 }
 0x145   :  { %v3912_v42 = vpop.f32.mrb[5].mxu0  ;;  %v3914_v43 = vpop.f32.mrb[4].mxu1  ;;  %v1031_v28 = vmul.f32 %v3910_v40, %v3910_v40  ;;  %v1111_v12 = vmul.f32 %v3910_v40, %v3804_v37 }
 0x146   :  { %1336 = vadd.xlane.f32.xlu1 %v1319_v39  ;;  %v3916_v46 = vpop.f32.mrb[6].mxu0  ;;  %v3918_v47 = vpop.f32.mrb[5].mxu1  ;;  %v1577_v19 = vmul.f32 %v3914_v43, %v3914_v43 }
 0x147   :  { %1334 = vadd.xlane.f32.xlu0 %v1318_v41  ;;  %v3920_v48 = vpop.f32.mrb[7].mxu0  ;;  %v3922_v49 = vpop.f32.mrb[6].mxu1  ;;  %v1032_v39 = vmul.f32 %v3916_v46, %v3916_v46  ;;  %v1112_v15 = vmul.f32 %v3916_v46, %v3806_v38  ;;  %v1127_v23 = vmax.f32 %v1111_v12, 0.0 }
 0x148   :  { %v3925_v54 = vpop.f32.mrb[7].mxu1  ;;  %v1578_v50 = vmul.f32 %v3922_v49, %v3922_v49  ;;  %v1321_v10 = vmul.f32 %v3920_v48, %v3920_v48  ;;  %v1658_v40 = vmul.f32 %v3922_v49, %v3806_v38  ;;  %v1401_v46 = vmul.f32 %v3920_v48, %v3806_v38 }
 0x149   :  { %v1915_v49 = vmul.f32 %v3925_v54, %v3806_v38 }
 0x14a   :  { %1850 = vadd.xlane.f32.xlu1 %v1833_v53 }
 0x14b   :  { %1848 = vadd.xlane.f32.xlu0 %v1832_v55  ;;  %v1320_v55 = vmul.f32 %v3912_v42, %v3912_v42  ;;  %v1931_v48 = vmax.f32 %v1915_v49, 0.0 }
 0x14c   :  { %v3928_v62 = vpop.f32.mrb[8].mxu0 }
 0x14d   :  { %v3931_v1 = vpop.f32.mrb[9].mxu0  ;;  %v3933_v2 = vpop.f32.mrb[8].mxu1 }
 0x14e   :  { %1143 = vadd.xlane.f32.xlu1 %v1126_v61  ;;  %v3935_v3 = vpop.f32.mrb[10].mxu0  ;;  %v3937_v4 = vpop.f32.mrb[9].mxu1 }
 0x14f   :  { %1047 = vadd.xlane.f32.xlu0 %v1030_v0  ;;  %v3939_v5 = vpop.f32.mrb[11].mxu0  ;;  %v3941_v6 = vpop.f32.mrb[10].mxu1 }
 0x150   :  { %v3944_v9 = vpop.f32.mrb[11].mxu1 }
 0x152   :  { %1689 = vadd.xlane.f32.xlu1 %v1672_v8 }
 0x153   :  { %1141 = vadd.xlane.f32.xlu0 %v1125_v11 }
 0x154   :  { %v3948_v14 = vpop.f32.mrb[12].mxu0 }
 0x155   :  { %v3951_v17 = vpop.f32.mrb[13].mxu0  ;;  %v3953_v18 = vpop.f32.mrb[12].mxu1 }
 0x156   :  { %1432 = vadd.xlane.f32.xlu1 %v1415_v13  ;;  %v3955_v21 = vpop.f32.mrb[14].mxu0  ;;  %v3957_v22 = vpop.f32.mrb[13].mxu1  ;;  %v1834_v13 = vmul.f32 %v3918_v47, %v3918_v47 }
 0x157   :  { %1687 = vadd.xlane.f32.xlu0 %v1671_v16  ;;  %v3959_v24 = vpop.f32.mrb[15].mxu0  ;;  %v3961_v25 = vpop.f32.mrb[14].mxu1  ;;  %v1835_v16 = vmul.f32 %v3925_v54, %v3925_v54  ;;  %v1034_v54 = vmul.f32 %v3935_v3, %v3935_v3 }
 0x158   :  { %v3963_v26 = vpop.f32.mrb[15].mxu1 }
 0x15a   :  { %1946 = vadd.xlane.f32.xlu1 %v1929_v20  ;;  %v1657_v20 = vmul.f32 %v3914_v43, %v3804_v37  ;;  %v1914_v43 = vmul.f32 %v3918_v47, %v3804_v37  ;;  %v1579_v47 = vmul.f32 %v3933_v2, %v3933_v2 }
 0x15b   :  { %1430 = vadd.xlane.f32.xlu0 %v1414_v27  ;;  %v1128_v27 = vmax.f32 %v1112_v15, 0.0 }
 0x15c   :  { %v3968_v29 = vpop.f32.mrb[16].mxu0 }
 0x15d   :  { %v3970_v32 = vpop.f32.mrb[17].mxu0  ;;  %v3972_v33 = vpop.f32.mrb[16].mxu1 }
 0x15e   :  { %1049 = vadd.xlane.f32.xlu1 %v1031_v28  ;;  %v3974_v34 = vpop.f32.mrb[18].mxu0  ;;  %v3976_v35 = vpop.f32.mrb[17].mxu1  ;;  %v1400_v28 = vmul.f32 %v3912_v42, %v3804_v37  ;;  %v1033_v42 = vmul.f32 %v3928_v62, %v3928_v62 }
 0x15f   :  { %1944 = vadd.xlane.f32.xlu0 %v1928_v31  ;;  %v3980_v30 = vpop.f32.mrb[19].mxu0  ;;  %v3982_v36 = vpop.f32.mrb[18].mxu1  ;;  %v1673_v31 = vmax.f32 %v1657_v20, 0.0 }
 0x160   :  { %v3986_v41 = vpop.f32.mrb[19].mxu1 }
 0x162   :  { %1051 = vadd.xlane.f32.xlu1 %v1032_v39  ;;  %v1416_v39 = vmax.f32 %v1400_v28, 0.0  ;;  %v1113_v28 = vmul.f32 %v3928_v62, %v3816_v44  ;;  %v1660_v62 = vmul.f32 %v3941_v6, %v3818_v45 }
 0x163   :  { %1595 = vadd.xlane.f32.xlu0 %v1577_v19  ;;  %v1674_v19 = vmax.f32 %v1658_v40, 0.0  ;;  %v1322_v40 = vmul.f32 %v3931_v1, %v3931_v1 }
 0x164   :  { %v3990_v53 = vpop.f32.mrb[20].mxu0 }
 0x165   :  { %v3994_v58 = vpop.f32.mrb[21].mxu0  ;;  %v3996_v61 = vpop.f32.mrb[20].mxu1 }
 0x166   :  { %1597 = vadd.xlane.f32.xlu1 %v1578_v50  ;;  %v3998_v63 = vpop.f32.mrb[22].mxu0  ;;  %v4000_v0 = vpop.f32.mrb[21].mxu1  ;;  %v1417_v50 = vmax.f32 %v1401_v46, 0.0  ;;  %v1114_v46 = vmul.f32 %v3935_v3, %v3818_v45  ;;  %v1403_v3 = vmul.f32 %v3939_v5, %v3818_v45 }
 0x167   :  { %1338 = vadd.xlane.f32.xlu0 %v1320_v55  ;;  %v4002_v7 = vpop.f32.mrb[23].mxu0  ;;  %v4004_v8 = vpop.f32.mrb[22].mxu1  ;;  %v1930_v55 = vmax.f32 %v1914_v43, 0.0  ;;  %v1659_v43 = vmul.f32 %v3933_v2, %v3816_v44  ;;  %v1916_v2 = vmul.f32 %v3937_v4, %v3816_v44 }
 0x168   :  { %v4008_v11 = vpop.f32.mrb[23].mxu1  ;;  %v1130_v49 = vmax.f32 %v1114_v46, 0.0 }
 0x16a   :  { %1340 = vadd.xlane.f32.xlu1 %v1321_v10 }
 0x16b   :  { %1852 = vadd.xlane.f32.xlu0 %v1834_v13 }
 0x16c   :  { %v4032_v10 = vpop.f32.mrb[24].mxu0 }
 0x16d   :  { %v4034_v12 = vpop.f32.mrb[25].mxu0  ;;  %v4044_v13 = vpop.f32.mrb[24].mxu1 }
 0x16e   :  { %1854 = vadd.xlane.f32.xlu1 %v1835_v16  ;;  %v4036_v37 = vpop.f32.mrb[26].mxu0  ;;  %v4046_v15 = vpop.f32.mrb[25].mxu1 }
 0x16f   :  { %1145 = vadd.xlane.f32.xlu0 %v1127_v23  ;;  %v4040_v38 = vpop.f32.mrb[27].mxu0  ;;  %v4048_v16 = vpop.f32.mrb[26].mxu1  ;;  %v1580_v23 = vmul.f32 %v3941_v6, %v3941_v6  ;;  %v1917_v6 = vmul.f32 %v3944_v9, %v3818_v45 }
 0x170   :  { %v4050_v20 = vpop.f32.mrb[27].mxu1 }
 0x172   :  { %1147 = vadd.xlane.f32.xlu1 %v1128_v27  ;;  %v1323_v27 = vmul.f32 %v3939_v5, %v3939_v5  ;;  %v1933_v5 = vmax.f32 %v1917_v6, 0.0 }
 0x173   :  { %1691 = vadd.xlane.f32.xlu0 %v1673_v31  ;;  %v1836_v31 = vmul.f32 %v3937_v4, %v3937_v4  ;;  %v1581_v4 = vmul.f32 %v3953_v18, %v3953_v18 }
 0x176   :  { %1693 = vadd.xlane.f32.xlu1 %v1674_v19  ;;  %v1837_v19 = vmul.f32 %v3944_v9, %v3944_v9  ;;  %v1036_v9 = vmul.f32 %v3955_v21, %v3955_v21 }
 0x177   :  { %1434 = vadd.xlane.f32.xlu0 %v1416_v39  ;;  %v1129_v39 = vmax.f32 %v1113_v28, 0.0 }
 0x17a   :  { %1436 = vadd.xlane.f32.xlu1 %v1417_v50  ;;  %v1402_v50 = vmul.f32 %v3931_v1, %v3816_v44  ;;  %v1035_v1 = vmul.f32 %v3948_v14, %v3948_v14 }
 0x17b   :  { %1948 = vadd.xlane.f32.xlu0 %v1930_v55  ;;  %v1675_v55 = vmax.f32 %v1659_v43, 0.0  ;;  %v1324_v43 = vmul.f32 %v3951_v17, %v3951_v17 }
 0x17e   :  { %1950 = vadd.xlane.f32.xlu1 %v1931_v48  ;;  %v1418_v48 = vmax.f32 %v1402_v50, 0.0  ;;  %v1116_v50 = vmul.f32 %v3955_v21, %v3830_v52  ;;  %v1405_v21 = vmul.f32 %v3959_v24, %v3830_v52 }
 0x17f   :  { %1053 = vadd.xlane.f32.xlu0 %v1033_v42  ;;  %v1676_v42 = vmax.f32 %v1660_v62, 0.0  ;;  %v1115_v62 = vmul.f32 %v3948_v14, %v3828_v51  ;;  %v1662_v14 = vmul.f32 %v3961_v25, %v3830_v52 }
 0x182   :  { %1055 = vadd.xlane.f32.xlu1 %v1034_v54  ;;  %v1932_v54 = vmax.f32 %v1916_v2, 0.0  ;;  %v1132_v2 = vmax.f32 %v1116_v50, 0.0  ;;  %v1326_v50 = vmul.f32 %v3970_v32, %v3970_v32 }
 0x183   :  { %1599 = vadd.xlane.f32.xlu0 %v1579_v47  ;;  %v1419_v47 = vmax.f32 %v1403_v3, 0.0  ;;  %v1661_v3 = vmul.f32 %v3953_v18, %v3828_v51  ;;  %v1918_v18 = vmul.f32 %v3957_v22, %v3828_v51 }
 0x185   :  { %v1677_v6 = vmax.f32 %v1661_v3, 0.0  ;;  %v1117_v3 = vmul.f32 %v3968_v29, %v3840_v56 }
 0x186   :  { %1601 = vadd.xlane.f32.xlu1 %v1580_v23  ;;  %v4080_v23 = vpop.f32.mrb[28].mxu0 }
 0x187   :  { %1342 = vadd.xlane.f32.xlu0 %v1322_v40  ;;  %v4082_v40 = vpop.f32.mrb[29].mxu0 }
 0x188   :  { %v4084_v44 = vpop.f32.mrb[30].mxu0 }
 0x189   :  { %v4088_v45 = vpop.f32.mrb[31].mxu0 }
 0x18a   :  { %1344 = vadd.xlane.f32.xlu1 %v1323_v27  ;;  %v4092_v27 = vpop.f32.mrb[28].mxu1 }
 0x18b   :  { %1856 = vadd.xlane.f32.xlu0 %v1836_v31  ;;  %v4094_v28 = vpop.f32.mrb[29].mxu1 }
 0x18c   :  { %v4096_v31 = vpop.f32.mrb[30].mxu1 }
 0x18d   :  { %v4098_v46 = vpop.f32.mrb[31].mxu1 }
 0x18e   :  { %1858 = vadd.xlane.f32.xlu1 %v1837_v19  ;;  %v1582_v19 = vmul.f32 %v3961_v25, %v3961_v25  ;;  %v1919_v25 = vmul.f32 %v3963_v26, %v3830_v52 }
 0x18f   :  { %1149 = vadd.xlane.f32.xlu0 %v1129_v39  ;;  %v1325_v39 = vmul.f32 %v3959_v24, %v3959_v24 }
 0x190   :  { %v1935_v24 = vmax.f32 %v1919_v25, 0.0  ;;  %v1406_v25 = vmul.f32 %v3970_v32, %v3840_v56 }
 0x192   :  { %1151 = vadd.xlane.f32.xlu1 %v1130_v49  ;;  %v1838_v49 = vmul.f32 %v3957_v22, %v3957_v22  ;;  %v1583_v22 = vmul.f32 %v3972_v33, %v3972_v33 }
 0x193   :  { %1695 = vadd.xlane.f32.xlu0 %v1675_v55  ;;  %v1839_v55 = vmul.f32 %v3963_v26, %v3963_v26  ;;  %v1038_v26 = vmul.f32 %v3974_v34, %v3974_v34 }
 0x196   :  { %1697 = vadd.xlane.f32.xlu1 %v1676_v42  ;;  %v1131_v42 = vmax.f32 %v1115_v62, 0.0 }
 0x197   :  { %1438 = vadd.xlane.f32.xlu0 %v1418_v48  ;;  %v1404_v48 = vmul.f32 %v3951_v17, %v3828_v51  ;;  %v1037_v17 = vmul.f32 %v3968_v29, %v3968_v29  ;;  %v1664_v29 = vmul.f32 %v3982_v36, %v3842_v57 }
 0x19a   :  { %1440 = vadd.xlane.f32.xlu1 %v1419_v47  ;;  %v1678_v47 = vmax.f32 %v1662_v14, 0.0  ;;  %v1118_v14 = vmul.f32 %v3974_v34, %v3842_v57 }
 0x19b   :  { %1952 = vadd.xlane.f32.xlu0 %v1932_v54  ;;  %v1420_v54 = vmax.f32 %v1404_v48, 0.0  ;;  %v1841_v48 = vmul.f32 %v3986_v41, %v3986_v41 }
 0x19e   :  { %1954 = vadd.xlane.f32.xlu1 %v1933_v5  ;;  %v1934_v5 = vmax.f32 %v1918_v18, 0.0 }
 0x19f   :  { %1057 = vadd.xlane.f32.xlu0 %v1035_v1  ;;  %v1421_v1 = vmax.f32 %v1405_v21, 0.0  ;;  %v1133_v21 = vmax.f32 %v1117_v3, 0.0 }
 0x1a2   :  { %1059 = vadd.xlane.f32.xlu1 %v1036_v9 }
 0x1a3   :  { %1603 = vadd.xlane.f32.xlu0 %v1581_v4  ;;  %v4128_v4 = vpop.f32.mrb[32].mxu0 }
 0x1a4   :  { %v4130_v9 = vpop.f32.mrb[33].mxu0 }
 0x1a5   :  { %v4132_v51 = vpop.f32.mrb[34].mxu0 }
 0x1a6   :  { %1605 = vadd.xlane.f32.xlu1 %v1582_v19  ;;  %v4136_v52 = vpop.f32.mrb[35].mxu0  ;;  %v4140_v19 = vpop.f32.mrb[32].mxu1 }
 0x1a7   :  { %1346 = vadd.xlane.f32.xlu0 %v1324_v43  ;;  %v4142_v43 = vpop.f32.mrb[33].mxu1 }
 0x1aa   :  { %1348 = vadd.xlane.f32.xlu1 %v1325_v39  ;;  %v4144_v39 = vpop.f32.mrb[34].mxu1 }
 0x1ab   :  { %1860 = vadd.xlane.f32.xlu0 %v1838_v49  ;;  %v4146_v62 = vpop.f32.mrb[35].mxu1  ;;  %v1584_v49 = vmul.f32 %v3982_v36, %v3982_v36  ;;  %v1920_v36 = vmul.f32 %v3976_v35, %v3840_v56 }
 0x1ae   :  { %1862 = vadd.xlane.f32.xlu1 %v1839_v55  ;;  %v1327_v55 = vmul.f32 %v3980_v30, %v3980_v30 }
 0x1af   :  { %1153 = vadd.xlane.f32.xlu0 %v1131_v42  ;;  %v1840_v42 = vmul.f32 %v3976_v35, %v3976_v35  ;;  %v4182_v35 = vpop.f32.mrb[36].mxu1 }
 0x1b2   :  { %1155 = vadd.xlane.f32.xlu1 %v1132_v2 }
 0x1b3   :  { %1699 = vadd.xlane.f32.xlu0 %v1677_v6  ;;  %v1663_v6 = vmul.f32 %v3972_v33, %v3840_v56  ;;  %v1407_v33 = vmul.f32 %v3980_v30, %v3842_v57  ;;  %v1921_v30 = vmul.f32 %v3986_v41, %v3842_v57  ;;  %v1039_v57 = vmul.f32 %v3990_v53, %v3990_v53 }
 0x1b5   :  { %v1423_v56 = vmax.f32 %v1407_v33, 0.0 }
 0x1b6   :  { %1701 = vadd.xlane.f32.xlu1 %v1678_v47 }
 0x1b7   :  { %1442 = vadd.xlane.f32.xlu0 %v1420_v54  ;;  %v1134_v54 = vmax.f32 %v1118_v14, 0.0  ;;  %v1205_v14 = vlaneseq }
 0x1ba   :  { %1444 = vadd.xlane.f32.xlu1 %v1421_v1  ;;  %v1679_v1 = vmax.f32 %v1663_v6, 0.0 }
 0x1bb   :  { %1956 = vadd.xlane.f32.xlu0 %v1934_v5 }
 0x1be   :  { %1958 = vadd.xlane.f32.xlu1 %v1935_v24  ;;  %v4168_v24 = vpop.f32.mrb[36].mxu0 }
 0x1bf   :  { %1061 = vadd.xlane.f32.xlu0 %v1037_v17  ;;  %v4174_v32 = vpop.f32.mrb[37].mxu0 }
 0x1c0   :  { %v4176_v3 = vpop.f32.mrb[38].mxu0 }
 0x1c2   :  { %1063 = vadd.xlane.f32.xlu1 %v1038_v26  ;;  %v1680_v26 = vmax.f32 %v1664_v29, 0.0 }
 0x1c3   :  { %1607 = vadd.xlane.f32.xlu0 %v1583_v22 }
 0x1c6   :  { %1609 = vadd.xlane.f32.xlu1 %v1584_v49 }
 0x1c7   :  { %1350 = vadd.xlane.f32.xlu0 %v1326_v50  ;;  %v1422_v50 = vmax.f32 %v1406_v25, 0.0  ;;  %v4188_v25 = vand.u32 127, %v1205_v14 }
 0x1ca   :  { %1352 = vadd.xlane.f32.xlu1 %v1327_v55 }
 0x1cb   :  { %1864 = vadd.xlane.f32.xlu0 %v1840_v42 }
 0x1cc   :  { %v1046_v2 = vpop.xlane.xlu0 %1045 }
 0x1cd   :  { %v1077_v5 = vmax.f32 %v1046_v2, 1e-12  ;;  %v4178_v2 = vpop.f32.mrb[39].mxu0 }
 0x1ce   :  { %1866 = vadd.xlane.f32.xlu1 %v1841_v48  ;;  %5298 = vst [vmem:[#allocation11_spill] sm:$0xff] %v4178_v2 }
 0x1cf   :  { %v1594_v47 = vpop.xlane.xlu1 %1593  ;;  %1157 = vadd.xlane.f32.xlu0 %v1133_v21  ;;  %v1936_v21 = vmax.f32 %v1920_v36, 0.0 }
 0x1d0   :  { %v1592_v18 = vpop.xlane.xlu0 %1591  ;;  %v1624_v34 = vmax.f32 %v1594_v47, 1e-12  ;;  %v4184_v47 = vpop.f32.mrb[37].mxu1 }
 0x1d1   :  { %v1623_v55 = vmax.f32 %v1592_v18, 1e-12  ;;  %5299 = vst [vmem:[#allocation12_spill] sm:$0xff] %v4184_v47  ;;  %v4186_v18 = vpop.f32.mrb[38].mxu1 }
 0x1d2   :  { %1159 = vadd.xlane.f32.xlu1 %v1134_v54  ;;  %3396 = vrsqrt.f32 %v1624_v34  ;;  %5300 = vst [vmem:[#allocation13_spill] sm:$0xff] %v4186_v18  ;;  %v4192_v41 = vpop.f32.mrb[39].mxu1 }
 0x1d3   :  { %v1337_v17 = vpop.xlane.xlu1 %1336  ;;  %1703 = vadd.xlane.f32.xlu0 %v1679_v1  ;;  %3398 = vrsqrt.f32 %v1077_v5  ;;  %5301 = vst [vmem:[#allocation14_spill] sm:$0xff] %v4192_v41  ;;  %v1937_v1 = vmax.f32 %v1921_v30, 0.0  ;;  %v1040_v30 = vmul.f32 %v3998_v63, %v3998_v63 }
 0x1d4   :  { %v1335_v22 = vpop.xlane.xlu0 %1334  ;;  %v1367_v49 = vmax.f32 %v1337_v17, 1e-12 }
 0x1d5   :  { %v1366_v29 = vmax.f32 %v1335_v22, 1e-12  ;;  %v4194_v22 = vshrl.u32 %v1205_v14, 7 }
 0x1d6   :  { %1705 = vadd.xlane.f32.xlu1 %v1680_v26  ;;  %3400 = vrsqrt.f32 %v1367_v49  ;;  %v1211_v26 = vadd.s32 4294967288, %v4188_v25  ;;  %v1585_v49 = vmul.f32 %v3996_v61, %v3996_v61 }
 0x1d7   :  { %v1851_v42 = vpop.xlane.xlu1 %1850  ;;  %1446 = vadd.xlane.f32.xlu0 %v1422_v50  ;;  %3402 = vrsqrt.f32 %v1623_v55 }
 0x1d8   :  { %v1849_v48 = vpop.xlane.xlu0 %1848  ;;  %v1881_v6 = vmax.f32 %v1851_v42, 1e-12  ;;  %v4202_v14 = vsub.s32 %v1211_v26, %v4194_v22 }
 0x1d9   :  { %v1880_v17 = vmax.f32 %v1849_v48, 1e-12 }
 0x1da   :  { %1448 = vadd.xlane.f32.xlu1 %v1423_v56  ;;  %3404 = vrsqrt.f32 %v1881_v6  ;;  %5302 = vst [vmem:[#allocation15_spill] sm:$0xff] %v4202_v14 }
 0x1db   :  { %v1144_v54 = vpop.xlane.xlu1 %1143  ;;  %1960 = vadd.xlane.f32.xlu0 %v1936_v21  ;;  %3406 = vrsqrt.f32 %v1366_v29 }
 0x1dc   :  { %v1048_v34 = vpop.xlane.xlu0 %1047  ;;  %v3397_v33 = vpop.eup %3396 }
 0x1dd   :  { %v1078_v5 = vmax.f32 %v1048_v34, 1e-12  ;;  %v3399_v50 = vpop.eup %3398  ;;  %v1586_v34 = vmul.f32 %v4004_v8, %v4004_v8 }
 0x1de   :  { %1962 = vadd.xlane.f32.xlu1 %v1937_v1  ;;  %v4208_v1 = vsub.s32 %v4188_v25, %v4194_v22 }
 0x1df   :  { %3408 = vrsqrt.f32 %v1078_v5  ;;  %v1690_v36 = vpop.xlane.xlu1 %1689  ;;  %1065 = vadd.xlane.f32.xlu0 %v1039_v57 }
 0x1e0   :  { %v1720_v55 = vmul.f32 %v3397_v33, %v1690_v36  ;;  %v1142_v42 = vpop.xlane.xlu0 %1141  ;;  %3410 = vrsqrt.f32 %v1880_v17  ;;  %v3401_v48 = vpop.eup %3400  ;;  %5303 = vst [vmem:[#allocation16_spill] sm:$0xff] %v4208_v1  ;;  %v1328_v17 = vmul.f32 %v3994_v58, %v3994_v58 }
 0x1e1   :  { %v1173_v56 = vmul.f32 %v3399_v50, %v1142_v42  ;;  %v3403_v21 = vpop.eup %3402 }
 0x1e2   :  { %1067 = vadd.xlane.f32.xlu1 %v1040_v30  ;;  %v1758_v26 = vrot.slane %v1720_v55, %v4202_v14 }
 0x1e3   :  { %v1433_v6 = vpop.xlane.xlu1 %1432  ;;  %1611 = vadd.xlane.f32.xlu0 %v1585_v49 }
 0x1e4   :  { %v1463_v29 = vmul.f32 %v3401_v48, %v1433_v6  ;;  %v1688_v57 = vpop.xlane.xlu0 %1687  ;;  %v3405_v33 = vpop.eup %3404  ;;  %v1329_v48 = vmul.f32 %v4002_v7, %v4002_v7 }
 0x1e5   :  { %v1719_v5 = vmul.f32 %v3403_v21, %v1688_v57  ;;  %v3407_v50 = vpop.eup %3406  ;;  %v4216_v6 = vpop.f32.mrb[40].mxu0  ;;  %v1119_v57 = vmul.f32 %v3990_v53, %v3852_v59 }
 0x1e6   :  { %1613 = vadd.xlane.f32.xlu1 %v1586_v34  ;;  %5304 = vst [vmem:[#allocation17_spill] sm:$0xff] %v4216_v6  ;;  %v1501_v47 = vrot.slane %v1463_v29, %v4202_v14  ;;  %v1665_v29 = vmul.f32 %v3996_v61, %v3852_v59 }
 0x1e7   :  { %v1754_v36 = vrot.slane %v1719_v5, %v4208_v1  ;;  %v1947_v49 = vpop.xlane.xlu1 %1946  ;;  %1354 = vadd.xlane.f32.xlu0 %v1328_v17  ;;  %v1842_v5 = vmul.f32 %v4000_v0, %v4000_v0  ;;  %v4225_v17 = vpop.f32.mrb[41].mxu0 }
 0x1e8   :  { %v1977_v42 = vmul.f32 %v3405_v33, %v1947_v49  ;;  %v1431_v30 = vpop.xlane.xlu0 %1430  ;;  %5305 = vst [vmem:[#allocation18_spill] sm:$0xff] %v4225_v17  ;;  %v4227_v49 = vpop.f32.mrb[42].mxu0 }
 0x1e9   :  { %v3409_v21 = vpop.eup %3408  ;;  %v4221_v34 = vsel %vm1216_vm0, %v1758_v26, %v1754_v36  ;;  %v1462_v55 = vmul.f32 %v3407_v50, %v1431_v30  ;;  %5306 = vst [vmem:[#allocation19_spill] sm:$0xff] %v4227_v49  ;;  %v4231_v53 = vpop.f32.mrb[43].mxu0  ;;  %v1120_v36 = vmul.f32 %v3998_v63, %v3854_v60  ;;  %v1210_v50 = vrot.slane %v1173_v56, %v4208_v1 }
 0x1ea   :  { %v1174_v33 = vmul.f32 %v3409_v21, %v1144_v54  ;;  %1356 = vadd.xlane.f32.xlu1 %v1329_v48  ;;  %5307 = vst [vmem:[#allocation20_spill] sm:$0xff] %v4231_v53  ;;  %v3411_v26 = vpop.eup %3410  ;;  %v1843_v48 = vmul.f32 %v4008_v11, %v4008_v11  ;;  %v4239_v21 = vpop.f32.mrb[40].mxu1  ;;  %v1135_v53 = vmax.f32 %v1119_v57, 0.0  ;;  %v2015_v49 = vrot.slane %v1977_v42, %v4202_v14 }
 0x1eb   :  { %v1497_v41 = vrot.slane %v1462_v55, %v4208_v1  ;;  %v1050_v6 = vpop.xlane.xlu1 %1049  ;;  %1868 = vadd.xlane.f32.xlu0 %v1842_v5  ;;  %5308 = vst [vmem:[#allocation21_spill] sm:$0xff] %v4239_v21  ;;  %v4246_v17 = vpop.f32.mrb[41].mxu1  ;;  %v1136_v57 = vmax.f32 %v1120_v36, 0.0  ;;  %v1922_v36 = vmul.f32 %v4000_v0, %v3852_v59  ;;  %v1225_v0 = vadd.s32 4294967272, %v4188_v25 }
 0x1ec   :  { %v1215_v30 = vrot.slane %v1174_v33, %v4202_v14  ;;  %v1945_v54 = vpop.xlane.xlu0 %1944  ;;  %5309 = vst [vmem:[#allocation22_spill] sm:$0xff] %v4246_v17  ;;  %v1079_v56 = vmax.f32 %v1050_v6, 1e-12  ;;  %v4251_v33 = vpop.f32.mrb[42].mxu1  ;;  %v3655_v17 = vld [vmem:[#allocation2 + $0x78] sm:$0xff] }
 0x1ed   :  { %v4244_v55 = vsel %vm1216_vm0, %v1501_v47, %v1497_v41  ;;  %v1976_v5 = vmul.f32 %v3411_v26, %v1945_v54  ;;  %5310 = vst [vmem:[#allocation23_spill] sm:$0xff] %v4251_v33  ;;  %v4255_v61 = vpop.f32.mrb[43].mxu1  ;;  %v1666_v47 = vmul.f32 %v4004_v8, %v3854_v60  ;;  %v1408_v26 = vmul.f32 %v3994_v58, %v3852_v59 }
 0x1ee   :  { %v4249_v63 = vsel %vm1216_vm0, %v1215_v30, %v1210_v50  ;;  %1870 = vadd.xlane.f32.xlu1 %v1843_v48  ;;  %5311 = vst [vmem:[#allocation24_spill] sm:$0xff] %v4255_v61  ;;  %v1681_v30 = vmax.f32 %v1665_v29, 0.0  ;;  %3412 = vrsqrt.f32 %v1079_v56  ;;  %v1923_v29 = vmul.f32 %v4008_v11, %v3854_v60 }
 0x1ef   :  { %v2011_v21 = vrot.slane %v1976_v5, %v4208_v1  ;;  %v1052_v2 = vpop.xlane.xlu1 %1051  ;;  %1161 = vadd.xlane.f32.xlu0 %v1135_v53  ;;  %v1409_v53 = vmul.f32 %v4002_v7, %v3854_v60  ;;  %v1682_v8 = vmax.f32 %v1666_v47, 0.0  ;;  %v1424_v5 = vmax.f32 %v1408_v26, 0.0 }
 0x1f0   :  { %v1596_v41 = vpop.xlane.xlu0 %1595  ;;  %v1080_v50 = vmax.f32 %v1052_v2, 1e-12 }
 0x1f1   :  { %v4262_v6 = vsel %vm1216_vm0, %v2015_v49, %v2011_v21  ;;  %v1625_v42 = vmax.f32 %v1596_v41, 1e-12  ;;  %v1218_v21 = vadd.s32 4294967280, %v4188_v25  ;;  %v1425_v7 = vmax.f32 %v1409_v53, 0.0 }
 0x1f2   :  { %1163 = vadd.xlane.f32.xlu1 %v1136_v57  ;;  %3414 = vrsqrt.f32 %v1080_v50  ;;  %v1938_v41 = vmax.f32 %v1922_v36, 0.0  ;;  %v1041_v50 = vmul.f32 %v4032_v10, %v4032_v10 }
 0x1f3   :  { %v1598_v54 = vpop.xlane.xlu1 %1597  ;;  %1707 = vadd.xlane.f32.xlu0 %v1681_v30  ;;  %3416 = vrsqrt.f32 %v1625_v42  ;;  %v4273_v26 = vsub.s32 %v1218_v21, %v4194_v22  ;;  %v4277_v30 = vpop.f32.mrb[44].mxu0  ;;  %v1939_v42 = vmax.f32 %v1923_v29, 0.0 }
 0x1f4   :  { %v1339_v48 = vpop.xlane.xlu0 %1338  ;;  %v1626_v58 = vmax.f32 %v1598_v54, 1e-12 }
 0x1f5   :  { %v1368_v49 = vmax.f32 %v1339_v48, 1e-12  ;;  %5312 = vst [vmem:[#allocation25_spill] sm:$0xff] %v4273_v26  ;;  %v4279_v48 = vpop.f32.mrb[45].mxu0 }
 0x1f6   :  { %1709 = vadd.xlane.f32.xlu1 %v1682_v8  ;;  %3418 = vrsqrt.f32 %v1626_v58  ;;  %v4282_v8 = vsub.s32 %v1225_v0, %v4194_v22  ;;  %v4284_v36 = vpop.f32.mrb[46].mxu0 }
 0x1f7   :  { %v1341_v2 = vpop.xlane.xlu1 %1340  ;;  %1450 = vadd.xlane.f32.xlu0 %v1424_v5  ;;  %3420 = vrsqrt.f32 %v1368_v49  ;;  %v1587_v49 = vmul.f32 %v4044_v13, %v4044_v13  ;;  %v4289_v21 = vpop.f32.mrb[47].mxu0 }
 0x1f8   :  { %v1853_v56 = vpop.xlane.xlu0 %1852  ;;  %v1369_v47 = vmax.f32 %v1341_v2, 1e-12  ;;  %v3413_v60 = vpop.eup %3412  ;;  %5313 = vst [vmem:[#allocation26_spill] sm:$0xff] %v4282_v8 }
 0x1f9   :  { %v1882_v59 = vmax.f32 %v1853_v56, 1e-12 }
 0x1fa   :  { %1452 = vadd.xlane.f32.xlu1 %v1425_v7  ;;  %3422 = vrsqrt.f32 %v1369_v47  ;;  %v1042_v47 = vmul.f32 %v4036_v37, %v4036_v37 }
 0x1fb   :  { %v1855_v57 = vpop.xlane.xlu1 %1854  ;;  %1964 = vadd.xlane.f32.xlu0 %v1938_v41  ;;  %3424 = vrsqrt.f32 %v1882_v59  ;;  %v4293_v41 = vpop.f32.mrb[44].mxu1 }
 0x1fc   :  { %v1146_v11 = vpop.xlane.xlu0 %1145  ;;  %v1883_v54 = vmax.f32 %v1855_v57, 1e-12  ;;  %v3415_v58 = vpop.eup %3414  ;;  %5314 = vst [vmem:[#allocation27_spill] sm:$0xff] %v4293_v41 }
 0x1fd   :  { %v1175_v53 = vmul.f32 %v3413_v60, %v1146_v11  ;;  %v3417_v29 = vpop.eup %3416  ;;  %v4297_v57 = vpop.f32.mrb[45].mxu1 }
 0x1fe   :  { %1966 = vadd.xlane.f32.xlu1 %v1939_v42  ;;  %3426 = vrsqrt.f32 %v1883_v54  ;;  %5315 = vst [vmem:[#allocation28_spill] sm:$0xff] %v4297_v57  ;;  %v4300_v60 = vpop.f32.mrb[46].mxu1  ;;  %v3652_v57 = vld [vmem:[#allocation2 + $0x60] sm:$0xff] }
 0x1ff   :  { %v1222_v5 = vrot.slane %v1175_v53, %v4273_v26  ;;  %v1148_v2 = vpop.xlane.xlu1 %1147  ;;  %1069 = vadd.xlane.f32.xlu0 %v1041_v50  ;;  %5316 = vst [vmem:[#allocation29_spill] sm:$0xff] %v4300_v60 }
 0x200   :  { %v1176_v56 = vmul.f32 %v3415_v58, %v1148_v2  ;;  %v1692_v7 = vpop.xlane.xlu0 %1691  ;;  %v3419_v11 = vpop.eup %3418 }
 0x201   :  { %v1224_v59 = vsel %vm1223_vm1, %v1222_v5, %v4249_v63  ;;  %v1721_v0 = vmul.f32 %v3417_v29, %v1692_v7  ;;  %v4303_v58 = vpop.f32.mrb[47].mxu1  ;;  %v3421_v54 = vpop.eup %3420  ;;  %v1588_v63 = vmul.f32 %v4048_v16, %v4048_v16 }
 0x202   :  { %v1229_v50 = vrot.slane %v1176_v56, %v4282_v8  ;;  %1071 = vadd.xlane.f32.xlu1 %v1042_v47  ;;  %5317 = vst [vmem:[#allocation30_spill] sm:$0xff] %v4303_v58  ;;  %v1330_v56 = vmul.f32 %v4034_v12, %v4034_v12 }
 0x203   :  { %v1763_v42 = vrot.slane %v1721_v0, %v4273_v26  ;;  %v1694_v53 = vpop.xlane.xlu1 %1693  ;;  %1615 = vadd.xlane.f32.xlu0 %v1587_v49 }
 0x204   :  { %v4306_v2 = vsel %vm1230_vm2, %v1229_v50, %v1224_v59  ;;  %v1722_v5 = vmul.f32 %v3419_v11, %v1694_v53  ;;  %v1435_v29 = vpop.xlane.xlu0 %1434  ;;  %v3423_v0 = vpop.eup %3422  ;;  %v1331_v11 = vmul.f32 %v4040_v38, %v4040_v38 }
 0x205   :  { %v1764_v7 = vsel %vm1223_vm1, %v1763_v42, %v4221_v34  ;;  %v1464_v47 = vmul.f32 %v3421_v54, %v1435_v29  ;;  %v3425_v50 = vpop.eup %3424  ;;  %v1121_v34 = vmul.f32 %v3652_v57, %v4032_v10  ;;  %v1844_v42 = vmul.f32 %v4046_v15, %v4046_v15 }
 0x206   :  { %v1768_v49 = vrot.slane %v1722_v5, %v4282_v8  ;;  %1617 = vadd.xlane.f32.xlu1 %v1588_v63  ;;  %v1845_v10 = vmul.f32 %v4050_v20, %v4050_v20 }
 0x207   :  { %v1506_v58 = vrot.slane %v1464_v47, %v4273_v26  ;;  %v1437_v59 = vpop.xlane.xlu1 %1436  ;;  %1358 = vadd.xlane.f32.xlu0 %v1330_v56  ;;  %v3653_v47 = vld [vmem:[#allocation2 + $0x68] sm:$0xff] }
 0x208   :  { %v4319_v53 = vsel %vm1230_vm2, %v1768_v49, %v1764_v7  ;;  %v1465_v14 = vmul.f32 %v3423_v0, %v1437_v59  ;;  %v1949_v1 = vpop.xlane.xlu0 %1948  ;;  %v3427_v29 = vpop.eup %3426  ;;  %v1122_v49 = vmul.f32 %v3653_v47, %v4036_v37 }
 0x209   :  { %v1507_v54 = vsel %vm1223_vm1, %v1506_v58, %v4244_v55  ;;  %v1978_v63 = vmul.f32 %v3425_v50, %v1949_v1  ;;  %v1137_v1 = vmax.f32 %v1121_v34, 0.0 }
 0x20a   :  { %v1511_v5 = vrot.slane %v1465_v14, %v4282_v8  ;;  %1360 = vadd.xlane.f32.xlu1 %v1331_v11  ;;  %v1667_v14 = vmul.f32 %v3652_v57, %v4044_v13  ;;  %v1138_v37 = vmax.f32 %v1122_v49, 0.0  ;;  %v1410_v13 = vmul.f32 %v3652_v57, %v4034_v12 }
 0x20b   :  { %v2020_v56 = vrot.slane %v1978_v63, %v4273_v26  ;;  %v1951_v7 = vpop.xlane.xlu1 %1950  ;;  %1872 = vadd.xlane.f32.xlu0 %v1844_v42  ;;  %v1668_v63 = vmul.f32 %v3653_v47, %v4048_v16  ;;  %v1333_v26 = vmul.f32 %v4088_v45, %v4088_v45 }
 0x20c   :  { %v4332_v0 = vsel %vm1230_vm2, %v1511_v5, %v1507_v54  ;;  %v1979_v59 = vmul.f32 %v3427_v29, %v1951_v7  ;;  %v1054_v55 = vpop.xlane.xlu0 %1053  ;;  %v4342_v29 = vpop.f32.mrb[48].mxu0  ;;  %v1683_v34 = vmax.f32 %v1667_v14, 0.0  ;;  %v1426_v12 = vmax.f32 %v1410_v13, 0.0 }
 0x20d   :  { %v2021_v58 = vsel %vm1223_vm1, %v2020_v56, %v4262_v6  ;;  %v1081_v11 = vmax.f32 %v1054_v55, 1e-12  ;;  %v4345_v6 = vpop.f32.mrb[49].mxu0  ;;  %v1684_v55 = vmax.f32 %v1668_v63, 0.0  ;;  %v1924_v14 = vmul.f32 %v3652_v57, %v4046_v15 }
 0x20e   :  { %v2025_v50 = vrot.slane %v1979_v59, %v4282_v8  ;;  %1874 = vadd.xlane.f32.xlu1 %v1845_v10  ;;  %v4347_v10 = vpop.f32.mrb[50].mxu0  ;;  %v1411_v59 = vmul.f32 %v3653_v47, %v4040_v38  ;;  %v1232_v38 = vadd.s32 4294967264, %v4188_v25  ;;  %v1925_v13 = vmul.f32 %v3653_v47, %v4050_v20 }
 0x20f   :  { %v1056_v42 = vpop.xlane.xlu1 %1055  ;;  %1165 = vadd.xlane.f32.xlu0 %v1137_v1  ;;  %3428 = vrsqrt.f32 %v1081_v11  ;;  %v4349_v16 = vpop.f32.mrb[51].mxu0  ;;  %v1940_v15 = vmax.f32 %v1924_v14, 0.0 }
 0x210   :  { %v4340_v54 = vsel %vm1230_vm2, %v2025_v50, %v2021_v58  ;;  %v1600_v5 = vpop.xlane.xlu0 %1599  ;;  %v1082_v7 = vmax.f32 %v1056_v42, 1e-12  ;;  %v4352_v58 = vpop.f32.mrb[48].mxu1 }
 0x211   :  { %v1627_v56 = vmax.f32 %v1600_v5, 1e-12  ;;  %5318 = vst [vmem:[#allocation31_spill] sm:$0xff] %v4352_v58  ;;  %v4355_v11 = vpop.f32.mrb[49].mxu1 }
 0x212   :  { %1167 = vadd.xlane.f32.xlu1 %v1138_v37  ;;  %3430 = vrsqrt.f32 %v1082_v7  ;;  %5319 = vst [vmem:[#allocation32_spill] sm:$0xff] %v4355_v11  ;;  %v4357_v37 = vpop.f32.mrb[50].mxu1 }
 0x213   :  { %v1602_v49 = vpop.xlane.xlu1 %1601  ;;  %1711 = vadd.xlane.f32.xlu0 %v1683_v34  ;;  %3432 = vrsqrt.f32 %v1627_v56  ;;  %5320 = vst [vmem:[#allocation33_spill] sm:$0xff] %v4357_v37  ;;  %v4360_v63 = vpop.f32.mrb[51].mxu1  ;;  %v1427_v34 = vmax.f32 %v1411_v59, 0.0  ;;  %v1239_v56 = vadd.s32 4294967256, %v4188_v25 }
 0x214   :  { %v1343_v1 = vpop.xlane.xlu0 %1342  ;;  %v1628_v50 = vmax.f32 %v1602_v49, 1e-12  ;;  %5321 = vst [vmem:[#allocation34_spill] sm:$0xff] %v4360_v63  ;;  %v1043_v49 = vmul.f32 %v4080_v23, %v4080_v23 }
 0x215   :  { %v1370_v42 = vmax.f32 %v1343_v1, 1e-12  ;;  %v4367_v1 = vsub.s32 %v1232_v38, %v4194_v22 }
 0x216   :  { %1713 = vadd.xlane.f32.xlu1 %v1684_v55  ;;  %3434 = vrsqrt.f32 %v1628_v50 }
 0x217   :  { %v1345_v5 = vpop.xlane.xlu1 %1344  ;;  %1454 = vadd.xlane.f32.xlu0 %v1426_v12  ;;  %3436 = vrsqrt.f32 %v1370_v42  ;;  %5322 = vst [vmem:[#allocation35_spill] sm:$0xff] %v4367_v1  ;;  %v1941_v12 = vmax.f32 %v1925_v13, 0.0  ;;  %v1044_v13 = vmul.f32 %v4084_v44, %v4084_v44 }
 0x218   :  { %v1857_v8 = vpop.xlane.xlu0 %1856  ;;  %v1371_v57 = vmax.f32 %v1345_v5, 1e-12  ;;  %v1589_v5 = vmul.f32 %v4092_v27, %v4092_v27 }
 0x219   :  { %v1884_v7 = vmax.f32 %v1857_v8, 1e-12  ;;  %v3429_v59 = vpop.eup %3428  ;;  %v4370_v8 = vsub.s32 %v1239_v56, %v4194_v22 }
 0x21a   :  { %1456 = vadd.xlane.f32.xlu1 %v1427_v34  ;;  %3438 = vrsqrt.f32 %v1371_v57 }
 0x21b   :  { %v1859_v55 = vpop.xlane.xlu1 %1858  ;;  %1968 = vadd.xlane.f32.xlu0 %v1940_v15  ;;  %3440 = vrsqrt.f32 %v1884_v7  ;;  %5323 = vst [vmem:[#allocation36_spill] sm:$0xff] %v4370_v8 }
 0x21c   :  { %v1150_v20 = vpop.xlane.xlu0 %1149  ;;  %v1885_v47 = vmax.f32 %v1859_v55, 1e-12  ;;  %v3431_v50 = vpop.eup %3430 }
 0x21d   :  { %v1177_v14 = vmul.f32 %v3429_v59, %v1150_v20  ;;  %v3433_v34 = vpop.eup %3432 }
 0x21e   :  { %1970 = vadd.xlane.f32.xlu1 %v1941_v12  ;;  %3442 = vrsqrt.f32 %v1885_v47  ;;  %v1590_v47 = vmul.f32 %v4096_v31, %v4096_v31 }
 0x21f   :  { %v1236_v42 = vrot.slane %v1177_v14, %v4367_v1  ;;  %v1152_v38 = vpop.xlane.xlu1 %1151  ;;  %1073 = vadd.xlane.f32.xlu0 %v1043_v49 }
 0x220   :  { %v1178_v15 = vmul.f32 %v3431_v50, %v1152_v38  ;;  %v1696_v57 = vpop.xlane.xlu0 %1695  ;;  %v3435_v59 = vpop.eup %3434 }
 0x221   :  { %v1238_v7 = vsel %vm1237_vm3, %v1236_v42, %v4306_v2  ;;  %v1723_v56 = vmul.f32 %v3433_v34, %v1696_v57  ;;  %v3437_v49 = vpop.eup %3436  ;;  %v4386_v2 = vpop.f32.mrb[52].mxu0  ;;  %v1332_v42 = vmul.f32 %v4082_v40, %v4082_v40 }
 0x222   :  { %v1243_v55 = vrot.slane %v1178_v15, %v4370_v8  ;;  %1075 = vadd.xlane.f32.xlu1 %v1044_v13  ;;  %v4392_v15 = vpop.f32.mrb[53].mxu0 }
 0x223   :  { %v1773_v12 = vrot.slane %v1723_v56, %v4367_v1  ;;  %v1698_v20 = vpop.xlane.xlu1 %1697  ;;  %1619 = vadd.xlane.f32.xlu0 %v1589_v5  ;;  %v4395_v57 = vpop.f32.mrb[54].mxu0 }
 0x224   :  { %v4382_v14 = vsel %vm1244_vm4, %v1243_v55, %v1238_v7  ;;  %v1724_v50 = vmul.f32 %v3435_v59, %v1698_v20  ;;  %v1439_v38 = vpop.xlane.xlu0 %1438  ;;  %v3439_v7 = vpop.eup %3438 }
 0x225   :  { %v1774_v34 = vsel %vm1237_vm3, %v1773_v12, %v4319_v53  ;;  %v1466_v13 = vmul.f32 %v3437_v49, %v1439_v38  ;;  %v4398_v59 = vpop.f32.mrb[55].mxu0  ;;  %v3441_v20 = vpop.eup %3440 }
 0x226   :  { %v1778_v5 = vrot.slane %v1724_v50, %v4370_v8  ;;  %1621 = vadd.xlane.f32.xlu1 %v1590_v47  ;;  %5324 = vst [vmem:[#allocation37_spill] sm:$0xff] %v4398_v59  ;;  %v4405_v50 = vpop.f32.mrb[52].mxu1  ;;  %v3654_v47 = vld [vmem:[#allocation2 + $0x70] sm:$0xff]  ;;  %v1124_v59 = vmul.f32 %v3655_v17, %v4084_v44 }
 0x227   :  { %v1516_v56 = vrot.slane %v1466_v13, %v4367_v1  ;;  %v1441_v55 = vpop.xlane.xlu1 %1440  ;;  %1362 = vadd.xlane.f32.xlu0 %v1332_v42  ;;  %5325 = vst [vmem:[#allocation38_spill] sm:$0xff] %v4405_v50  ;;  %v1123_v38 = vmul.f32 %v3654_v47, %v4080_v23  ;;  %v1846_v13 = vmul.f32 %v4094_v28, %v4094_v28  ;;  %v4412_v11 = vpop.f32.mrb[53].mxu1 }
 0x228   :  { %v4403_v53 = vsel %vm1244_vm4, %v1778_v5, %v1774_v34  ;;  %v1467_v12 = vmul.f32 %v3439_v7, %v1441_v55  ;;  %v1953_v49 = vpop.xlane.xlu0 %1952  ;;  %5326 = vst [vmem:[#allocation39_spill] sm:$0xff] %v4412_v11  ;;  %v4415_v34 = vpop.f32.mrb[54].mxu1  ;;  %v1140_v44 = vmax.f32 %v1124_v59, 0.0  ;;  %v1670_v11 = vmul.f32 %v3655_v17, %v4096_v31 }
 0x229   :  { %v1517_v42 = vsel %vm1237_vm3, %v1516_v56, %v4332_v0  ;;  %v1980_v63 = vmul.f32 %v3441_v20, %v1953_v49  ;;  %5327 = vst [vmem:[#allocation40_spill] sm:$0xff] %v4415_v34  ;;  %v3443_v5 = vpop.eup %3442  ;;  %v4418_v23 = vpop.f32.mrb[55].mxu1  ;;  %v1847_v0 = vmul.f32 %v4098_v46, %v4098_v46  ;;  %v1669_v49 = vmul.f32 %v3654_v47, %v4092_v27 }
 0x22a   :  { %v1521_v61 = vrot.slane %v1467_v12, %v4370_v8  ;;  %1364 = vadd.xlane.f32.xlu1 %v1333_v26  ;;  %5328 = vst [vmem:[#allocation41_spill] sm:$0xff] %v4418_v23  ;;  %v1139_v12 = vmax.f32 %v1123_v38, 0.0  ;;  %v1412_v38 = vmul.f32 %v3654_v47, %v4082_v40  ;;  %v1926_v31 = vmul.f32 %v3654_v47, %v4094_v28 }
 0x22b   :  { %v2030_v7 = vrot.slane %v1980_v63, %v4367_v1  ;;  %v1955_v55 = vpop.xlane.xlu1 %1954  ;;  %1876 = vadd.xlane.f32.xlu0 %v1846_v13  ;;  %v1253_v47 = vadd.s32 4294967240, %v4188_v25 }
 0x22c   :  { %v4424_v56 = vsel %vm1244_vm4, %v1521_v61, %v1517_v42  ;;  %v1981_v20 = vmul.f32 %v3443_v5, %v1955_v55  ;;  %v1058_v26 = vpop.xlane.xlu0 %1057  ;;  %v1685_v5 = vmax.f32 %v1669_v49, 0.0  ;;  %v1428_v59 = vmax.f32 %v1412_v38, 0.0 }
 0x22d   :  { %v2031_v63 = vsel %vm1237_vm3, %v2030_v7, %v4340_v54  ;;  %v1083_v1 = vmax.f32 %v1058_v26, 1e-12  ;;  %v1413_v7 = vmul.f32 %v3655_v17, %v4088_v45  ;;  %v2089_v38 = vmul.f32 %v4128_v4, %v4128_v4 }
 0x22e   :  { %v2035_v13 = vrot.slane %v1981_v20, %v4370_v8  ;;  %1878 = vadd.xlane.f32.xlu1 %v1847_v0  ;;  %v1686_v0 = vmax.f32 %v1670_v11, 0.0  ;;  %v1942_v11 = vmax.f32 %v1926_v31, 0.0 }
 0x22f   :  { %v1060_v23 = vpop.xlane.xlu1 %1059  ;;  %1169 = vadd.xlane.f32.xlu0 %v1139_v12  ;;  %3444 = vrsqrt.f32 %v1083_v1  ;;  %v1246_v1 = vadd.s32 4294967248, %v4188_v25  ;;  %v1429_v49 = vmax.f32 %v1413_v7, 0.0 }
 0x230   :  { %v4432_v61 = vsel %vm1244_vm4, %v2035_v13, %v2031_v63  ;;  %v1604_v42 = vpop.xlane.xlu0 %1603  ;;  %v1084_v27 = vmax.f32 %v1060_v23, 1e-12  ;;  %v4438_v23 = vpop.f32.mrb[56].mxu0  ;;  %v1927_v63 = vmul.f32 %v3655_v17, %v4098_v46 }
 0x231   :  { %v1629_v55 = vmax.f32 %v1604_v42, 1e-12  ;;  %v4449_v46 = vsub.s32 %v1246_v1, %v4194_v22  ;;  %v2090_v1 = vmul.f32 %v4132_v51, %v4132_v51 }
 0x232   :  { %1171 = vadd.xlane.f32.xlu1 %v1140_v44  ;;  %3446 = vrsqrt.f32 %v1084_v27  ;;  %v4441_v44 = vpop.f32.mrb[57].mxu0 }
 0x233   :  { %v1606_v54 = vpop.xlane.xlu1 %1605  ;;  %1715 = vadd.xlane.f32.xlu0 %v1685_v5  ;;  %3448 = vrsqrt.f32 %v1629_v55  ;;  %v4444_v42 = vpop.f32.mrb[58].mxu0  ;;  %5329 = vst [vmem:[#allocation42_spill] sm:$0xff] %v4449_v46  ;;  %v1943_v55 = vmax.f32 %v1927_v63, 0.0 }
 0x234   :  { %v1347_v20 = vpop.xlane.xlu0 %1346  ;;  %v1630_v26 = vmax.f32 %v1606_v54, 1e-12  ;;  %v4451_v17 = vpop.f32.mrb[59].mxu0 }
 0x235   :  { %v1372_v12 = vmax.f32 %v1347_v20, 1e-12  ;;  %v4454_v20 = vsub.s32 %v1253_v47, %v4194_v22 }
 0x236   :  { %1717 = vadd.xlane.f32.xlu1 %v1686_v0  ;;  %3450 = vrsqrt.f32 %v1630_v26  ;;  %v2603_v26 = vmul.f32 %v4140_v19, %v4140_v19 }
 0x237   :  { %v1349_v40 = vpop.xlane.xlu1 %1348  ;;  %1458 = vadd.xlane.f32.xlu0 %v1428_v59  ;;  %3452 = vrsqrt.f32 %v1372_v12  ;;  %5330 = vst [vmem:[#allocation43_spill] sm:$0xff] %v4454_v20 }
 0x238   :  { %v1861_v45 = vpop.xlane.xlu0 %1860  ;;  %v1373_v13 = vmax.f32 %v1349_v40, 1e-12 }
 0x239   :  { %v1886_v28 = vmax.f32 %v1861_v45, 1e-12  ;;  %v3445_v27 = vpop.eup %3444 }
 0x23a   :  { %1460 = vadd.xlane.f32.xlu1 %v1429_v49  ;;  %3454 = vrsqrt.f32 %v1373_v13 }
 0x23b   :  { %v1863_v5 = vpop.xlane.xlu1 %1862  ;;  %1972 = vadd.xlane.f32.xlu0 %v1942_v11  ;;  %3456 = vrsqrt.f32 %v1886_v28 }
 0x23c   :  { %v1154_v54 = vpop.xlane.xlu0 %1153  ;;  %v1887_v7 = vmax.f32 %v1863_v5, 1e-12  ;;  %v3447_v59 = vpop.eup %3446 }
 0x23d   :  { %v1179_v0 = vmul.f32 %v3445_v27, %v1154_v54  ;;  %v3449_v40 = vpop.eup %3448 }
 0x23e   :  { %1974 = vadd.xlane.f32.xlu1 %v1943_v55  ;;  %3458 = vrsqrt.f32 %v1887_v7  ;;  %v2604_v55 = vmul.f32 %v4144_v39, %v4144_v39 }
 0x23f   :  { %v1250_v31 = vrot.slane %v1179_v0, %v4449_v46  ;;  %v1156_v12 = vpop.xlane.xlu1 %1155  ;;  %2105 = vadd.xlane.f32.xlu0 %v2089_v38 }
 0x240   :  { %v1180_v49 = vmul.f32 %v3447_v59, %v1156_v12  ;;  %v1700_v63 = vpop.xlane.xlu0 %1699  ;;  %v3451_v28 = vpop.eup %3450 }
 0x241   :  { %v1252_v45 = vsel %vm1251_vm5, %v1250_v31, %v4382_v14  ;;  %v1725_v11 = vmul.f32 %v3449_v40, %v1700_v63  ;;  %v3453_v38 = vpop.eup %3452  ;;  %v2346_v14 = vmul.f32 %v4130_v9, %v4130_v9 }
 0x242   :  { %v1257_v13 = vrot.slane %v1180_v49, %v4454_v20  ;;  %2107 = vadd.xlane.f32.xlu1 %v2090_v1  ;;  %v2347_v49 = vmul.f32 %v4136_v52, %v4136_v52 }
 0x243   :  { %v1783_v47 = vrot.slane %v1725_v11, %v4449_v46  ;;  %v1702_v5 = vpop.xlane.xlu1 %1701  ;;  %2619 = vadd.xlane.f32.xlu0 %v2603_v26 }
 0x244   :  { %v4466_v27 = vsel %vm1258_vm6, %v1257_v13, %v1252_v45  ;;  %v1726_v54 = vmul.f32 %v3451_v28, %v1702_v5  ;;  %v1443_v7 = vpop.xlane.xlu0 %1442  ;;  %v3455_v26 = vpop.eup %3454 }
 0x245   :  { %v1784_v0 = vsel %vm1251_vm5, %v1783_v47, %v4403_v53  ;;  %v1468_v59 = vmul.f32 %v3453_v38, %v1443_v7  ;;  %v3457_v1 = vpop.eup %3456  ;;  %v4481_v13 = vpop.f32.mrb[60].mxu0  ;;  %v3656_v53 = vld [vmem:[#allocation2] sm:$0xff]  ;;  %v2860_v47 = vmul.f32 %v4142_v43, %v4142_v43 }
 0x246   :  { %v1788_v31 = vrot.slane %v1726_v54, %v4454_v20  ;;  %2621 = vadd.xlane.f32.xlu1 %v2604_v55  ;;  %v2169_v28 = vmul.f32 %v3656_v53, %v4128_v4  ;;  %v4488_v55 = vpop.f32.mrb[61].mxu0 }
 0x247   :  { %v1526_v12 = vrot.slane %v1468_v59, %v4449_v46  ;;  %v1445_v40 = vpop.xlane.xlu1 %1444  ;;  %2362 = vadd.xlane.f32.xlu0 %v2346_v14  ;;  %v4491_v7 = vpop.f32.mrb[62].mxu0 }
 0x248   :  { %v4479_v63 = vsel %vm1258_vm6, %v1788_v31, %v1784_v0  ;;  %v1469_v45 = vmul.f32 %v3455_v26, %v1445_v40  ;;  %v1957_v11 = vpop.xlane.xlu0 %1956  ;;  %v3459_v14 = vpop.eup %3458  ;;  %v3657_v31 = vld [vmem:[#allocation2 + $0x8] sm:$0xff] }
 0x249   :  { %v1527_v5 = vsel %vm1251_vm5, %v1526_v12, %v4424_v56  ;;  %v1982_v38 = vmul.f32 %v3457_v1, %v1957_v11  ;;  %v4494_v4 = vpop.f32.mrb[63].mxu0  ;;  %v2170_v26 = vmul.f32 %v3657_v31, %v4132_v51  ;;  %v2861_v56 = vmul.f32 %v4146_v62, %v4146_v62 }
 0x24a   :  { %v1531_v54 = vrot.slane %v1469_v45, %v4454_v20  ;;  %2364 = vadd.xlane.f32.xlu1 %v2347_v49  ;;  %v2185_v49 = vmax.f32 %v2169_v28, 0.0  ;;  %v2426_v45 = vmul.f32 %v3656_v53, %v4130_v9  ;;  %v2427_v8 = vmul.f32 %v3657_v31, %v4136_v52 }
 0x24b   :  { %v2040_v0 = vrot.slane %v1982_v38, %v4449_v46  ;;  %v1959_v59 = vpop.xlane.xlu1 %1958  ;;  %2876 = vadd.xlane.f32.xlu0 %v2860_v47  ;;  %v2186_v51 = vmax.f32 %v2170_v26, 0.0  ;;  %v2605_v31 = vmul.f32 %v4182_v35, %v4182_v35 }
 0x24c   :  { %v4500_v12 = vsel %vm1258_vm6, %v1531_v54, %v1527_v5  ;;  %v1983_v40 = vmul.f32 %v3459_v14, %v1959_v59  ;;  %v1062_v1 = vpop.xlane.xlu0 %1061  ;;  %v2442_v14 = vmax.f32 %v2426_v45, 0.0  ;;  %v1267_v45 = vadd.s32 4294967224, %v4188_v25 }
 0x24d   :  { %v2041_v11 = vsel %vm1251_vm5, %v2040_v0, %v4432_v61  ;;  %v1085_v38 = vmax.f32 %v1062_v1, 1e-12  ;;  %v2091_v61 = vmul.f32 %v4168_v24, %v4168_v24  ;;  %v2443_v0 = vmax.f32 %v2427_v8, 0.0 }
 0x24e   :  { %v2045_v47 = vrot.slane %v1983_v40, %v4454_v20  ;;  %2878 = vadd.xlane.f32.xlu1 %v2861_v56  ;;  %v2092_v40 = vmul.f32 %v4176_v3, %v4176_v3 }
 0x24f   :  { %v1064_v46 = vpop.xlane.xlu1 %1063  ;;  %2201 = vadd.xlane.f32.xlu0 %v2185_v49  ;;  %3460 = vrsqrt.f32 %v1085_v38 }
 0x250   :  { %v4508_v5 = vsel %vm1258_vm6, %v2045_v47, %v2041_v11  ;;  %v1608_v54 = vpop.xlane.xlu0 %1607  ;;  %v1086_v28 = vmax.f32 %v1064_v46, 1e-12  ;;  %v1260_v46 = vadd.s32 4294967232, %v4188_v25  ;;  %v3658_v11 = vld [vmem:[#allocation2 + $0x10] sm:$0xff] }
 0x251   :  { %v1631_v9 = vmax.f32 %v1608_v54, 1e-12  ;;  %v2171_v47 = vmul.f32 %v3658_v11, %v4168_v24  ;;  %v4527_v24 = vsub.s32 %v1267_v45, %v4194_v22 }
 0x252   :  { %2203 = vadd.xlane.f32.xlu1 %v2186_v51  ;;  %3462 = vrsqrt.f32 %v1086_v28  ;;  %v4520_v51 = vsub.s32 %v1260_v46, %v4194_v22  ;;  %v3659_v46 = vld [vmem:[#allocation2 + $0x18] sm:$0xff] }
 0x253   :  { %v1610_v53 = vpop.xlane.xlu1 %1609  ;;  %2458 = vadd.xlane.f32.xlu0 %v2442_v14  ;;  %3464 = vrsqrt.f32 %v1631_v9  ;;  %v2606_v14 = vmul.f32 %v4186_v18, %v4186_v18  ;;  %v2348_v9 = vmul.f32 %v4174_v32, %v4174_v32  ;;  %5332 = vst [vmem:[#allocation45_spill] sm:$0xff] %v4527_v24 }
 0x254   :  { %v1351_v59 = vpop.xlane.xlu0 %1350  ;;  %v1632_v26 = vmax.f32 %v1610_v53, 1e-12  ;;  %5331 = vst [vmem:[#allocation44_spill] sm:$0xff] %v4520_v51 }
 0x255   :  { %v1374_v52 = vmax.f32 %v1351_v59, 1e-12  ;;  %v2187_v59 = vmax.f32 %v2171_v47, 0.0 }
 0x256   :  { %2460 = vadd.xlane.f32.xlu1 %v2443_v0  ;;  %3466 = vrsqrt.f32 %v1632_v26 }
 0x257   :  { %v1353_v56 = vpop.xlane.xlu1 %1352  ;;  %2109 = vadd.xlane.f32.xlu0 %v2091_v61  ;;  %3468 = vrsqrt.f32 %v1374_v52 }
 0x258   :  { %v1865_v1 = vpop.xlane.xlu0 %1864  ;;  %v1375_v49 = vmax.f32 %v1353_v56, 1e-12  ;;  %v2428_v56 = vmul.f32 %v3658_v11, %v4174_v32 }
 0x259   :  { %v1888_v8 = vmax.f32 %v1865_v1, 1e-12  ;;  %v3461_v54 = vpop.eup %3460  ;;  %v5333_v1 = vld [vmem:[#allocation11_spill] sm:$0xff] }
 0x25a   :  { %2111 = vadd.xlane.f32.xlu1 %v2092_v40  ;;  %3470 = vrsqrt.f32 %v1375_v49  ;;  %v2172_v40 = vmul.f32 %v3659_v46, %v4176_v3  ;;  %v2349_v49 = vmul.f32 %v5333_v1, %v5333_v1 }
 0x25b   :  { %v1867_v38 = vpop.xlane.xlu1 %1866  ;;  %2623 = vadd.xlane.f32.xlu0 %v2605_v31  ;;  %3472 = vrsqrt.f32 %v1888_v8 }
 0x25c   :  { %v1158_v28 = vpop.xlane.xlu0 %1157  ;;  %v1889_v61 = vmax.f32 %v1867_v38, 1e-12  ;;  %v3463_v0 = vpop.eup %3462 }
 0x25d   :  { %v1181_v53 = vmul.f32 %v3461_v54, %v1158_v28  ;;  %v3465_v31 = vpop.eup %3464  ;;  %v2188_v28 = vmax.f32 %v2172_v40, 0.0 }
 0x25e   :  { %2625 = vadd.xlane.f32.xlu1 %v2606_v14  ;;  %3474 = vrsqrt.f32 %v1889_v61 }
 0x25f   :  { %v1264_v26 = vrot.slane %v1181_v53, %v4520_v51  ;;  %v1160_v52 = vpop.xlane.xlu1 %1159  ;;  %2366 = vadd.xlane.f32.xlu0 %v2348_v9  ;;  %v2429_v9 = vmul.f32 %v3659_v46, %v5333_v1 }
 0x260   :  { %v1182_v8 = vmul.f32 %v3463_v0, %v1160_v52  ;;  %v1704_v38 = vpop.xlane.xlu0 %1703  ;;  %v3467_v14 = vpop.eup %3466 }
 0x261   :  { %v1266_v45 = vsel %vm1265_vm7, %v1264_v26, %v4466_v27  ;;  %v1727_v47 = vmul.f32 %v3465_v31, %v1704_v38  ;;  %v3469_v3 = vpop.eup %3468  ;;  %v2444_v27 = vmax.f32 %v2428_v56, 0.0  ;;  %v2445_v38 = vmax.f32 %v2429_v9, 0.0  ;;  %v4557_v9 = vpop.f32.mrb[56].mxu1 }
 0x262   :  { %v1271_v54 = vrot.slane %v1182_v8, %v4527_v24  ;;  %2368 = vadd.xlane.f32.xlu1 %v2349_v49  ;;  %v5334_v8 = vld [vmem:[#allocation17_spill] sm:$0xff] }
 0x263   :  { %v1793_v32 = vrot.slane %v1727_v47, %v4520_v51  ;;  %v1706_v11 = vpop.xlane.xlu1 %1705  ;;  %2205 = vadd.xlane.f32.xlu0 %v2187_v59  ;;  %v2093_v40 = vmul.f32 %v5334_v8, %v5334_v8 }
 0x264   :  { %v4540_v53 = vsel %vm1272_vm8, %v1271_v54, %v1266_v45  ;;  %v1728_v61 = vmul.f32 %v3467_v14, %v1706_v11  ;;  %v1447_v0 = vpop.xlane.xlu0 %1446  ;;  %v3471_v49 = vpop.eup %3470 }
 0x265   :  { %v1794_v26 = vsel %vm1265_vm7, %v1793_v32, %v4479_v63  ;;  %v1470_v52 = vmul.f32 %v3469_v3, %v1447_v0  ;;  %v3473_v1 = vpop.eup %3472  ;;  %v5335_v3 = vld [vmem:[#allocation21_spill] sm:$0xff] }
 0x266   :  { %v1798_v31 = vrot.slane %v1728_v61, %v4527_v24  ;;  %2207 = vadd.xlane.f32.xlu1 %v2188_v28  ;;  %v2607_v28 = vmul.f32 %v5335_v3, %v5335_v3 }
 0x267   :  { %v1536_v59 = vrot.slane %v1470_v52, %v4520_v51  ;;  %v1449_v46 = vpop.xlane.xlu1 %1448  ;;  %2462 = vadd.xlane.f32.xlu0 %v2444_v27  ;;  %v5336_v27 = vld [vmem:[#allocation19_spill] sm:$0xff] }
 0x268   :  { %v4549_v45 = vsel %vm1272_vm8, %v1798_v31, %v1794_v26  ;;  %v1471_v56 = vmul.f32 %v3471_v49, %v1449_v46  ;;  %v1961_v47 = vpop.xlane.xlu0 %1960  ;;  %v3475_v32 = vpop.eup %3474 }
 0x269   :  { %v1537_v63 = vsel %vm1265_vm7, %v1536_v59, %v4500_v12  ;;  %v1984_v54 = vmul.f32 %v3473_v1, %v1961_v47  ;;  %v2094_v12 = vmul.f32 %v5336_v27, %v5336_v27  ;;  %v4567_v46 = vpop.f32.mrb[57].mxu1 }
 0x26a   :  { %v1541_v14 = vrot.slane %v1471_v56, %v4527_v24  ;;  %2464 = vadd.xlane.f32.xlu1 %v2445_v38  ;;  %v4571_v1 = vpop.f32.mrb[58].mxu1  ;;  %v2608_v56 = vmul.f32 %v4251_v33, %v4251_v33 }
 0x26b   :  { %v2050_v11 = vrot.slane %v1984_v54, %v4520_v51  ;;  %v1963_v61 = vpop.xlane.xlu1 %1962  ;;  %2113 = vadd.xlane.f32.xlu0 %v2093_v40 }
 0x26c   :  { %v4560_v0 = vsel %vm1272_vm8, %v1541_v14, %v1537_v63  ;;  %v1985_v26 = vmul.f32 %v3475_v32, %v1963_v61  ;;  %v1066_v52 = vpop.xlane.xlu0 %1065  ;;  %v4578_v63 = vpop.f32.mrb[59].mxu1  ;;  %v5338_v14 = vld [vmem:[#allocation18_spill] sm:$0xff]  ;;  %v4588_v61 = vld [vmem:[#allocation2 + $0x28] sm:$0xff] }
 0x26d   :  { %v2051_v31 = vsel %vm1265_vm7, %v2050_v11, %v4508_v5  ;;  %v1087_v59 = vmax.f32 %v1066_v52, 1e-12  ;;  %v4580_v5 = vld [vmem:[#allocation2 + $0x20] sm:$0xff]  ;;  %v2350_v32 = vmul.f32 %v5338_v14, %v5338_v14  ;;  %5339 = vst [vmem:[#allocation17_spill] sm:$0xff] %v4588_v61 }
 0x26e   :  { %v2055_v49 = vrot.slane %v1985_v26, %v4527_v24  ;;  %2115 = vadd.xlane.f32.xlu1 %v2094_v12  ;;  %5337 = vst [vmem:[#allocation11_spill] sm:$0xff] %v4580_v5  ;;  %v2173_v54 = vmul.f32 %v4580_v5, %v5334_v8  ;;  %v2174_v12 = vmul.f32 %v4588_v61, %v5336_v27  ;;  %v5340_v26 = vld [vmem:[#allocation20_spill] sm:$0xff] }
 0x26f   :  { %v4569_v40 = vpop.xlane.xlu1 %1067  ;;  %2627 = vadd.xlane.f32.xlu0 %v2607_v28  ;;  %3476 = vrsqrt.f32 %v1087_v59  ;;  %v2351_v52 = vmul.f32 %v5340_v26, %v5340_v26  ;;  %v2430_v8 = vmul.f32 %v4580_v5, %v5338_v14  ;;  %v2431_v51 = vmul.f32 %v4588_v61, %v5340_v26 }
 0x270   :  { %v4574_v38 = vsel %vm1272_vm8, %v2055_v49, %v2051_v31  ;;  %v1612_v47 = vpop.xlane.xlu0 %1611  ;;  %v2189_v49 = vmax.f32 %v2173_v54, 0.0  ;;  %v2190_v27 = vmax.f32 %v2174_v12, 0.0 }
 0x271   :  { %v1633_v11 = vmax.f32 %v1612_v47, 1e-12  ;;  %v2446_v14 = vmax.f32 %v2430_v8, 0.0  ;;  %v2447_v26 = vmax.f32 %v2431_v51, 0.0 }
 0x272   :  { %2629 = vadd.xlane.f32.xlu1 %v2608_v56  ;;  %v4596_v56 = vpop.f32.mrb[60].mxu1 }
 0x273   :  { %v4586_v28 = vpop.xlane.xlu1 %1613  ;;  %2370 = vadd.xlane.f32.xlu0 %v2350_v32  ;;  %3478 = vrsqrt.f32 %v1633_v11  ;;  %v1274_v32 = vadd.s32 4294967216, %v4188_v25  ;;  %v4601_v24 = vpop.f32.mrb[61].mxu1 }
 0x274   :  { %v1355_v31 = vpop.xlane.xlu0 %1354  ;;  %v4605_v20 = vpop.f32.mrb[62].mxu1 }
 0x275   :  { %v1376_v59 = vmax.f32 %v1355_v31, 1e-12  ;;  %5341 = vst [vmem:[#allocation19_spill] sm:$0xff] %v4605_v20  ;;  %v4607_v11 = vpop.f32.mrb[63].mxu1  ;;  %v2095_v31 = vmul.f32 %v4277_v30, %v4277_v30  ;;  %v4614_v12 = vsub.s32 %v1274_v32, %v4194_v22  ;;  %v2096_v32 = vmul.f32 %v4284_v36, %v4284_v36 }
 0x276   :  { %2372 = vadd.xlane.f32.xlu1 %v2351_v52  ;;  %5342 = vst [vmem:[#allocation18_spill] sm:$0xff] %v4607_v11 }
 0x277   :  { %v4598_v47 = vpop.xlane.xlu1 %1356  ;;  %2209 = vadd.xlane.f32.xlu0 %v2189_v49  ;;  %3480 = vrsqrt.f32 %v1376_v59  ;;  %5343 = vst [vmem:[#allocation20_spill] sm:$0xff] %v4614_v12  ;;  %v2609_v59 = vmul.f32 %v4293_v41, %v4293_v41  ;;  %v4632_v41 = vld [vmem:[#allocation2 + $0x30] sm:$0xff] }
 0x278   :  { %v1869_v54 = vpop.xlane.xlu0 %1868  ;;  %5344 = vst [vmem:[#allocation46_spill] sm:$0xff] %v4632_v41  ;;  %v2175_v3 = vmul.f32 %v4632_v41, %v4277_v30 }
 0x279   :  { %v1890_v52 = vmax.f32 %v1869_v54, 1e-12  ;;  %v3477_v33 = vpop.eup %3476 }
 0x27a   :  { %2211 = vadd.xlane.f32.xlu1 %v2190_v27  ;;  %v2191_v18 = vmax.f32 %v2175_v3, 0.0 }
 0x27b   :  { %v4611_v49 = vpop.xlane.xlu1 %1870  ;;  %2466 = vadd.xlane.f32.xlu0 %v2446_v14  ;;  %3482 = vrsqrt.f32 %v1890_v52 }
 0x27c   :  { %v1162_v61 = vpop.xlane.xlu0 %1161 }
 0x27d   :  { %v1183_v5 = vmul.f32 %v3477_v33, %v1162_v61  ;;  %v3479_v54 = vpop.eup %3478 }
 0x27e   :  { %2468 = vadd.xlane.f32.xlu1 %v2447_v26 }
 0x27f   :  { %v1278_v8 = vrot.slane %v1183_v5, %v4614_v12  ;;  %v4619_v27 = vpop.xlane.xlu1 %1163  ;;  %2117 = vadd.xlane.f32.xlu0 %v2095_v31  ;;  %v2610_v31 = vmul.f32 %v4300_v60, %v4300_v60  ;;  %v2353_v60 = vmul.f32 %v4289_v21, %v4289_v21 }
 0x280   :  { %v1708_v14 = vpop.xlane.xlu0 %1707 }
 0x281   :  { %v4625_v51 = vsel %vm1279_vm9, %v1278_v8, %v4540_v53  ;;  %v1729_v33 = vmul.f32 %v3479_v54, %v1708_v14  ;;  %v3481_v52 = vpop.eup %3480  ;;  %v2352_v53 = vmul.f32 %v4279_v48, %v4279_v48 }
 0x282   :  { %2119 = vadd.xlane.f32.xlu1 %v2096_v32 }
 0x283   :  { %v1803_v61 = vrot.slane %v1729_v33, %v4614_v12  ;;  %v4628_v5 = vpop.xlane.xlu1 %1709  ;;  %2631 = vadd.xlane.f32.xlu0 %v2609_v59  ;;  %v4645_v33 = vld [vmem:[#allocation2 + $0x38] sm:$0xff] }
 0x284   :  { %v1451_v26 = vpop.xlane.xlu0 %1450  ;;  %5345 = vst [vmem:[#allocation47_spill] sm:$0xff] %v4645_v33  ;;  %v2176_v30 = vmul.f32 %v4645_v33, %v4284_v36 }
 0x285   :  { %v4640_v8 = vsel %vm1279_vm9, %v1803_v61, %v4549_v45  ;;  %v1472_v54 = vmul.f32 %v3481_v52, %v1451_v26  ;;  %v3483_v14 = vpop.eup %3482  ;;  %v2432_v45 = vmul.f32 %v4632_v41, %v4279_v48 }
 0x286   :  { %2633 = vadd.xlane.f32.xlu1 %v2610_v31  ;;  %v2192_v36 = vmax.f32 %v2176_v30, 0.0 }
 0x287   :  { %v1546_v59 = vrot.slane %v1472_v54, %v4614_v12  ;;  %v4643_v32 = vpop.xlane.xlu1 %1452  ;;  %2374 = vadd.xlane.f32.xlu0 %v2352_v53  ;;  %v2433_v53 = vmul.f32 %v4645_v33, %v4289_v21  ;;  %v2448_v3 = vmax.f32 %v2432_v45, 0.0  ;;  %v2612_v45 = vmul.f32 %v4357_v37, %v4357_v37 }
 0x288   :  { %v1965_v11 = vpop.xlane.xlu0 %1964  ;;  %v2099_v33 = vmul.f32 %v4386_v2, %v4386_v2 }
 0x289   :  { %v4655_v61 = vsel %vm1279_vm9, %v1546_v59, %v4560_v0  ;;  %v1986_v52 = vmul.f32 %v3483_v14, %v1965_v11  ;;  %v2097_v0 = vmul.f32 %v4342_v29, %v4342_v29  ;;  %v2449_v11 = vmax.f32 %v2433_v53, 0.0 }
 0x28a   :  { %2376 = vadd.xlane.f32.xlu1 %v2353_v60  ;;  %v2354_v53 = vmul.f32 %v4345_v6, %v4345_v6 }
 0x28b   :  { %v2060_v31 = vrot.slane %v1986_v52, %v4614_v12  ;;  %v4658_v26 = vpop.xlane.xlu1 %1966  ;;  %2213 = vadd.xlane.f32.xlu0 %v2191_v18  ;;  %v2611_v18 = vmul.f32 %v4352_v58, %v4352_v58 }
 0x28c   :  { %v1070_v54 = vpop.xlane.xlu0 %1069 }
 0x28d   :  { %v4664_v48 = vsel %vm1279_vm9, %v2060_v31, %v4574_v38  ;;  %v2098_v38 = vmul.f32 %v4347_v10, %v4347_v10  ;;  %v4684_v31 = vld [vmem:[#allocation2 + $0x40] sm:$0xff] }
 0x28e   :  { %2215 = vadd.xlane.f32.xlu1 %v2192_v36  ;;  %5346 = vst [vmem:[#allocation48_spill] sm:$0xff] %v4684_v31  ;;  %v2177_v36 = vmul.f32 %v4684_v31, %v4342_v29  ;;  %v2434_v29 = vmul.f32 %v4684_v31, %v4345_v6  ;;  %v1088_v6 = vmax.f32 %v4569_v40, 1e-12  ;;  %v2100_v40 = vmul.f32 %v4395_v57, %v4395_v57 }
 0x28f   :  { %v1072_v60 = vpop.xlane.xlu1 %1071  ;;  %2470 = vadd.xlane.f32.xlu0 %v2448_v3 }
 0x290   :  { %v4668_v59 = vpop.xlane.xlu0 %1615  ;;  %v2193_v12 = vmax.f32 %v2177_v36, 0.0  ;;  %3484 = vrsqrt.f32 %v1088_v6  ;;  %v1288_v6 = vadd.s32 4294967200, %v4188_v25 }
 0x292   :  { %2472 = vadd.xlane.f32.xlu1 %v2449_v11 }
 0x293   :  { %v4672_v21 = vpop.xlane.xlu1 %1617  ;;  %2121 = vadd.xlane.f32.xlu0 %v2097_v0  ;;  %v4692_v0 = vld [vmem:[#allocation2 + $0x48] sm:$0xff] }
 0x294   :  { %v4676_v14 = vpop.xlane.xlu0 %1358  ;;  %5347 = vst [vmem:[#allocation49_spill] sm:$0xff] %v4692_v0  ;;  %v2178_v11 = vmul.f32 %v4692_v0, %v4347_v10  ;;  %v2450_v10 = vmax.f32 %v2434_v29, 0.0  ;;  %v2613_v29 = vmul.f32 %v4405_v50, %v4405_v50 }
 0x296   :  { %2123 = vadd.xlane.f32.xlu1 %v2098_v38 }
 0x297   :  { %v4678_v30 = vpop.xlane.xlu1 %1360  ;;  %2635 = vadd.xlane.f32.xlu0 %v2611_v18  ;;  %v2355_v18 = vmul.f32 %v4349_v16, %v4349_v16 }
 0x298   :  { %v4682_v52 = vpop.xlane.xlu0 %1872 }
 0x29a   :  { %2637 = vadd.xlane.f32.xlu1 %v2612_v45  ;;  %v2194_v45 = vmax.f32 %v2178_v11, 0.0  ;;  %v1634_v11 = vmax.f32 %v4586_v28, 1e-12  ;;  %v1377_v28 = vmax.f32 %v4598_v47, 1e-12 }
 0x29b   :  { %v4690_v3 = vpop.xlane.xlu1 %1874  ;;  %2378 = vadd.xlane.f32.xlu0 %v2354_v53  ;;  %v2435_v53 = vmul.f32 %v4692_v0, %v4349_v16  ;;  %v1281_v16 = vadd.s32 4294967208, %v4188_v25  ;;  %v1090_v0 = vmax.f32 %v1072_v60, 1e-12  ;;  %v1636_v60 = vmax.f32 %v4672_v21, 1e-12 }
 0x29c   :  { %v4698_v38 = vpop.xlane.xlu0 %1165  ;;  %v1378_v47 = vmax.f32 %v4676_v14, 1e-12  ;;  %v1295_v21 = vadd.s32 4294967192, %v4188_v25  ;;  %v4748_v14 = vld [vmem:[#allocation2 + $0x58] sm:$0xff]  ;;  %v1893_v31 = vmax.f32 %v4690_v3, 1e-12 }
 0x29d   :  { %v2451_v36 = vmax.f32 %v2435_v53, 0.0  ;;  %5349 = vst [vmem:[#allocation51_spill] sm:$0xff] %v4748_v14 }
 0x29e   :  { %2380 = vadd.xlane.f32.xlu1 %v2355_v18 }
 0x29f   :  { %v4702_v37 = vpop.xlane.xlu1 %1167  ;;  %2217 = vadd.xlane.f32.xlu0 %v2193_v12  ;;  %v1089_v12 = vmax.f32 %v1070_v54, 1e-12  ;;  %v1635_v54 = vmax.f32 %v4668_v59, 1e-12  ;;  %v2614_v59 = vmul.f32 %v4415_v34, %v4415_v34 }
 0x2a0   :  { %v4706_v58 = vpop.xlane.xlu0 %1711 }
 0x2a1   :  { %3486 = vrsqrt.f32 %v1089_v12 }
 0x2a2   :  { %2219 = vadd.xlane.f32.xlu1 %v2194_v45  ;;  %3488 = vrsqrt.f32 %v1634_v11  ;;  %v4738_v11 = vld [vmem:[#allocation2 + $0x50] sm:$0xff] }
 0x2a3   :  { %v4710_v41 = vpop.xlane.xlu1 %1713  ;;  %2474 = vadd.xlane.f32.xlu0 %v2450_v10  ;;  %v1891_v10 = vmax.f32 %v4611_v49, 1e-12  ;;  %3490 = vrsqrt.f32 %v1090_v0  ;;  %5348 = vst [vmem:[#allocation50_spill] sm:$0xff] %v4738_v11  ;;  %v2179_v49 = vmul.f32 %v4738_v11, %v4386_v2  ;;  %v2436_v0 = vmul.f32 %v4738_v11, %v4392_v15  ;;  %v5350_v2 = vld [vmem:[#allocation37_spill] sm:$0xff]  ;;  %v4762_v11 = vld [vmem:[#allocation2 + $0x60] sm:$0xff] }
 0x2a4   :  { %v4713_v18 = vpop.xlane.xlu0 %1454  ;;  %3492 = vrsqrt.f32 %v1635_v54  ;;  %v2180_v54 = vmul.f32 %v4748_v14, %v4395_v57  ;;  %v4754_v34 = vmul.f32 %v4748_v14, %v5350_v2 }
 0x2a5   :  { %3494 = vrsqrt.f32 %v1377_v28  ;;  %v2195_v57 = vmax.f32 %v2179_v49, 0.0 }
 0x2a6   :  { %2476 = vadd.xlane.f32.xlu1 %v2451_v36  ;;  %v4729_v36 = vsub.s32 %v1281_v16, %v4194_v22  ;;  %v2356_v16 = vmul.f32 %v4392_v15, %v4392_v15  ;;  %3496 = vrsqrt.f32 %v1891_v10  ;;  %v1892_v15 = vmax.f32 %v4682_v52, 1e-12 }
 0x2a7   :  { %v4719_v45 = vpop.xlane.xlu1 %1456  ;;  %2125 = vadd.xlane.f32.xlu0 %v2099_v33  ;;  %3498 = vrsqrt.f32 %v1636_v60  ;;  %v3485_v60 = vpop.eup %3484  ;;  %v4769_v52 = vsub.s32 %v1295_v21, %v4194_v22  ;;  %v2196_v49 = vmax.f32 %v2180_v54, 0.0 }
 0x2a8   :  { %v4723_v53 = vpop.xlane.xlu0 %1968  ;;  %3500 = vrsqrt.f32 %v1378_v47  ;;  %v1184_v47 = vmul.f32 %v3485_v60, %v4619_v27 }
 0x2aa   :  { %2127 = vadd.xlane.f32.xlu1 %v2100_v40  ;;  %v1379_v40 = vmax.f32 %v4678_v30, 1e-12  ;;  %v2357_v30 = vmul.f32 %v5350_v2, %v5350_v2 }
 0x2ab   :  { %v4731_v33 = vpop.xlane.xlu1 %1970  ;;  %2639 = vadd.xlane.f32.xlu0 %v2613_v29  ;;  %v3487_v2 = vpop.eup %3486 }
 0x2ac   :  { %v1074_v12 = vpop.xlane.xlu0 %1073  ;;  %v1185_v20 = vmul.f32 %v3487_v2, %v4698_v38  ;;  %v4783_v38 = vmul.f32 %v4762_v11, %v4441_v44 }
 0x2ad   :  { %v1091_v29 = vmax.f32 %v1074_v12, 1e-12 }
 0x2ae   :  { %2641 = vadd.xlane.f32.xlu1 %v2614_v59  ;;  %v4758_v59 = vsub.s32 %v1288_v6, %v4194_v22  ;;  %v2452_v6 = vmax.f32 %v2436_v0, 0.0  ;;  %v2101_v0 = vmul.f32 %v4438_v23, %v4438_v23 }
 0x2af   :  { %v1076_v28 = vpop.xlane.xlu1 %1075  ;;  %2382 = vadd.xlane.f32.xlu0 %v2356_v16  ;;  %v4766_v16 = vmul.f32 %v4762_v11, %v4438_v23  ;;  %3502 = vrsqrt.f32 %v1091_v29  ;;  %v3489_v29 = vpop.eup %3488  ;;  %v1285_v23 = vrot.slane %v1184_v47, %v4729_v36 }
 0x2b0   :  { %v1620_v10 = vpop.xlane.xlu0 %1619  ;;  %v1092_v12 = vmax.f32 %v1076_v28, 1e-12  ;;  %3504 = vrsqrt.f32 %v1379_v40  ;;  %v2453_v28 = vmax.f32 %v4754_v34, 0.0  ;;  %v2358_v34 = vmul.f32 %v4441_v44, %v4441_v44  ;;  %v3491_v40 = vpop.eup %3490  ;;  %v4792_v44 = vld [vmem:[#allocation2 + $0x68] sm:$0xff] }
 0x2b1   :  { %v1637_v14 = vmax.f32 %v1620_v10, 1e-12  ;;  %3506 = vrsqrt.f32 %v1892_v15  ;;  %v1730_v54 = vmul.f32 %v3489_v29, %v4628_v5  ;;  %v3493_v15 = vpop.eup %3492  ;;  %v4796_v2 = vmul.f32 %v4792_v44, %v4444_v42 }
 0x2b2   :  { %2384 = vadd.xlane.f32.xlu1 %v2357_v30  ;;  %3508 = vrsqrt.f32 %v1092_v12  ;;  %v1302_v12 = vadd.s32 4294967184, %v4188_v25  ;;  %v3495_v5 = vpop.eup %3494  ;;  %v1731_v60 = vmul.f32 %v3493_v15, %v4706_v58 }
 0x2b3   :  { %v1622_v50 = vpop.xlane.xlu1 %1621  ;;  %2221 = vadd.xlane.f32.xlu0 %v2195_v57  ;;  %3510 = vrsqrt.f32 %v1637_v14  ;;  %v2102_v57 = vmul.f32 %v4444_v42, %v4444_v42  ;;  %v1292_v14 = vrot.slane %v1185_v20, %v4758_v59  ;;  %v3497_v47 = vpop.eup %3496  ;;  %v1808_v20 = vrot.slane %v1730_v54, %v4729_v36 }
 0x2b4   :  { %v1363_v21 = vpop.xlane.xlu0 %1362  ;;  %v1638_v30 = vmax.f32 %v1622_v50, 1e-12  ;;  %v1186_v50 = vmul.f32 %v3491_v40, %v4702_v37  ;;  %3512 = vrsqrt.f32 %v1893_v31  ;;  %v3499_v31 = vpop.eup %3498  ;;  %v1473_v58 = vmul.f32 %v3495_v5, %v4643_v32 }
 0x2b5   :  { %v1380_v3 = vmax.f32 %v1363_v21, 1e-12  ;;  %v1309_v21 = vadd.s32 4294967176, %v4188_v25  ;;  %v3501_v40 = vpop.eup %3500  ;;  %v1287_v42 = vsel %vm1286_vm10, %v1285_v23, %v4625_v51  ;;  %v1732_v15 = vmul.f32 %v3499_v31, %v4710_v41 }
 0x2b6   :  { %2223 = vadd.xlane.f32.xlu1 %v2196_v49  ;;  %3514 = vrsqrt.f32 %v1638_v30  ;;  %v2359_v49 = vmul.f32 %v4451_v17, %v4451_v17  ;;  %v1299_v30 = vrot.slane %v1186_v50, %v4769_v52  ;;  %v4808_v25 = vsub.s32 %v1302_v12, %v4194_v22 }
 0x2b7   :  { %v1365_v10 = vpop.xlane.xlu1 %1364  ;;  %2478 = vadd.xlane.f32.xlu0 %v2452_v6  ;;  %3516 = vrsqrt.f32 %v1380_v3  ;;  %v1294_v54 = vsel %vm1293_vm11, %v1292_v14, %v1287_v42  ;;  %v1813_v32 = vrot.slane %v1731_v60, %v4758_v59  ;;  %v1551_v50 = vrot.slane %v1473_v58, %v4729_v36 }
 0x2b8   :  { %v1877_v37 = vpop.xlane.xlu0 %1876  ;;  %v1381_v6 = vmax.f32 %v1365_v10, 1e-12  ;;  %v4817_v12 = vsub.s32 %v1309_v21, %v4194_v22  ;;  %v1301_v60 = vsel %vm1300_vm12, %v1299_v30, %v1294_v54  ;;  %v2439_v42 = vmul.f32 %v4792_v44, %v4451_v17 }
 0x2b9   :  { %v1894_v29 = vmax.f32 %v1877_v37, 1e-12  ;;  %v3503_v27 = vpop.eup %3502  ;;  %v1818_v37 = vrot.slane %v1732_v15, %v4769_v52  ;;  %v1552_v15 = vsel %vm1286_vm10, %v1551_v50, %v4655_v61 }
 0x2ba   :  { %2480 = vadd.xlane.f32.xlu1 %v2453_v28  ;;  %v1474_v28 = vmul.f32 %v3501_v40, %v4713_v18  ;;  %v3505_v5 = vpop.eup %3504  ;;  %3518 = vrsqrt.f32 %v1381_v6  ;;  %v1987_v18 = vmul.f32 %v3497_v47, %v4658_v26  ;;  %v2454_v40 = vmax.f32 %v4783_v38, 0.0 }
 0x2bb   :  { %v1879_v10 = vpop.xlane.xlu1 %1878  ;;  %2129 = vadd.xlane.f32.xlu0 %v2101_v0  ;;  %v3507_v41 = vpop.eup %3506  ;;  %v1809_v0 = vsel %vm1286_vm10, %v1808_v20, %v4640_v8  ;;  %3520 = vrsqrt.f32 %v1894_v29  ;;  %v5351_v38 = vmax.f32 %v4766_v16, 0.0 }
 0x2bc   :  { %v1170_v3 = vpop.xlane.xlu0 %1169  ;;  %v1895_v51 = vmax.f32 %v1879_v10, 1e-12  ;;  %v3509_v14 = vpop.eup %3508  ;;  %v1814_v8 = vsel %vm1293_vm11, %v1813_v32, %v1809_v0  ;;  %v1556_v20 = vrot.slane %v1474_v28, %v4758_v59  ;;  %v1988_v58 = vmul.f32 %v3507_v41, %v4723_v53 }
 0x2bd   :  { %v1187_v23 = vmul.f32 %v3503_v27, %v1170_v3  ;;  %v3511_v31 = vpop.eup %3510  ;;  %v2065_v53 = vrot.slane %v1987_v18, %v4729_v36  ;;  %v1819_v10 = vsel %vm1300_vm12, %v1818_v37, %v1814_v8  ;;  %v2103_v18 = vmul.f32 %v4481_v13, %v4481_v13 }
 0x2be   :  { %2131 = vadd.xlane.f32.xlu1 %v2102_v57  ;;  %v1475_v57 = vmul.f32 %v3505_v5, %v4719_v45  ;;  %3522 = vrsqrt.f32 %v1895_v51  ;;  %v3513_v29 = vpop.eup %3512  ;;  %v1557_v61 = vsel %vm1293_vm11, %v1556_v20, %v1552_v15  ;;  %v2070_v51 = vrot.slane %v1988_v58, %v4758_v59 }
 0x2bf   :  { %v1306_v27 = vrot.slane %v1187_v23, %v4808_v25  ;;  %v1172_v6 = vpop.xlane.xlu1 %1171  ;;  %2386 = vadd.xlane.f32.xlu0 %v2358_v34  ;;  %v2198_v34 = vmax.f32 %v4796_v2, 0.0  ;;  %v1989_v28 = vmul.f32 %v3513_v29, %v4731_v33  ;;  %v2066_v50 = vsel %vm1286_vm10, %v2065_v53, %v4664_v48 }
 0x2c0   :  { %v1188_v22 = vmul.f32 %v3509_v14, %v1172_v6  ;;  %v1716_v21 = vpop.xlane.xlu0 %1715  ;;  %v3515_v45 = vpop.eup %3514  ;;  %v1561_v17 = vrot.slane %v1475_v57, %v4769_v52  ;;  %v2455_v33 = vmax.f32 %v2439_v42, 0.0  ;;  %v2071_v57 = vsel %vm1293_vm11, %v2070_v51, %v2066_v50 }
 0x2c1   :  { %v1308_v26 = vsel %vm1307_vm13, %v1306_v27, %v1301_v60  ;;  %v1733_v47 = vmul.f32 %v3511_v31, %v1716_v21  ;;  %v3517_v2 = vpop.eup %3516  ;;  %v2075_v6 = vrot.slane %v1989_v28, %v4769_v52  ;;  %v2360_v53 = vmul.f32 %v4488_v55, %v4488_v55 }
 0x2c2   :  { %v1313_v30 = vrot.slane %v1188_v22, %v4817_v12  ;;  %2388 = vadd.xlane.f32.xlu1 %v2359_v49  ;;  %v1562_v27 = vsel %vm1300_vm12, %v1561_v17, %v1557_v61  ;;  %v5352_v61 = vld [vmem:[#allocation14_spill] sm:$0xff] }
 0x2c3   :  { %v1823_v54 = vrot.slane %v1733_v47, %v4808_v25  ;;  %v1718_v32 = vpop.xlane.xlu1 %1717  ;;  %2225 = vadd.xlane.f32.xlu0 %v5351_v38  ;;  %v2076_v29 = vsel %vm1300_vm12, %v2075_v6, %v2071_v57  ;;  %v2863_v51 = vmul.f32 %v5352_v61, %v5352_v61 }
 0x2c4   :  { %v1315_v49 = vsel %vm1314_vm14, %v1313_v30, %v1308_v26  ;;  %v1734_v3 = vmul.f32 %v3515_v45, %v1718_v32  ;;  %v1459_v5 = vpop.xlane.xlu0 %1458  ;;  %v3519_v0 = vpop.eup %3518  ;;  %v4863_v45 = vld [vmem:[#allocation2 + $0x70] sm:$0xff] }
 0x2c5   :  { %1317 = vst [vmem:[#allocation7] sm:$0x1] %v1315_v49  ;;  %v1824_v23 = vsel %vm1307_vm13, %v1823_v54, %v1819_v10  ;;  %v1476_v41 = vmul.f32 %v3517_v2, %v1459_v5  ;;  %v3521_v37 = vpop.eup %3520  ;;  %v2183_v15 = vmul.f32 %v4863_v45, %v4481_v13  ;;  %v2361_v2 = vmul.f32 %v4494_v4, %v4494_v4 }
 0x2c6   :  { %v1828_v16 = vrot.slane %v1734_v3, %v4817_v12  ;;  %2227 = vadd.xlane.f32.xlu1 %v2198_v34  ;;  %v2104_v34 = vmul.f32 %v4491_v7, %v4491_v7  ;;  %v2440_v49 = vmul.f32 %v4863_v45, %v4488_v55 }
 0x2c7   :  { %v1566_v14 = vrot.slane %v1476_v41, %v4808_v25  ;;  %v1461_v60 = vpop.xlane.xlu1 %1460  ;;  %2482 = vadd.xlane.f32.xlu0 %v2454_v40  ;;  %v2199_v13 = vmax.f32 %v2183_v15, 0.0  ;;  %v5358_v15 = vld [vmem:[#allocation15_spill] sm:$0xff] }
 0x2c8   :  { %v1829_v31 = vsel %vm1314_vm14, %v1828_v16, %v1824_v23  ;;  %v1477_v8 = vmul.f32 %v3519_v0, %v1461_v60  ;;  %v1973_v20 = vpop.xlane.xlu0 %1972  ;;  %v3523_v58 = vpop.eup %3522  ;;  %v4882_v23 = vld [vmem:[#allocation2 + $0x78] sm:$0xff]  ;;  %v2456_v0 = vmax.f32 %v2440_v49, 0.0  ;;  %v5360_v49 = vld [vmem:[#allocation32_spill] sm:$0xff] }
 0x2c9   :  { %1831 = vst [vmem:[#allocation7 + $0x2] sm:$0x1] %v1829_v31  ;;  %v1567_v48 = vsel %vm1307_vm13, %v1566_v14, %v1562_v27  ;;  %v1990_v22 = vmul.f32 %v3521_v37, %v1973_v20  ;;  %v2184_v41 = vmul.f32 %v4882_v23, %v4491_v7  ;;  %v2441_v14 = vmul.f32 %v4882_v23, %v4494_v4  ;;  %v5353_v37 = vld [vmem:[#allocation12_spill] sm:$0xff]  ;;  %v5354_v20 = vld [vmem:[#allocation22_spill] sm:$0xff] }
 0x2ca   :  { %v1571_v21 = vrot.slane %v1477_v8, %v4817_v12  ;;  %2484 = vadd.xlane.f32.xlu1 %v2455_v33  ;;  %v2862_v27 = vmul.f32 %v5353_v37, %v5353_v37  ;;  %v2864_v57 = vmul.f32 %v5354_v20, %v5354_v20 }
 0x2cb   :  { %v2080_v26 = vrot.slane %v1990_v22, %v4808_v25  ;;  %v1975_v47 = vpop.xlane.xlu1 %1974  ;;  %2133 = vadd.xlane.f32.xlu0 %v2103_v18  ;;  %v2200_v33 = vmax.f32 %v2184_v41, 0.0  ;;  %v2457_v31 = vmax.f32 %v2441_v14, 0.0 }
 0x2cc   :  { %v1572_v40 = vsel %vm1314_vm14, %v1571_v21, %v1567_v48  ;;  %v1991_v42 = vmul.f32 %v3523_v58, %v1975_v47  ;;  %v2106_v30 = vpop.xlane.xlu0 %2105  ;;  %v5355_v21 = vld [vmem:[#allocation24_spill] sm:$0xff] }
 0x2cd   :  { %1574 = vst [vmem:[#allocation7 + $0x1] sm:$0x1] %v1572_v40  ;;  %v2081_v10 = vsel %vm1307_vm13, %v2080_v26, %v2076_v29  ;;  %v2137_v32 = vmax.f32 %v2106_v30, 1e-12  ;;  %v2865_v58 = vmul.f32 %v5355_v21, %v5355_v21  ;;  %v5356_v40 = vld [vmem:[#allocation28_spill] sm:$0xff] }
 0x2ce   :  { %v2085_v54 = vrot.slane %v1991_v42, %v4817_v12  ;;  %2135 = vadd.xlane.f32.xlu1 %v2104_v34  ;;  %v2866_v34 = vmul.f32 %v5356_v40, %v5356_v40  ;;  %v5357_v42 = vld [vmem:[#allocation16_spill] sm:$0xff] }
 0x2cf   :  { %v2108_v38 = vpop.xlane.xlu1 %2107  ;;  %2390 = vadd.xlane.f32.xlu0 %v2360_v53  ;;  %3524 = vrsqrt.f32 %v2137_v32 }
 0x2d0   :  { %v2086_v17 = vsel %vm1314_vm14, %v2085_v54, %v2081_v10  ;;  %v4874_v28 = vpop.xlane.xlu0 %2619  ;;  %v2138_v3 = vmax.f32 %v2108_v38, 1e-12  ;;  %v5359_v38 = vld [vmem:[#allocation30_spill] sm:$0xff] }
 0x2d1   :  { %2088 = vst [vmem:[#allocation7 + $0x3] sm:$0x1] %v2086_v17 }
 0x2d2   :  { %2392 = vadd.xlane.f32.xlu1 %v2361_v2  ;;  %3526 = vrsqrt.f32 %v2138_v3  ;;  %v2867_v2 = vmul.f32 %v5359_v38, %v5359_v38  ;;  %v2868_v3 = vmul.f32 %v5360_v49, %v5360_v49 }
 0x2d3   :  { %v4878_v5 = vpop.xlane.xlu1 %2621  ;;  %2229 = vadd.xlane.f32.xlu0 %v2199_v13 }
 0x2d4   :  { %v2363_v16 = vpop.xlane.xlu0 %2362 }
 0x2d5   :  { %v2394_v50 = vmax.f32 %v2363_v16, 1e-12 }
 0x2d6   :  { %2882 = vadd.xlane.f32.xlu1 %v2863_v51 }
 0x2d7   :  { %3528 = vrsqrt.f32 %v2394_v50  ;;  %v2365_v55 = vpop.xlane.xlu1 %2364  ;;  %2486 = vadd.xlane.f32.xlu0 %v2456_v0 }
 0x2d8   :  { %v2395_v18 = vmax.f32 %v2365_v55, 1e-12  ;;  %v4888_v60 = vpop.xlane.xlu0 %2876  ;;  %v5361_v55 = vld [vmem:[#allocation34_spill] sm:$0xff] }
 0x2d9   :  { %v3525_v6 = vpop.eup %3524 }
 0x2da   :  { %3530 = vrsqrt.f32 %v2395_v18  ;;  %2231 = vadd.xlane.f32.xlu1 %v2200_v33  ;;  %v2869_v33 = vmul.f32 %v5361_v55, %v5361_v55 }
 0x2db   :  { %v4892_v7 = vpop.xlane.xlu1 %2878  ;;  %2880 = vadd.xlane.f32.xlu0 %v2862_v27  ;;  %v5362_v27 = vld [vmem:[#allocation39_spill] sm:$0xff] }
 0x2dc   :  { %v2202_v8 = vpop.xlane.xlu0 %2201  ;;  %v3527_v4 = vpop.eup %3526 }
 0x2dd   :  { %v2233_v48 = vmul.f32 %v3525_v6, %v2202_v8  ;;  %v2870_v6 = vmul.f32 %v5362_v27, %v5362_v27  ;;  %v2615_v8 = vmul.f32 %v4557_v9, %v4557_v9 }
 0x2de   :  { %2488 = vadd.xlane.f32.xlu1 %v2457_v31 }
 0x2df   :  { %v2204_v22 = vpop.xlane.xlu1 %2203  ;;  %2884 = vadd.xlane.f32.xlu0 %v2864_v57  ;;  %v2268_v30 = vrot.slane %v2233_v48, %v5357_v42  ;;  %v5363_v48 = vld [vmem:[#allocation41_spill] sm:$0xff] }
 0x2e0   :  { %v2234_v26 = vmul.f32 %v3527_v4, %v2204_v22  ;;  %v2459_v47 = vpop.xlane.xlu0 %2458  ;;  %v2871_v4 = vmul.f32 %v5363_v48, %v5363_v48 }
 0x2e1   :  { %v3529_v29 = vpop.eup %3528 }
 0x2e2   :  { %v2272_v53 = vrot.slane %v2234_v26, %v5358_v15  ;;  %v2490_v10 = vmul.f32 %v3529_v29, %v2459_v47  ;;  %2886 = vadd.xlane.f32.xlu1 %v2865_v58  ;;  %v2872_v26 = vmul.f32 %v4567_v46, %v4567_v46 }
 0x2e3   :  { %v2461_v54 = vpop.xlane.xlu1 %2460  ;;  %2888 = vadd.xlane.f32.xlu0 %v2866_v34 }
 0x2e4   :  { %v3531_v32 = vpop.eup %3530  ;;  %v2273_v17 = vsel %vm1216_vm0, %v2272_v53, %v2268_v30  ;;  %v2110_v13 = vpop.xlane.xlu0 %2109  ;;  %v2525_v16 = vrot.slane %v2490_v10, %v5357_v42  ;;  %v2616_v53 = vmul.f32 %v4571_v1, %v4571_v1 }
 0x2e5   :  { %v2491_v51 = vmul.f32 %v3531_v32, %v2461_v54  ;;  %v2139_v41 = vmax.f32 %v2110_v13, 1e-12  ;;  %v2617_v32 = vmul.f32 %v4596_v56, %v4596_v56  ;;  %v3672_v13 = vld [vmem:[#allocation2] sm:$0xff] }
 0x2e6   :  { %2890 = vadd.xlane.f32.xlu1 %v2867_v2 }
 0x2e7   :  { %v2529_v0 = vrot.slane %v2491_v51, %v5358_v15  ;;  %3532 = vrsqrt.f32 %v2139_v41  ;;  %v2112_v50 = vpop.xlane.xlu1 %2111  ;;  %2892 = vadd.xlane.f32.xlu0 %v2868_v3  ;;  %v2683_v3 = vmul.f32 %v3672_v13, %v4140_v19  ;;  %v2873_v51 = vmul.f32 %v4578_v63, %v4578_v63  ;;  %v5364_v41 = vld [vmem:[#allocation25_spill] sm:$0xff] }
 0x2e8   :  { %v2140_v14 = vmax.f32 %v2112_v50, 1e-12  ;;  %v4911_v18 = vpop.xlane.xlu0 %2623  ;;  %v3673_v50 = vld [vmem:[#allocation2 + $0x8] sm:$0xff] }
 0x2e9   :  { %v2530_v31 = vsel %vm1216_vm0, %v2529_v0, %v2525_v16 }
 0x2ea   :  { %3534 = vrsqrt.f32 %v2140_v14  ;;  %2894 = vadd.xlane.f32.xlu1 %v2869_v33  ;;  %v2684_v33 = vmul.f32 %v3673_v50, %v4144_v39 }
 0x2eb   :  { %v4918_v57 = vpop.xlane.xlu1 %2625  ;;  %2896 = vadd.xlane.f32.xlu0 %v2870_v6 }
 0x2ec   :  { %v2367_v22 = vpop.xlane.xlu0 %2366 }
 0x2ed   :  { %v2396_v58 = vmax.f32 %v2367_v22, 1e-12 }
 0x2ee   :  { %2898 = vadd.xlane.f32.xlu1 %v2871_v4 }
 0x2ef   :  { %3536 = vrsqrt.f32 %v2396_v58  ;;  %v2369_v47 = vpop.xlane.xlu1 %2368  ;;  %2643 = vadd.xlane.f32.xlu0 %v2615_v8  ;;  %v5365_v8 = vld [vmem:[#allocation26_spill] sm:$0xff]  ;;  %v2699_v58 = vmax.f32 %v2683_v3, 0.0 }
 0x2f0   :  { %v2397_v29 = vmax.f32 %v2369_v47, 1e-12  ;;  %v2206_v34 = vpop.xlane.xlu0 %2205  ;;  %v2940_v47 = vmul.f32 %v3672_v13, %v4142_v43 }
 0x2f1   :  { %v3533_v30 = vpop.eup %3532 }
 0x2f2   :  { %3538 = vrsqrt.f32 %v2397_v29  ;;  %v2235_v10 = vmul.f32 %v3533_v30, %v2206_v34  ;;  %2900 = vadd.xlane.f32.xlu1 %v2872_v26  ;;  %v2700_v29 = vmax.f32 %v2684_v33, 0.0  ;;  %v2956_v43 = vmax.f32 %v2940_v47, 0.0 }
 0x2f3   :  { %v2208_v54 = vpop.xlane.xlu1 %2207  ;;  %2645 = vadd.xlane.f32.xlu0 %v2616_v53 }
 0x2f4   :  { %v3535_v2 = vpop.eup %3534  ;;  %v2277_v16 = vrot.slane %v2235_v10, %v5364_v41  ;;  %v2463_v0 = vpop.xlane.xlu0 %2462  ;;  %v2941_v10 = vmul.f32 %v3673_v50, %v4146_v62  ;;  %v3674_v50 = vld [vmem:[#allocation2 + $0x10] sm:$0xff] }
 0x2f5   :  { %v2236_v14 = vmul.f32 %v3535_v2, %v2208_v54  ;;  %v2874_v54 = vmul.f32 %v4601_v24, %v4601_v24  ;;  %v2685_v33 = vmul.f32 %v3674_v50, %v4182_v35 }
 0x2f6   :  { %v2278_v6 = vsel %vm1223_vm1, %v2277_v16, %v2273_v17  ;;  %2902 = vadd.xlane.f32.xlu1 %v2873_v51  ;;  %v2957_v62 = vmax.f32 %v2941_v10, 0.0 }
 0x2f7   :  { %v2282_v4 = vrot.slane %v2236_v14, %v5365_v8  ;;  %v2465_v22 = vpop.xlane.xlu1 %2464  ;;  %2647 = vadd.xlane.f32.xlu0 %v2617_v32 }
 0x2f8   :  { %v2114_v26 = vpop.xlane.xlu0 %2113 }
 0x2f9   :  { %v3537_v19 = vpop.eup %3536  ;;  %v2283_v34 = vsel %vm1230_vm2, %v2282_v4, %v2278_v6  ;;  %v2141_v30 = vmax.f32 %v2114_v26, 1e-12  ;;  %v5366_v6 = vld [vmem:[#allocation19_spill] sm:$0xff]  ;;  %v2701_v26 = vmax.f32 %v2685_v33, 0.0 }
 0x2fa   :  { %v2492_v53 = vmul.f32 %v3537_v19, %v2463_v0  ;;  %2715 = vadd.xlane.f32.xlu1 %v2699_v58  ;;  %v2618_v4 = vmul.f32 %v5366_v6, %v5366_v6  ;;  %v2942_v19 = vmul.f32 %v3674_v50, %v5353_v37  ;;  %v5370_v50 = vld [vmem:[#allocation21_spill] sm:$0xff]  ;;  %v5371_v33 = vld [vmem:[#allocation11_spill] sm:$0xff] }
 0x2fb   :  { %3540 = vrsqrt.f32 %v2141_v30  ;;  %v2116_v39 = vpop.xlane.xlu1 %2115  ;;  %2717 = vadd.xlane.f32.xlu0 %v2700_v29 }
 0x2fc   :  { %v3539_v17 = vpop.eup %3538  ;;  %v2534_v32 = vrot.slane %v2492_v53, %v5364_v41  ;;  %v2142_v2 = vmax.f32 %v2116_v39, 1e-12  ;;  %v4941_v3 = vpop.xlane.xlu0 %2627  ;;  %v3675_v53 = vld [vmem:[#allocation2 + $0x18] sm:$0xff] }
 0x2fd   :  { %v2493_v13 = vmul.f32 %v3539_v17, %v2465_v22  ;;  %v5367_v39 = vld [vmem:[#allocation13_spill] sm:$0xff]  ;;  %v5368_v17 = vld [vmem:[#allocation18_spill] sm:$0xff] }
 0x2fe   :  { %v2535_v51 = vsel %vm1223_vm1, %v2534_v32, %v2530_v31  ;;  %3542 = vrsqrt.f32 %v2142_v2  ;;  %2904 = vadd.xlane.f32.xlu1 %v2874_v54  ;;  %v2686_v35 = vmul.f32 %v3675_v53, %v5367_v39  ;;  %v2875_v10 = vmul.f32 %v5368_v17, %v5368_v17  ;;  %v5373_v39 = vld [vmem:[#allocation23_spill] sm:$0xff] }
 0x2ff   :  { %v2539_v16 = vrot.slane %v2493_v13, %v5365_v8  ;;  %v4945_v0 = vpop.xlane.xlu1 %2629  ;;  %2972 = vadd.xlane.f32.xlu0 %v2956_v43  ;;  %v2958_v43 = vmax.f32 %v2942_v19, 0.0  ;;  %v2943_v13 = vmul.f32 %v3675_v53, %v5352_v61  ;;  %v2944_v19 = vmul.f32 %v5371_v33, %v5354_v20 }
 0x300   :  { %v2371_v14 = vpop.xlane.xlu0 %2370 }
 0x301   :  { %v2540_v58 = vsel %vm1230_vm2, %v2539_v16, %v2535_v51  ;;  %v2398_v22 = vmax.f32 %v2371_v14, 1e-12  ;;  %v5369_v51 = vld [vmem:[#allocation35_spill] sm:$0xff]  ;;  %v2687_v14 = vmul.f32 %v5371_v33, %v5370_v50 }
 0x302   :  { %2974 = vadd.xlane.f32.xlu1 %v2957_v62  ;;  %v2702_v62 = vmax.f32 %v2686_v35, 0.0  ;;  %v5374_v35 = vld [vmem:[#allocation17_spill] sm:$0xff] }
 0x303   :  { %3544 = vrsqrt.f32 %v2398_v22  ;;  %v2373_v31 = vpop.xlane.xlu1 %2372  ;;  %2649 = vadd.xlane.f32.xlu0 %v2618_v4  ;;  %v2703_v53 = vmax.f32 %v2687_v14, 0.0  ;;  %v5375_v14 = vld [vmem:[#allocation27_spill] sm:$0xff] }
 0x304   :  { %v2399_v47 = vmax.f32 %v2373_v31, 1e-12  ;;  %v2210_v29 = vpop.xlane.xlu0 %2209  ;;  %v5372_v31 = vld [vmem:[#allocation36_spill] sm:$0xff] }
 0x305   :  { %v3541_v30 = vpop.eup %3540 }
 0x306   :  { %3546 = vrsqrt.f32 %v2399_v47  ;;  %v2237_v54 = vmul.f32 %v3541_v30, %v2210_v29  ;;  %2719 = vadd.xlane.f32.xlu1 %v2701_v26  ;;  %v2959_v29 = vmax.f32 %v2943_v13, 0.0  ;;  %v2945_v13 = vmul.f32 %v5374_v35, %v5355_v21 }
 0x307   :  { %v2212_v32 = vpop.xlane.xlu1 %2211  ;;  %2906 = vadd.xlane.f32.xlu0 %v2875_v10  ;;  %v2688_v10 = vmul.f32 %v5374_v35, %v5373_v39  ;;  %v5377_v39 = vld [vmem:[#allocation29_spill] sm:$0xff]  ;;  %v5378_v35 = vld [vmem:[#allocation47_spill] sm:$0xff] }
 0x308   :  { %v3543_v2 = vpop.eup %3542  ;;  %v2287_v37 = vrot.slane %v2237_v54, %v5369_v51  ;;  %v2467_v16 = vpop.xlane.xlu0 %2466  ;;  %v2961_v21 = vmax.f32 %v2945_v13, 0.0 }
 0x309   :  { %v2238_v4 = vmul.f32 %v3543_v2, %v2212_v32  ;;  %v2704_v33 = vmax.f32 %v2688_v10, 0.0  ;;  %v2690_v10 = vmul.f32 %v5378_v35, %v5377_v39 }
 0x30a   :  { %v2288_v22 = vsel %vm1237_vm3, %v2287_v37, %v2283_v34  ;;  %2976 = vadd.xlane.f32.xlu1 %v2958_v43  ;;  %v2960_v37 = vmax.f32 %v2944_v19, 0.0 }
 0x30b   :  { %v2292_v47 = vrot.slane %v2238_v4, %v5372_v31  ;;  %v2469_v26 = vpop.xlane.xlu1 %2468  ;;  %2721 = vadd.xlane.f32.xlu0 %v2702_v62  ;;  %v5376_v4 = vld [vmem:[#allocation46_spill] sm:$0xff] }
 0x30c   :  { %v2118_v61 = vpop.xlane.xlu0 %2117 }
 0x30d   :  { %v3545_v30 = vpop.eup %3544  ;;  %v2293_v54 = vsel %vm1244_vm4, %v2292_v47, %v2288_v22  ;;  %v2143_v32 = vmax.f32 %v2118_v61, 1e-12  ;;  %v2689_v22 = vmul.f32 %v5376_v4, %v5375_v14  ;;  %v2946_v61 = vmul.f32 %v5376_v4, %v5356_v40 }
 0x30e   :  { %v2494_v2 = vmul.f32 %v3545_v30, %v2467_v16  ;;  %2978 = vadd.xlane.f32.xlu1 %v2959_v29  ;;  %v2706_v40 = vmax.f32 %v2690_v10, 0.0 }
 0x30f   :  { %3548 = vrsqrt.f32 %v2143_v32  ;;  %v2120_v34 = vpop.xlane.xlu1 %2119  ;;  %2723 = vadd.xlane.f32.xlu0 %v2703_v53  ;;  %v2705_v53 = vmax.f32 %v2689_v22, 0.0 }
 0x310   :  { %v3547_v43 = vpop.eup %3546  ;;  %v2544_v20 = vrot.slane %v2494_v2, %v5369_v51  ;;  %v2144_v62 = vmax.f32 %v2120_v34, 1e-12  ;;  %v4969_v50 = vpop.xlane.xlu0 %2631  ;;  %v2962_v2 = vmax.f32 %v2946_v61, 0.0  ;;  %v2947_v34 = vmul.f32 %v5378_v35, %v5359_v38 }
 0x311   :  { %v2495_v47 = vmul.f32 %v3547_v43, %v2469_v26 }
 0x312   :  { %v2545_v16 = vsel %vm1237_vm3, %v2544_v20, %v2540_v58  ;;  %3550 = vrsqrt.f32 %v2144_v62  ;;  %2980 = vadd.xlane.f32.xlu1 %v2960_v37  ;;  %v5379_v20 = vld [vmem:[#allocation31_spill] sm:$0xff]  ;;  %v5380_v62 = vld [vmem:[#allocation48_spill] sm:$0xff] }
 0x313   :  { %v2549_v29 = vrot.slane %v2495_v47, %v5372_v31  ;;  %v4975_v19 = vpop.xlane.xlu1 %2633  ;;  %2725 = vadd.xlane.f32.xlu0 %v2704_v33  ;;  %v2691_v33 = vmul.f32 %v5380_v62, %v5379_v20  ;;  %v2963_v47 = vmax.f32 %v2947_v34, 0.0  ;;  %v5386_v20 = vld [vmem:[#allocation50_spill] sm:$0xff] }
 0x314   :  { %v2375_v30 = vpop.xlane.xlu0 %2374 }
 0x315   :  { %v2550_v26 = vsel %vm1244_vm4, %v2549_v29, %v2545_v16  ;;  %v2400_v32 = vmax.f32 %v2375_v30, 1e-12  ;;  %v2948_v16 = vmul.f32 %v5380_v62, %v5360_v49  ;;  %v5381_v29 = vld [vmem:[#allocation42_spill] sm:$0xff]  ;;  %v2707_v61 = vmax.f32 %v2691_v33, 0.0  ;;  %v5382_v30 = vld [vmem:[#allocation33_spill] sm:$0xff] }
 0x316   :  { %2982 = vadd.xlane.f32.xlu1 %v2961_v21 }
 0x317   :  { %3552 = vrsqrt.f32 %v2400_v32  ;;  %v2377_v58 = vpop.xlane.xlu1 %2376  ;;  %2727 = vadd.xlane.f32.xlu0 %v2705_v53  ;;  %v5383_v53 = vld [vmem:[#allocation49_spill] sm:$0xff]  ;;  %v5384_v32 = vld [vmem:[#allocation43_spill] sm:$0xff] }
 0x318   :  { %v2401_v43 = vmax.f32 %v2377_v58, 1e-12  ;;  %v2214_v37 = vpop.xlane.xlu0 %2213  ;;  %v2692_v39 = vmul.f32 %v5383_v53, %v5382_v30  ;;  %v2949_v34 = vmul.f32 %v5383_v53, %v5361_v55  ;;  %v2950_v55 = vmul.f32 %v5386_v20, %v5362_v27  ;;  %v5388_v30 = vld [vmem:[#allocation51_spill] sm:$0xff] }
 0x319   :  { %v3549_v13 = vpop.eup %3548  ;;  %v2951_v27 = vmul.f32 %v5388_v30, %v5363_v48  ;;  %v2696_v48 = vmul.f32 %v4792_v44, %v4571_v1  ;;  %v2954_v1 = vmul.f32 %v4863_v45, %v4601_v24 }
 0x31a   :  { %3554 = vrsqrt.f32 %v2401_v43  ;;  %v2239_v14 = vmul.f32 %v3549_v13, %v2214_v37  ;;  %2984 = vadd.xlane.f32.xlu1 %v2962_v2  ;;  %v2964_v43 = vmax.f32 %v2948_v16, 0.0  ;;  %v2708_v13 = vmax.f32 %v2692_v39, 0.0 }
 0x31b   :  { %v2216_v4 = vpop.xlane.xlu1 %2215  ;;  %2729 = vadd.xlane.f32.xlu0 %v2706_v40  ;;  %v5385_v40 = vld [vmem:[#allocation38_spill] sm:$0xff] }
 0x31c   :  { %v3551_v22 = vpop.eup %3550  ;;  %v2297_v21 = vrot.slane %v2239_v14, %v5381_v29  ;;  %v2471_v38 = vpop.xlane.xlu0 %2470  ;;  %v2693_v62 = vmul.f32 %v5386_v20, %v5385_v40  ;;  %v2952_v40 = vmul.f32 %v4762_v11, %v4567_v46  ;;  %v2697_v46 = vmul.f32 %v4863_v45, %v4596_v56 }
 0x31d   :  { %v2240_v35 = vmul.f32 %v3551_v22, %v2216_v4  ;;  %v2965_v22 = vmax.f32 %v2949_v34, 0.0  ;;  %v2955_v56 = vmul.f32 %v4882_v23, %v5368_v17 }
 0x31e   :  { %v2298_v10 = vsel %vm1251_vm5, %v2297_v21, %v2293_v54  ;;  %2986 = vadd.xlane.f32.xlu1 %v2963_v47  ;;  %v2709_v21 = vmax.f32 %v2693_v62, 0.0 }
 0x31f   :  { %v2302_v58 = vrot.slane %v2240_v35, %v5384_v32  ;;  %v2473_v2 = vpop.xlane.xlu1 %2472  ;;  %2731 = vadd.xlane.f32.xlu0 %v2707_v61  ;;  %v5387_v61 = vld [vmem:[#allocation40_spill] sm:$0xff]  ;;  %v2971_v24 = vmax.f32 %v2955_v56, 0.0 }
 0x320   :  { %v4995_v49 = vpop.xlane.xlu0 %2121  ;;  %v2694_v53 = vmul.f32 %v5388_v30, %v5387_v61  ;;  %v2713_v61 = vmax.f32 %v2697_v46, 0.0  ;;  %v2698_v30 = vmul.f32 %v4882_v23, %v5366_v6 }
 0x321   :  { %v3553_v37 = vpop.eup %3552  ;;  %v5000_v33 = vsel %vm1258_vm6, %v2302_v58, %v2298_v10  ;;  %v2966_v58 = vmax.f32 %v2950_v55, 0.0  ;;  %v2712_v55 = vmax.f32 %v2696_v48, 0.0 }
 0x322   :  { %v2496_v54 = vmul.f32 %v3553_v37, %v2471_v38  ;;  %2988 = vadd.xlane.f32.xlu1 %v2964_v43  ;;  %v2710_v34 = vmax.f32 %v2694_v53, 0.0  ;;  %v2695_v37 = vmul.f32 %v4762_v11, %v4557_v9  ;;  %v2968_v9 = vmax.f32 %v2952_v40, 0.0 }
 0x323   :  { %v5002_v14 = vpop.xlane.xlu1 %2123  ;;  %2733 = vadd.xlane.f32.xlu0 %v2708_v13 }
 0x324   :  { %v3555_v4 = vpop.eup %3554  ;;  %v2554_v47 = vrot.slane %v2496_v54, %v5381_v29  ;;  %v5007_v16 = vpop.xlane.xlu0 %2635  ;;  %v2711_v62 = vmax.f32 %v2695_v37, 0.0  ;;  %v2146_v37 = vmax.f32 %v5002_v14, 1e-12 }
 0x325   :  { %v2497_v39 = vmul.f32 %v3555_v4, %v2473_v2  ;;  %v2967_v2 = vmax.f32 %v2951_v27, 0.0  ;;  %v2953_v4 = vmul.f32 %v4792_v44, %v4578_v63  ;;  %v2970_v44 = vmax.f32 %v2954_v1, 0.0 }
 0x326   :  { %v2555_v38 = vsel %vm1251_vm5, %v2554_v47, %v2550_v26  ;;  %2990 = vadd.xlane.f32.xlu1 %v2965_v22  ;;  %v2145_v27 = vmax.f32 %v4995_v49, 1e-12 }
 0x327   :  { %v2559_v35 = vrot.slane %v2497_v39, %v5384_v32  ;;  %v5013_v10 = vpop.xlane.xlu1 %2637  ;;  %2735 = vadd.xlane.f32.xlu0 %v2709_v21  ;;  %v2969_v47 = vmax.f32 %v2953_v4, 0.0  ;;  %v2714_v39 = vmax.f32 %v2698_v30, 0.0 }
 0x328   :  { %v2379_v43 = vpop.xlane.xlu0 %2378  ;;  %3556 = vrsqrt.f32 %v2145_v27 }
 0x329   :  { %v5020_v13 = vsel %vm1258_vm6, %v2559_v35, %v2555_v38  ;;  %3558 = vrsqrt.f32 %v2146_v37 }
 0x32a   :  { %2992 = vadd.xlane.f32.xlu1 %v2966_v58 }
 0x32b   :  { %v2381_v26 = vpop.xlane.xlu1 %2380  ;;  %2737 = vadd.xlane.f32.xlu0 %v2710_v34 }
 0x32c   :  { %v5024_v20 = vpop.xlane.xlu0 %2217 }
 0x32e   :  { %2994 = vadd.xlane.f32.xlu1 %v2967_v2  ;;  %v2402_v2 = vmax.f32 %v2379_v43, 1e-12 }
 0x32f   :  { %v5028_v54 = vpop.xlane.xlu1 %2219  ;;  %2739 = vadd.xlane.f32.xlu0 %v2711_v62  ;;  %v2403_v62 = vmax.f32 %v2381_v26, 1e-12 }
 0x330   :  { %v5032_v22 = vpop.xlane.xlu0 %2474  ;;  %3560 = vrsqrt.f32 %v2402_v2 }
 0x332   :  { %2996 = vadd.xlane.f32.xlu1 %v2968_v9 }
 0x333   :  { %v5036_v11 = vpop.xlane.xlu1 %2476  ;;  %2741 = vadd.xlane.f32.xlu0 %v2712_v55 }
 0x334   :  { %v2126_v21 = vpop.xlane.xlu0 %2125 }
 0x335   :  { %v2147_v17 = vmax.f32 %v2126_v21, 1e-12  ;;  %v3557_v21 = vpop.eup %3556 }
 0x336   :  { %2998 = vadd.xlane.f32.xlu1 %v2969_v47  ;;  %v3559_v26 = vpop.eup %3558  ;;  %v2241_v56 = vmul.f32 %v3557_v21, %v5024_v20  ;;  %v5390_v20 = vld [vmem:[#allocation45_spill] sm:$0xff]  ;;  %v5391_v21 = vld [vmem:[#allocation20_spill] sm:$0xff] }
 0x337   :  { %v2128_v63 = vpop.xlane.xlu1 %2127  ;;  %2743 = vadd.xlane.f32.xlu0 %v2713_v61  ;;  %3562 = vrsqrt.f32 %v2147_v17  ;;  %v5389_v17 = vld [vmem:[#allocation44_spill] sm:$0xff] }
 0x338   :  { %v5044_v53 = vpop.xlane.xlu0 %2639  ;;  %v2148_v48 = vmax.f32 %v2128_v63, 1e-12  ;;  %3564 = vrsqrt.f32 %v2403_v62 }
 0x33a   :  { %3000 = vadd.xlane.f32.xlu1 %v2970_v44  ;;  %3566 = vrsqrt.f32 %v2148_v48  ;;  %v3561_v44 = vpop.eup %3560 }
 0x33b   :  { %v5046_v38 = vpop.xlane.xlu1 %2641  ;;  %2745 = vadd.xlane.f32.xlu0 %v2714_v39  ;;  %v2498_v27 = vmul.f32 %v3561_v44, %v5032_v22 }
 0x33c   :  { %v2383_v45 = vpop.xlane.xlu0 %2382 }
 0x33d   :  { %v2404_v4 = vmax.f32 %v2383_v45, 1e-12 }
 0x33e   :  { %3002 = vadd.xlane.f32.xlu1 %v2971_v24 }
 0x33f   :  { %v2385_v35 = vpop.xlane.xlu1 %2384  ;;  %3568 = vrsqrt.f32 %v2404_v4 }
 0x340   :  { %v2222_v58 = vpop.xlane.xlu0 %2221  ;;  %v2405_v49 = vmax.f32 %v2385_v35, 1e-12  ;;  %v2242_v35 = vmul.f32 %v3559_v26, %v5028_v54 }
 0x341   :  { %v3563_v39 = vpop.eup %3562 }
 0x342   :  { %v3565_v45 = vpop.eup %3564  ;;  %v2243_v62 = vmul.f32 %v3563_v39, %v2222_v58 }
 0x343   :  { %v2224_v6 = vpop.xlane.xlu1 %2223 }
 0x344   :  { %v2479_v34 = vpop.xlane.xlu0 %2478  ;;  %v3567_v2 = vpop.eup %3566  ;;  %v2317_v26 = vrot.slane %v2243_v62, %v5391_v21 }
 0x345   :  { %v2244_v58 = vmul.f32 %v3567_v2, %v2224_v6 }
 0x347   :  { %v5050_v23 = vpop.xlane.xlu1 %2480  ;;  %v2322_v6 = vrot.slane %v2244_v58, %v4729_v36 }
 0x348   :  { %v2130_v40 = vpop.xlane.xlu0 %2129 }
 0x349   :  { %v2149_v46 = vmax.f32 %v2130_v40, 1e-12  ;;  %v2307_v40 = vrot.slane %v2241_v56, %v5389_v17 }
 0x34b   :  { %v2132_v9 = vpop.xlane.xlu1 %2131  ;;  %3570 = vrsqrt.f32 %v2149_v46  ;;  %v2312_v46 = vrot.slane %v2242_v35, %v5390_v20 }
 0x34c   :  { %v2387_v55 = vpop.xlane.xlu0 %2386  ;;  %v2150_v14 = vmax.f32 %v2132_v9, 1e-12  ;;  %3572 = vrsqrt.f32 %v2405_v49  ;;  %v3569_v9 = vpop.eup %3568  ;;  %v2564_v49 = vrot.slane %v2498_v27, %v5389_v17 }
 0x34d   :  { %v2406_v1 = vmax.f32 %v2387_v55, 1e-12  ;;  %v2500_v56 = vmul.f32 %v3569_v9, %v2479_v34 }
 0x34e   :  { %3574 = vrsqrt.f32 %v2150_v14 }
 0x34f   :  { %v2389_v47 = vpop.xlane.xlu1 %2388  ;;  %3576 = vrsqrt.f32 %v2406_v1  ;;  %v2308_v1 = vsel %vm1265_vm7, %v2307_v40, %v5000_v33  ;;  %v2574_v62 = vrot.slane %v2500_v56, %v5391_v21 }
 0x350   :  { %v2226_v43 = vpop.xlane.xlu0 %2225  ;;  %v2407_v30 = vmax.f32 %v2389_v47, 1e-12  ;;  %v2499_v47 = vmul.f32 %v3565_v45, %v5036_v11  ;;  %v2313_v27 = vsel %vm1272_vm8, %v2312_v46, %v2308_v1  ;;  %v2565_v11 = vsel %vm1265_vm7, %v2564_v49, %v5020_v13 }
 0x351   :  { %v2318_v40 = vsel %vm1279_vm9, %v2317_v26, %v2313_v27 }
 0x352   :  { %3578 = vrsqrt.f32 %v2407_v30  ;;  %v2569_v45 = vrot.slane %v2499_v47, %v5390_v20  ;;  %v2323_v47 = vsel %vm1286_vm10, %v2322_v6, %v2318_v40 }
 0x353   :  { %v2228_v61 = vpop.xlane.xlu1 %2227 }
 0x354   :  { %v2483_v63 = vpop.xlane.xlu0 %2482  ;;  %v2570_v13 = vsel %vm1272_vm8, %v2569_v45, %v2565_v11 }
 0x355   :  { %v3571_v4 = vpop.eup %3570 }
 0x356   :  { %v3573_v22 = vpop.eup %3572  ;;  %v2245_v39 = vmul.f32 %v3571_v4, %v2226_v43 }
 0x357   :  { %v2485_v24 = vpop.xlane.xlu1 %2484  ;;  %v2501_v34 = vmul.f32 %v3573_v22, %v5050_v23 }
 0x358   :  { %v2134_v37 = vpop.xlane.xlu0 %2133  ;;  %v3575_v44 = vpop.eup %3574  ;;  %v2327_v9 = vrot.slane %v2245_v39, %v4758_v59 }
 0x359   :  { %v2151_v48 = vmax.f32 %v2134_v37, 1e-12  ;;  %v3577_v37 = vpop.eup %3576  ;;  %v2246_v43 = vmul.f32 %v3575_v44, %v2228_v61 }
 0x35a   :  { %v2502_v4 = vmul.f32 %v3577_v37, %v2483_v63  ;;  %v2328_v22 = vsel %vm1293_vm11, %v2327_v9, %v2323_v47 }
 0x35b   :  { %3580 = vrsqrt.f32 %v2151_v48  ;;  %v2136_v55 = vpop.xlane.xlu1 %2135  ;;  %v2332_v23 = vrot.slane %v2246_v43, %v4769_v52 }
 0x35c   :  { %v2152_v54 = vmax.f32 %v2136_v55, 1e-12  ;;  %v2391_v14 = vpop.xlane.xlu0 %2390  ;;  %v3579_v2 = vpop.eup %3578  ;;  %v2584_v63 = vrot.slane %v2502_v4, %v4758_v59 }
 0x35d   :  { %v2408_v30 = vmax.f32 %v2391_v14, 1e-12  ;;  %v2503_v61 = vmul.f32 %v3579_v2, %v2485_v24  ;;  %v2575_v14 = vsel %vm1279_vm9, %v2574_v62, %v2570_v13  ;;  %v2333_v37 = vsel %vm1300_vm12, %v2332_v23, %v2328_v22 }
 0x35e   :  { %3582 = vrsqrt.f32 %v2152_v54  ;;  %v2579_v54 = vrot.slane %v2501_v34, %v4729_v36  ;;  %v2652_v22 = vmax.f32 %v4878_v5, 1e-12  ;;  %v2653_v5 = vmax.f32 %v4911_v18, 1e-12 }
 0x35f   :  { %3584 = vrsqrt.f32 %v2408_v30  ;;  %v2393_v35 = vpop.xlane.xlu1 %2392 }
 0x360   :  { %v2409_v48 = vmax.f32 %v2393_v35, 1e-12  ;;  %v2230_v33 = vpop.xlane.xlu0 %2229  ;;  %v2580_v39 = vsel %vm1286_vm10, %v2579_v54, %v2575_v14  ;;  %v2589_v35 = vrot.slane %v2503_v61, %v4769_v52  ;;  %v2651_v14 = vmax.f32 %v4874_v28, 1e-12 }
 0x361   :  { %v2585_v27 = vsel %vm1293_vm11, %v2584_v63, %v2580_v39 }
 0x362   :  { %3586 = vrsqrt.f32 %v2409_v48  ;;  %v2590_v43 = vsel %vm1300_vm12, %v2589_v35, %v2585_v27 }
 0x363   :  { %v5071_v55 = vpop.xlane.xlu1 %2882  ;;  %3588 = vrsqrt.f32 %v2651_v14 }
 0x364   :  { %v2487_v46 = vpop.xlane.xlu0 %2486  ;;  %3590 = vrsqrt.f32 %v2652_v22  ;;  %v2911_v18 = vmax.f32 %v5071_v55, 1e-12  ;;  %v2656_v22 = vmax.f32 %v4945_v0, 1e-12 }
 0x365   :  { %v3581_v49 = vpop.eup %3580 }
 0x366   :  { %v2247_v1 = vmul.f32 %v3581_v49, %v2230_v33 }
 0x367   :  { %v2232_v26 = vpop.xlane.xlu1 %2231 }
 0x368   :  { %v3583_v58 = vpop.eup %3582  ;;  %v2337_v30 = vrot.slane %v2247_v1, %v4808_v25  ;;  %v2881_v44 = vpop.xlane.xlu0 %2880 }
 0x369   :  { %v3585_v56 = vpop.eup %3584  ;;  %v2248_v24 = vmul.f32 %v3583_v58, %v2232_v26  ;;  %v2908_v26 = vmax.f32 %v4888_v60, 1e-12  ;;  %v2910_v60 = vmax.f32 %v2881_v44, 1e-12 }
 0x36a   :  { %v2338_v11 = vsel %vm1307_vm13, %v2337_v30, %v2333_v37  ;;  %v2504_v45 = vmul.f32 %v3585_v56, %v2487_v46  ;;  %v2909_v56 = vmax.f32 %v4892_v7, 1e-12 }
 0x36b   :  { %v2342_v48 = vrot.slane %v2248_v24, %v4817_v12  ;;  %v2489_v33 = vpop.xlane.xlu1 %2488  ;;  %3592 = vrsqrt.f32 %v2908_v26 }
 0x36c   :  { %v3587_v40 = vpop.eup %3586  ;;  %v2594_v6 = vrot.slane %v2504_v45, %v4808_v25  ;;  %v5088_v34 = vpop.xlane.xlu0 %2884  ;;  %3594 = vrsqrt.f32 %v2909_v56 }
 0x36d   :  { %v2343_v2 = vsel %vm1314_vm14, %v2342_v48, %v2338_v11  ;;  %v2505_v62 = vmul.f32 %v3587_v40, %v2489_v33  ;;  %v3589_v37 = vpop.eup %3588  ;;  %3596 = vrsqrt.f32 %v2653_v5  ;;  %v2654_v48 = vmax.f32 %v4918_v57, 1e-12 }
 0x36e   :  { %v2595_v9 = vsel %vm1307_vm13, %v2594_v6, %v2590_v43  ;;  %2345 = vst [vmem:[#allocation7 + $0x4] sm:$0x1] %v2343_v2  ;;  %v3591_v24 = vpop.eup %3590  ;;  %3598 = vrsqrt.f32 %v2910_v60  ;;  %v2912_v14 = vmax.f32 %v5088_v34, 1e-12  ;;  %v2657_v34 = vmax.f32 %v4969_v50, 1e-12 }
 0x36f   :  { %v2599_v4 = vrot.slane %v2505_v62, %v4817_v12  ;;  %v5094_v13 = vpop.xlane.xlu1 %2886  ;;  %3600 = vrsqrt.f32 %v2654_v48  ;;  %v2655_v62 = vmax.f32 %v4941_v3, 1e-12 }
 0x370   :  { %v5096_v46 = vpop.xlane.xlu0 %2888  ;;  %3602 = vrsqrt.f32 %v2911_v18 }
 0x371   :  { %v2600_v49 = vsel %vm1314_vm14, %v2599_v4, %v2595_v9  ;;  %3604 = vrsqrt.f32 %v2655_v62  ;;  %v2914_v48 = vmax.f32 %v5096_v46, 1e-12 }
 0x372   :  { %2602 = vst [vmem:[#allocation7 + $0x5] sm:$0x1] %v2600_v49  ;;  %3606 = vrsqrt.f32 %v2912_v14 }
 0x373   :  { %v5099_v47 = vpop.xlane.xlu1 %2890  ;;  %3608 = vrsqrt.f32 %v2656_v22 }
 0x374   :  { %v5101_v54 = vpop.xlane.xlu0 %2892 }
 0x375   :  { %v3593_v43 = vpop.eup %3592 }
 0x376   :  { %v3595_v9 = vpop.eup %3594 }
 0x377   :  { %v5103_v23 = vpop.xlane.xlu1 %2894  ;;  %v3597_v56 = vpop.eup %3596 }
 0x378   :  { %v5105_v61 = vpop.xlane.xlu0 %2896  ;;  %v3599_v0 = vpop.eup %3598 }
 0x37b   :  { %v5109_v63 = vpop.xlane.xlu1 %2898 }
 0x37c   :  { %v5111_v1 = vpop.xlane.xlu0 %2643 }
 0x37f   :  { %v5114_v58 = vpop.xlane.xlu1 %2900 }
 0x380   :  { %v5116_v30 = vpop.xlane.xlu0 %2645 }
 0x383   :  { %v5119_v39 = vpop.xlane.xlu1 %2902 }
 0x384   :  { %v5121_v28 = vpop.xlane.xlu0 %2647 }
 0x387   :  { %v2716_v35 = vpop.xlane.xlu1 %2715 }
 0x388   :  { %v2747_v27 = vmul.f32 %v3589_v37, %v2716_v35  ;;  %v2718_v11 = vpop.xlane.xlu0 %2717 }
 0x389   :  { %v2748_v45 = vmul.f32 %v3591_v24, %v2718_v11  ;;  %v2913_v24 = vmax.f32 %v5094_v13, 1e-12 }
 0x38a   :  { %v2782_v7 = vrot.slane %v2747_v27, %v5357_v42 }
 0x38b   :  { %v2786_v33 = vrot.slane %v2748_v45, %v5358_v15  ;;  %v5127_v40 = vpop.xlane.xlu1 %2904  ;;  %3610 = vrsqrt.f32 %v2913_v24 }
 0x38c   :  { %v2973_v6 = vpop.xlane.xlu0 %2972  ;;  %3612 = vrsqrt.f32 %v2657_v34 }
 0x38d   :  { %v2787_v2 = vsel %vm1216_vm0, %v2786_v33, %v2782_v7  ;;  %v3004_v44 = vmul.f32 %v3593_v43, %v2973_v6  ;;  %v2658_v33 = vmax.f32 %v4975_v19, 1e-12  ;;  %3614 = vrsqrt.f32 %v2914_v48 }
 0x38e   :  { %v2659_v19 = vmax.f32 %v5007_v16, 1e-12  ;;  %v2660_v16 = vmax.f32 %v5013_v10, 1e-12  ;;  %v2661_v10 = vmax.f32 %v5044_v53, 1e-12 }
 0x38f   :  { %v2975_v4 = vpop.xlane.xlu1 %2974  ;;  %v3039_v55 = vrot.slane %v3004_v44, %v5357_v42  ;;  %v3601_v42 = vpop.eup %3600  ;;  %3616 = vrsqrt.f32 %v2658_v33  ;;  %v2662_v53 = vmax.f32 %v5046_v38, 1e-12 }
 0x390   :  { %v3005_v57 = vmul.f32 %v3595_v9, %v2975_v4  ;;  %v5132_v49 = vpop.xlane.xlu0 %2649  ;;  %v3603_v6 = vpop.eup %3602  ;;  %v2915_v9 = vmax.f32 %v5099_v47, 1e-12  ;;  %v2916_v47 = vmax.f32 %v5101_v54, 1e-12  ;;  %v2917_v54 = vmax.f32 %v5103_v23, 1e-12 }
 0x391   :  { %v3605_v18 = vpop.eup %3604  ;;  %v2918_v23 = vmax.f32 %v5105_v61, 1e-12 }
 0x392   :  { %v3043_v26 = vrot.slane %v3005_v57, %v5358_v15  ;;  %v3607_v57 = vpop.eup %3606  ;;  %3618 = vrsqrt.f32 %v2915_v9 }
 0x393   :  { %v2720_v5 = vpop.xlane.xlu1 %2719  ;;  %3620 = vrsqrt.f32 %v2659_v19 }
 0x394   :  { %v3044_v3 = vsel %vm1216_vm0, %v3043_v26, %v3039_v55  ;;  %v2749_v37 = vmul.f32 %v3597_v56, %v2720_v5  ;;  %v5139_v35 = vpop.xlane.xlu0 %2906  ;;  %v3609_v55 = vpop.eup %3608  ;;  %3622 = vrsqrt.f32 %v2916_v47 }
 0x395   :  { %v3611_v24 = vpop.eup %3610  ;;  %3624 = vrsqrt.f32 %v2660_v16 }
 0x396   :  { %v2791_v27 = vrot.slane %v2749_v37, %v5364_v41  ;;  %3626 = vrsqrt.f32 %v2917_v54  ;;  %v2920_v54 = vmax.f32 %v5114_v58, 1e-12 }
 0x397   :  { %v2977_v11 = vpop.xlane.xlu1 %2976  ;;  %3628 = vrsqrt.f32 %v2661_v10  ;;  %v2921_v10 = vmax.f32 %v5119_v39, 1e-12 }
 0x398   :  { %v2792_v15 = vsel %vm1223_vm1, %v2791_v27, %v2787_v2  ;;  %v3006_v60 = vmul.f32 %v3599_v0, %v2977_v11  ;;  %v2722_v45 = vpop.xlane.xlu0 %2721  ;;  %v3613_v0 = vpop.eup %3612  ;;  %3630 = vrsqrt.f32 %v2918_v23 }
 0x399   :  { %v2750_v7 = vmul.f32 %v3601_v42, %v2722_v45  ;;  %v3615_v48 = vpop.eup %3614  ;;  %3632 = vrsqrt.f32 %v2662_v53 }
 0x39a   :  { %v3048_v13 = vrot.slane %v3006_v60, %v5364_v41 }
 0x39b   :  { %v2796_v50 = vrot.slane %v2750_v7, %v5365_v8  ;;  %v2979_v43 = vpop.xlane.xlu1 %2978 }
 0x39c   :  { %v3049_v62 = vsel %vm1223_vm1, %v3048_v13, %v3044_v3  ;;  %v3007_v44 = vmul.f32 %v3603_v6, %v2979_v43  ;;  %v2724_v2 = vpop.xlane.xlu0 %2723  ;;  %v3617_v13 = vpop.eup %3616 }
 0x39d   :  { %v2797_v46 = vsel %vm1230_vm2, %v2796_v50, %v2792_v15  ;;  %v2751_v4 = vmul.f32 %v3605_v18, %v2724_v2 }
 0x39e   :  { %v3053_v41 = vrot.slane %v3007_v44, %v5365_v8  ;;  %v3619_v44 = vpop.eup %3618 }
 0x39f   :  { %v2801_v14 = vrot.slane %v2751_v4, %v5369_v51  ;;  %v2981_v22 = vpop.xlane.xlu1 %2980 }
 0x3a0   :  { %v3054_v26 = vsel %vm1230_vm2, %v3053_v41, %v3049_v62  ;;  %v3008_v56 = vmul.f32 %v3607_v57, %v2981_v22  ;;  %v2726_v5 = vpop.xlane.xlu0 %2725 }
 0x3a1   :  { %v2802_v3 = vsel %vm1237_vm3, %v2801_v14, %v2797_v46  ;;  %v2752_v37 = vmul.f32 %v3609_v55, %v2726_v5  ;;  %v3621_v46 = vpop.eup %3620 }
 0x3a2   :  { %v3058_v8 = vrot.slane %v3008_v56, %v5369_v51  ;;  %v3623_v22 = vpop.eup %3622 }
 0x3a3   :  { %v2806_v34 = vrot.slane %v2752_v37, %v5372_v31  ;;  %v2983_v27 = vpop.xlane.xlu1 %2982  ;;  %v3625_v55 = vpop.eup %3624  ;;  %v2919_v37 = vmax.f32 %v5109_v63, 1e-12 }
 0x3a4   :  { %v3059_v11 = vsel %vm1237_vm3, %v3058_v8, %v3054_v26  ;;  %v3009_v42 = vmul.f32 %v3611_v24, %v2983_v27  ;;  %v2728_v15 = vpop.xlane.xlu0 %2727  ;;  %v3627_v8 = vpop.eup %3626  ;;  %v2663_v24 = vmax.f32 %v5111_v1, 1e-12 }
 0x3a5   :  { %v2807_v60 = vsel %vm1244_vm4, %v2806_v34, %v2802_v3  ;;  %v2753_v45 = vmul.f32 %v3613_v0, %v2728_v15  ;;  %v3629_v27 = vpop.eup %3628  ;;  %v2664_v0 = vmax.f32 %v5116_v30, 1e-12  ;;  %3634 = vrsqrt.f32 %v2919_v37 }
 0x3a6   :  { %v3063_v51 = vrot.slane %v3009_v42, %v5372_v31  ;;  %3636 = vrsqrt.f32 %v2663_v24 }
 0x3a7   :  { %v2811_v7 = vrot.slane %v2753_v45, %v5381_v29  ;;  %v2985_v33 = vpop.xlane.xlu1 %2984  ;;  %v3631_v45 = vpop.eup %3630  ;;  %3638 = vrsqrt.f32 %v2664_v0 }
 0x3a8   :  { %v3064_v6 = vsel %vm1244_vm4, %v3063_v51, %v3059_v11  ;;  %v3010_v50 = vmul.f32 %v3615_v48, %v2985_v33  ;;  %v2730_v43 = vpop.xlane.xlu0 %2729  ;;  %v3633_v48 = vpop.eup %3632  ;;  %3640 = vrsqrt.f32 %v2920_v54 }
 0x3a9   :  { %v2812_v18 = vsel %vm1251_vm5, %v2811_v7, %v2807_v60  ;;  %v2754_v62 = vmul.f32 %v3617_v13, %v2730_v43  ;;  %v2922_v13 = vmax.f32 %v5127_v40, 1e-12 }
 0x3aa   :  { %v3068_v31 = vrot.slane %v3010_v50, %v5381_v29 }
 0x3ab   :  { %v2816_v2 = vrot.slane %v2754_v62, %v5384_v32  ;;  %v2987_v9 = vpop.xlane.xlu1 %2986  ;;  %v2923_v62 = vmax.f32 %v5139_v35, 1e-12 }
 0x3ac   :  { %v3069_v4 = vsel %vm1251_vm5, %v3068_v31, %v3064_v6  ;;  %v3011_v19 = vmul.f32 %v3619_v44, %v2987_v9  ;;  %v2732_v41 = vpop.xlane.xlu0 %2731 }
 0x3ad   :  { %v2817_v61 = vsel %vm1258_vm6, %v2816_v2, %v2812_v18  ;;  %v2755_v57 = vmul.f32 %v3621_v46, %v2732_v41 }
 0x3ae   :  { %v3073_v14 = vrot.slane %v3011_v19, %v5384_v32 }
 0x3af   :  { %v2821_v38 = vrot.slane %v2755_v57, %v5389_v17  ;;  %v2989_v29 = vpop.xlane.xlu1 %2988  ;;  %v3635_v31 = vpop.eup %3634 }
 0x3b0   :  { %v3074_v26 = vsel %vm1258_vm6, %v3073_v14, %v3069_v4  ;;  %v3012_v56 = vmul.f32 %v3623_v22, %v2989_v29  ;;  %v2734_v5 = vpop.xlane.xlu0 %2733  ;;  %v3637_v2 = vpop.eup %3636 }
 0x3b1   :  { %v2822_v47 = vsel %vm1265_vm7, %v2821_v38, %v2817_v61  ;;  %v2756_v3 = vmul.f32 %v3625_v55, %v2734_v5 }
 0x3b2   :  { %v3078_v16 = vrot.slane %v3012_v56, %v5389_v17  ;;  %v2665_v17 = vmax.f32 %v5121_v28, 1e-12 }
 0x3b3   :  { %v2826_v32 = vrot.slane %v2756_v3, %v5390_v20  ;;  %v2991_v34 = vpop.xlane.xlu1 %2990 }
 0x3b4   :  { %v3079_v11 = vsel %vm1265_vm7, %v3078_v16, %v3074_v26  ;;  %v3013_v42 = vmul.f32 %v3627_v8, %v2991_v34  ;;  %v2736_v15 = vpop.xlane.xlu0 %2735  ;;  %3642 = vrsqrt.f32 %v2665_v17 }
 0x3b5   :  { %v2827_v60 = vsel %vm1272_vm8, %v2826_v32, %v2822_v47  ;;  %v2757_v63 = vmul.f32 %v3629_v27, %v2736_v15  ;;  %3644 = vrsqrt.f32 %v2921_v10 }
 0x3b6   :  { %v3083_v1 = vrot.slane %v3013_v42, %v5390_v20  ;;  %v2666_v20 = vmax.f32 %v5132_v49, 1e-12  ;;  %3646 = vrsqrt.f32 %v2922_v13  ;;  %v3639_v49 = vpop.eup %3638 }
 0x3b7   :  { %v2831_v30 = vrot.slane %v2757_v63, %v5391_v21  ;;  %v2993_v51 = vpop.xlane.xlu1 %2992  ;;  %v3641_v9 = vpop.eup %3640 }
 0x3b8   :  { %v3084_v7 = vsel %vm1272_vm8, %v3083_v1, %v3079_v11  ;;  %v3014_v58 = vmul.f32 %v3631_v45, %v2993_v51  ;;  %v2738_v33 = vpop.xlane.xlu0 %2737  ;;  %3648 = vrsqrt.f32 %v2666_v20 }
 0x3b9   :  { %v2832_v28 = vsel %vm1279_vm9, %v2831_v30, %v2827_v60  ;;  %v2758_v6 = vmul.f32 %v3633_v48, %v2738_v33  ;;  %3650 = vrsqrt.f32 %v2923_v62 }
 0x3ba   :  { %v3088_v39 = vrot.slane %v3014_v58, %v5391_v21 }
 0x3bb   :  { %v2836_v50 = vrot.slane %v2758_v6, %v4729_v36  ;;  %v2995_v43 = vpop.xlane.xlu1 %2994 }
 0x3bc   :  { %v3089_v23 = vsel %vm1279_vm9, %v3088_v39, %v3084_v7  ;;  %v2740_v18 = vpop.xlane.xlu0 %2739  ;;  %v3015_v41 = vmul.f32 %v3635_v31, %v2995_v43 }
 0x3bd   :  { %v2837_v40 = vsel %vm1286_vm10, %v2836_v50, %v2832_v28  ;;  %v2759_v21 = vmul.f32 %v3637_v2, %v2740_v18 }
 0x3be   :  { %v3643_v19 = vpop.eup %3642  ;;  %v3093_v5 = vrot.slane %v3015_v41, %v4729_v36 }
 0x3bf   :  { %v2997_v53 = vpop.xlane.xlu1 %2996  ;;  %v3645_v57 = vpop.eup %3644  ;;  %v2841_v35 = vrot.slane %v2759_v21, %v4758_v59 }
 0x3c0   :  { %v2742_v44 = vpop.xlane.xlu0 %2741  ;;  %v3016_v14 = vmul.f32 %v3641_v9, %v2997_v53  ;;  %v3647_v29 = vpop.eup %3646  ;;  %v3094_v36 = vsel %vm1286_vm10, %v3093_v5, %v3089_v23 }
 0x3c1   :  { %v2760_v46 = vmul.f32 %v3639_v49, %v2742_v44  ;;  %v2842_v24 = vsel %vm1293_vm11, %v2841_v35, %v2837_v40 }
 0x3c2   :  { %v3649_v56 = vpop.eup %3648  ;;  %v3098_v16 = vrot.slane %v3016_v14, %v4758_v59 }
 0x3c3   :  { %v2999_v4 = vpop.xlane.xlu1 %2998  ;;  %v2846_v55 = vrot.slane %v2760_v46, %v4769_v52  ;;  %v3651_v34 = vpop.eup %3650 }
 0x3c4   :  { %v2744_v61 = vpop.xlane.xlu0 %2743  ;;  %v3017_v38 = vmul.f32 %v3645_v57, %v2999_v4  ;;  %v3099_v59 = vsel %vm1293_vm11, %v3098_v16, %v3094_v36 }
 0x3c5   :  { %v2761_v22 = vmul.f32 %v3643_v19, %v2744_v61  ;;  %v2847_v27 = vsel %vm1300_vm12, %v2846_v55, %v2842_v24 }
 0x3c6   :  { %v3103_v32 = vrot.slane %v3017_v38, %v4769_v52 }
 0x3c7   :  { %v3001_v26 = vpop.xlane.xlu1 %3000  ;;  %v2851_v47 = vrot.slane %v2761_v22, %v4808_v25 }
 0x3c8   :  { %v3018_v3 = vmul.f32 %v3647_v29, %v3001_v26  ;;  %v2746_v37 = vpop.xlane.xlu0 %2745  ;;  %v3104_v52 = vsel %vm1300_vm12, %v3103_v32, %v3099_v59 }
 0x3c9   :  { %v2762_v8 = vmul.f32 %v3649_v56, %v2746_v37  ;;  %v2852_v15 = vsel %vm1307_vm13, %v2851_v47, %v2847_v27 }
 0x3ca   :  { %v3108_v0 = vrot.slane %v3018_v3, %v4808_v25 }
 0x3cb   :  { %v2856_v11 = vrot.slane %v2762_v8, %v4817_v12  ;;  %v3003_v42 = vpop.xlane.xlu1 %3002 }
 0x3cc   :  { %v3019_v54 = vmul.f32 %v3651_v34, %v3003_v42  ;;  %v3109_v25 = vsel %vm1307_vm13, %v3108_v0, %v3104_v52 }
 0x3cd   :  { %v2857_v60 = vsel %vm1314_vm14, %v2856_v11, %v2852_v15 }
 0x3ce   :  { %2859 = vst [vmem:[#allocation7 + $0x6] sm:$0x1] %v2857_v60  ;;  %v3113_v63 = vrot.slane %v3019_v54, %v4817_v12 }
 0x3d0   :  { %v3114_v17 = vsel %vm1314_vm14, %v3113_v63, %v3109_v25 }
 0x3d1   :  { %3116 = vst [vmem:[#allocation7 + $0x7] sm:$0x1] %v3114_v17 }
 0x3d2   :  { %3731 = shalt.err (!%p3728_p6)
}
 0x3d3   :  { %s3732_s12 = scalar_lea.hbm %s5232_s2, 128 }
 0x3d4   :  { %p3733_p7 = scmp.ne.s32.totalorder %s5232_s2, %s3732_s12  ;;  %p3736_p8 = scmp.lt.u32.totalorder %s3732_s12, %s5232_s2 }
 0x3d6   :  { %p3738_p9 = pnand %p3736_p8, %p3733_p7 }
 0x3d8   :  { %3741 = shalt.err (!%p3738_p9)
}
 0x3d9   :  { %3126 = dma.vmem_to_hbm [thread:$0]  %s3124_s8, 128, %s5232_s2, [#allocation4]  }
 0x3da   :  { %3746 = dma.done.wait [#allocation4], 128  }
 0x3db   :  { %3747 = vsyncadd [#allocation4], 4294967168 }
 0x3dc   :  { %3130 = vsyncpa [#allocation3], 1 }
 0x3dd   :  { %3131 = vsyncpa [#allocation6], 1 }
 0x3de   :  { %3132 = vsyncpa [#allocation4], 1 }

</bundles_post_ra>
